<compile_context>
chip_gen: v7x
topology: tpu7x:2x2x1
jax: 0.10.0
libtpu: 0.0.40
codegen_flags: <defaults>
</compile_context>

<pallas_src>
import functools

import jax
import jax.numpy as jnp
from jax import lax
from jax.experimental import pallas as pl
from jax.experimental.pallas import tpu as pltpu


# ----------------------------------------------------------------------------
# Pallas kernels
# ----------------------------------------------------------------------------
def _lstm_chunk_kernel(x_ref, wih_ref, whh_ref, b_ref, h0_ref, c0_ref,   # inputs
                       out_ref,                                          # output
                       h_sc, c_sc):                                      # scratch
    """One time-chunk of a single-layer LSTM.

    x_ref:   (chunk*B, D) time-major rows (row t*B+b = timestep t, batch b)
    wih_ref: (D, 4H)   whh_ref: (H, 4H)   b_ref: (1, 4H)  (gate order i,f,g,o)
    h0/c0:   (B, H) initial states; carried across grid steps in VMEM scratch.
    """
    step = pl.program_id(0)

    @pl.when(step == 0)
    def _():
        h_sc[...] = h0_ref[...]
        c_sc[...] = c0_ref[...]

    B, H = h_sc.shape
    rows = x_ref.shape[0]
    n_t = rows // B

    # Hoisted input projection for the whole chunk: one lane-dense MXU matmul.
    xg = jnp.dot(x_ref[...], wih_ref[...],
                 preferred_element_type=jnp.float32) + b_ref[...]      # (chunk*B, 4H)

    # Fully unrolled recurrence over the chunk (static indices -> static slices).
    for t in range(n_t):
        g = xg[t * B:(t + 1) * B, :] + jnp.dot(
            h_sc[...], whh_ref[...], preferred_element_type=jnp.float32)  # (B, 4H)
        i_g = jax.nn.sigmoid(g[:, 0 * H:1 * H])
        f_g = jax.nn.sigmoid(g[:, 1 * H:2 * H])
        g_g = jnp.tanh(g[:, 2 * H:3 * H])
        o_g = jax.nn.sigmoid(g[:, 3 * H:4 * H])
        c_new = f_g * c_sc[...] + i_g * g_g
        h_new = o_g * jnp.tanh(c_new)
        c_sc[...] = c_new
        h_sc[...] = h_new
        out_ref[t * B:(t + 1) * B, :] = h_new.astype(out_ref.dtype)


def _latent_states_kernel(bn, x_ref, w_ref, b_ref, gamma_ref, beta_ref, o_ref):
    """Fused Latent_states: Linear -> (BatchNorm1d over batch) -> ReLU.

    The h_state and c_state heads are concatenated along the output channel axis
    so both are produced by a single matmul / single kernel launch.
    """
    z = jnp.dot(x_ref[...], w_ref[...],
                preferred_element_type=jnp.float32) + b_ref[...]
    if bn:
        mean = jnp.mean(z, axis=0, keepdims=True)
        var = jnp.mean((z - mean) ** 2, axis=0, keepdims=True)
        z = (z - mean) * lax.rsqrt(var + 1e-5) * gamma_ref[...] + beta_ref[...]
    o_ref[...] = jnp.maximum(z, 0.0).astype(o_ref.dtype)


def _decoder_tail_kernel(bn, x_ref, gamma_ref, beta_ref, wo_ref, bo_ref, o_ref):
    """Fused tail: BN_Decoder_2 (training-mode stats over B*T) + Linear + LogSoftmax."""
    x = x_ref[...]
    if bn:
        mean = jnp.mean(x, axis=0, keepdims=True)
        var = jnp.mean((x - mean) ** 2, axis=0, keepdims=True)
        x = (x - mean) * lax.rsqrt(var + 1e-5) * gamma_ref[...] + beta_ref[...]
    logits = jnp.dot(x, wo_ref[...],
                     preferred_element_type=jnp.float32) + bo_ref[...]
    m = jnp.max(logits, axis=-1, keepdims=True)
    lse = m + jnp.log(jnp.sum(jnp.exp(logits - m), axis=-1, keepdims=True))
    o_ref[...] = (logits - lse).astype(o_ref.dtype)


# ----------------------------------------------------------------------------
# Wrappers
# ----------------------------------------------------------------------------
def lstm_layer(x_flat, w_ih, w_hh, bias, h0, c0, *, chunk):
    """x_flat: (T*B, D) time-major rows. Returns (T*B, H) hidden sequence."""
    n_rows, d_in = x_flat.shape
    batch, hidden = h0.shape
    n_steps = n_rows // batch
    if n_steps % chunk != 0:
        chunk = n_steps
    rows = chunk * batch
    return pl.pallas_call(
        _lstm_chunk_kernel,
        out_shape=jax.ShapeDtypeStruct((n_rows, hidden), jnp.float32),
        grid_spec=pltpu.PrefetchScalarGridSpec(
            num_scalar_prefetch=0,
            grid=(n_steps // chunk,),
            in_specs=[pl.BlockSpec((rows, d_in), lambda s: (s, 0)),
                      pl.BlockSpec((d_in, 4 * hidden), lambda s: (0, 0)),
                      pl.BlockSpec((hidden, 4 * hidden), lambda s: (0, 0)),
                      pl.BlockSpec((1, 4 * hidden), lambda s: (0, 0)),
                      pl.BlockSpec((batch, hidden), lambda s: (0, 0)),
                      pl.BlockSpec((batch, hidden), lambda s: (0, 0))],
            out_specs=pl.BlockSpec((rows, hidden), lambda s: (s, 0)),
            scratch_shapes=[pltpu.VMEM((batch, hidden), jnp.float32),
                            pltpu.VMEM((batch, hidden), jnp.float32)]),
        compiler_params=pltpu.CompilerParams(
            dimension_semantics=("arbitrary",)),   # time recurrence is serial
    )(x_flat, w_ih, w_hh, bias, h0, c0)


def latent_states(latent, p, *, bn):
    batch = latent.shape[0]
    c2 = p['w'].shape[1]                     # 2 * lstm_dim (h-head ++ c-head)
    out = pl.pallas_call(
        functools.partial(_latent_states_kernel, bn),
        out_shape=jax.ShapeDtypeStruct((batch, c2), jnp.float32),
    )(latent, p['w'], p['b'], p['gamma'], p['beta'])
    hidden = c2 // 2
    return out[:, :hidden], out[:, hidden:]


def decoder_tail(x_flat, p, *, bn):
    n_rows = x_flat.shape[0]
    out_dim = p['wo'].shape[1]
    return pl.pallas_call(
        functools.partial(_decoder_tail_kernel, bn),
        out_shape=jax.ShapeDtypeStruct((n_rows, out_dim), jnp.float32),
    )(x_flat, p['gamma2'], p['beta2'], p['wo'], p['bo'])


def model_forward(latent_input, decoder_inputs, params, *, bn=True, time_chunk=8):
    """Mirrors Model_NoEncoder_all.forward.

    latent_input:   (B, codelayer_dim)
    decoder_inputs: (B, T, dec_input_dim)   batch_first like PyTorch
    returns:        (B, output_dims, T)     (= x.permute(0, 2, 1) in the reference)
    """
    # ---- Latent_states: one fused kernel producing both dec_h and dec_c ----
    h0, c0 = latent_states(latent_input, params['latent'], bn=bn)

    b_sz, t_len, d_in = decoder_inputs.shape
    # time-major flat slab: row t*B + b  <->  (timestep t, batch b)
    x = jnp.transpose(decoder_inputs, (1, 0, 2)).reshape(t_len * b_sz, d_in)

    p1, p2 = params['lstm1'], params['lstm2']

    # ---- decoder_lstm_1 ----
    x1 = lstm_layer(x, p1['w_ih'], p1['w_hh'], p1['b_ih'] + p1['b_hh'],
                    h0, c0, chunk=time_chunk)

    # ---- BN_Decoder_1: fold the per-channel affine into decoder_lstm_2's
    #      input projection (only a cheap stats reduction runs in XLA). ----
    w_ih2 = p2['w_ih']
    b2 = p2['b_ih'] + p2['b_hh']
    if bn:
        mean = jnp.mean(x1, axis=0)
        var = jnp.mean((x1 - mean) ** 2, axis=0)
        scale = params['bn1_gamma'][0] * lax.rsqrt(var + 1e-5)
        shift = params['bn1_beta'][0] - mean * scale
        w_ih2 = w_ih2 * scale[:, None]
        b2 = b2 + (shift @ p2['w_ih'])[None, :]

    # ---- decoder_lstm_2 (initial state is (dec_h, dec_c) again, per the spec) ----
    x2 = lstm_layer(x1, w_ih2, p2['w_hh'], b2, h0, c0, chunk=time_chunk)

    # ---- BN_Decoder_2 + Dense_Decoder_2 (Linear + LogSoftmax), fused ----
    out_flat = decoder_tail(x2, params['tail'], bn=bn)          # (T*B, O)
    out = out_flat.reshape(t_len, b_sz, -1)
    return jnp.transpose(out, (1, 2, 0))                         # (B, O, T)


# ----------------------------------------------------------------------------
# Deterministic parameter initialization (shapes follow the nn.Module __init__)
# ----------------------------------------------------------------------------
def init_params(key, *, dec_input_dim, lstm_dim, codelayer_dim, output_dims):
    hidden = lstm_dim
    keys = iter(jax.random.split(key, 16))

    def u(k, shape, fan_in):
        bound = 1.0 / float(fan_in) ** 0.5
        return jax.random.uniform(k, shape, jnp.float32, -bound, bound)

    def lstm_p(d_in):
        return {
            'w_ih': u(next(keys), (d_in, 4 * hidden), hidden),
            'w_hh': u(next(keys), (hidden, 4 * hidden), hidden),
            'b_ih': u(next(keys), (1, 4 * hidden), hidden),
            'b_hh': u(next(keys), (1, 4 * hidden), hidden),
        }

    latent = {
        'w': jnp.concatenate([u(next(keys), (codelayer_dim, hidden), codelayer_dim),
                              u(next(keys), (codelayer_dim, hidden), codelayer_dim)],
                             axis=1),
        'b': jnp.concatenate([u(next(keys), (1, hidden), codelayer_dim),
                              u(next(keys), (1, hidden), codelayer_dim)], axis=1),
        'gamma': jnp.ones((1, 2 * hidden), jnp.float32),
        'beta': jnp.zeros((1, 2 * hidden), jnp.float32),
    }
    tail = {
        'gamma2': jnp.ones((1, hidden), jnp.float32),
        'beta2': jnp.zeros((1, hidden), jnp.float32),
        'wo': u(next(keys), (hidden, output_dims), hidden),
        'bo': u(next(keys), (1, output_dims), hidden),
    }
    return {
        'latent': latent,
        'lstm1': lstm_p(dec_input_dim),
        'lstm2': lstm_p(hidden),
        'bn1_gamma': jnp.ones((1, hidden), jnp.float32),
        'bn1_beta': jnp.zeros((1, hidden), jnp.float32),
        'tail': tail,
    }


if __name__ == "__main__":
    key = jax.random.PRNGKey(0)
    pkey, lkey, dkey = jax.random.split(key, 3)

    B = 2
    T = 8                    # decoder sequence length
    dec_input_dim = 16       # args.dec_input_shape[-1]
    lstm_dim = 32            # args.lstm_dim  -> gate lane dim 4H = 128 (lane dense)
    codelayer_dim = 32       # args.codelayer_dim
    output_dims = 16         # args.output_dims
    bn = True                # args.bn          (td_dense_dim = 0)

    params = init_params(pkey, dec_input_dim=dec_input_dim, lstm_dim=lstm_dim,
                         codelayer_dim=codelayer_dim, output_dims=output_dims)
    latent_input = jax.random.normal(lkey, (B, codelayer_dim), jnp.float32)
    decoder_inputs = jax.random.normal(dkey, (B, T, dec_input_dim), jnp.float32)

    fwd = jax.jit(functools.partial(model_forward, bn=bn, time_chunk=8))
    out = fwd(latent_input, decoder_inputs, params)
    out = jax.block_until_ready(out)

    assert out.shape == (B, output_dims, T), out.shape
    assert bool(jnp.all(jnp.isfinite(out)))
    # log-softmax sanity: probabilities over the class dim must sum to 1
    probs = jnp.exp(jnp.transpose(out, (0, 2, 1)))         # (B, T, O)
    assert bool(jnp.allclose(jnp.sum(probs, axis=-1), 1.0, atol=1e-3))
    print("KERNEL_OK")
</pallas_src>

<mosaic_0001>
module attributes {stable_mosaic.version = 11 : i64} {
  func.func @_latent_states_kernel(%arg0: memref<2x32xf32, #tpu.memory_space<vmem>>, %arg1: memref<32x64xf32, #tpu.memory_space<vmem>>, %arg2: memref<1x64xf32, #tpu.memory_space<vmem>>, %arg3: memref<1x64xf32, #tpu.memory_space<vmem>>, %arg4: memref<1x64xf32, #tpu.memory_space<vmem>>, %arg5: memref<2x64xf32, #tpu.memory_space<vmem>>) attributes {dimension_semantics = [], scalar_prefetch = 0 : i64, scratch_operands = 0 : i64, tpu.core_type = #tpu.core_type<tc>} {
    %c0 = arith.constant 0 : index
    %c0_0 = arith.constant 0 : index
    %0 = vector.load %arg0[%c0, %c0_0] : memref<2x32xf32, #tpu.memory_space<vmem>>, vector<2x32xf32>
    %c0_1 = arith.constant 0 : index
    %c0_2 = arith.constant 0 : index
    %1 = vector.load %arg1[%c0_1, %c0_2] : memref<32x64xf32, #tpu.memory_space<vmem>>, vector<32x64xf32>
    %cst = arith.constant dense<0.000000e+00> : vector<2x64xf32>
    %2 = tpu.matmul %0, %1, %cst {dimension_numbers = #tpu.dot_dimension_numbers<[1], [0], [0], [1], [0, 0, 1, 1], [], []>} : vector<2x32xf32>, vector<32x64xf32>, vector<2x64xf32> -> vector<2x64xf32>
    %c0_3 = arith.constant 0 : index
    %c0_4 = arith.constant 0 : index
    %3 = vector.load %arg2[%c0_3, %c0_4] : memref<1x64xf32, #tpu.memory_space<vmem>>, vector<1x64xf32>
    %4 = vector.broadcast %3 : vector<1x64xf32> to vector<2x64xf32>
    %5 = arith.addf %2, %4 : vector<2x64xf32>
    %cst_5 = arith.constant dense<0.000000e+00> : vector<64xf32>
    %6 = vector.multi_reduction <add>, %5, %cst_5 [0] : vector<2x64xf32> to vector<64xf32>
    %7 = vector.shape_cast %6 : vector<64xf32> to vector<1x64xf32>
    %cst_6 = arith.constant 2.000000e+00 : f32
    %8 = vector.broadcast %cst_6 : f32 to vector<1x64xf32>
    %9 = arith.divf %7, %8 : vector<1x64xf32>
    %10 = vector.broadcast %9 : vector<1x64xf32> to vector<2x64xf32>
    %11 = arith.subf %5, %10 : vector<2x64xf32>
    %12 = arith.mulf %11, %11 : vector<2x64xf32>
    %cst_7 = arith.constant dense<0.000000e+00> : vector<64xf32>
    %13 = vector.multi_reduction <add>, %12, %cst_7 [0] : vector<2x64xf32> to vector<64xf32>
    %14 = vector.shape_cast %13 : vector<64xf32> to vector<1x64xf32>
    %cst_8 = arith.constant 2.000000e+00 : f32
    %15 = vector.broadcast %cst_8 : f32 to vector<1x64xf32>
    %16 = arith.divf %14, %15 : vector<1x64xf32>
    %17 = vector.broadcast %9 : vector<1x64xf32> to vector<2x64xf32>
    %18 = arith.subf %5, %17 : vector<2x64xf32>
    %cst_9 = arith.constant 9.99999974E-6 : f32
    %19 = vector.broadcast %cst_9 : f32 to vector<1x64xf32>
    %20 = arith.addf %16, %19 : vector<1x64xf32>
    %21 = math.rsqrt %20 : vector<1x64xf32>
    %22 = vector.broadcast %21 : vector<1x64xf32> to vector<2x64xf32>
    %23 = arith.mulf %18, %22 : vector<2x64xf32>
    %c0_10 = arith.constant 0 : index
    %c0_11 = arith.constant 0 : index
    %24 = vector.load %arg3[%c0_10, %c0_11] : memref<1x64xf32, #tpu.memory_space<vmem>>, vector<1x64xf32>
    %25 = vector.broadcast %24 : vector<1x64xf32> to vector<2x64xf32>
    %26 = arith.mulf %23, %25 : vector<2x64xf32>
    %c0_12 = arith.constant 0 : index
    %c0_13 = arith.constant 0 : index
    %27 = vector.load %arg4[%c0_12, %c0_13] : memref<1x64xf32, #tpu.memory_space<vmem>>, vector<1x64xf32>
    %28 = vector.broadcast %27 : vector<1x64xf32> to vector<2x64xf32>
    %29 = arith.addf %26, %28 : vector<2x64xf32>
    %cst_14 = arith.constant 0.000000e+00 : f32
    %30 = vector.broadcast %cst_14 : f32 to vector<2x64xf32>
    %31 = arith.maximumf %29, %30 : vector<2x64xf32>
    %c0_15 = arith.constant 0 : index
    %c0_16 = arith.constant 0 : index
    %32 = vector.load %arg5[%c0_15, %c0_16] : memref<2x64xf32, #tpu.memory_space<vmem>>, vector<2x64xf32>
    tpu.vector_store %arg5[%c0_15, %c0_16], %31 {strides = array<i32>} : memref<2x64xf32, #tpu.memory_space<vmem>>, vector<2x64xf32>,
    return
  }
}

module attributes {stable_mosaic.version = 11 : i64} {
  func.func @_lstm_chunk_kernel(%arg0: i32, %arg1: memref<16x16xf32, #tpu.memory_space<vmem>>, %arg2: memref<16x128xf32, #tpu.memory_space<vmem>>, %arg3: memref<32x128xf32, #tpu.memory_space<vmem>>, %arg4: memref<1x128xf32, #tpu.memory_space<vmem>>, %arg5: memref<2x32xf32, #tpu.memory_space<vmem>>, %arg6: memref<2x32xf32, #tpu.memory_space<vmem>>, %arg7: memref<16x32xf32, #tpu.memory_space<vmem>>, %arg8: memref<2x32xf32, #tpu.memory_space<vmem>>, %arg9: memref<2x32xf32, #tpu.memory_space<vmem>>) attributes {dimension_semantics = [#tpu.dimension_semantics<arbitrary>], iteration_bounds = array<i64: 1>, scalar_prefetch = 0 : i64, scratch_operands = 2 : i64, tpu.core_type = #tpu.core_type<tc>, window_params = [{transform_indices = @transform_0, window_bounds = array<i64: 16, 16>}, {pipeline_mode = #tpu.pipeline_mode<synchronous>, transform_indices = @transform_1, window_bounds = array<i64: 16, 128>}, {pipeline_mode = #tpu.pipeline_mode<synchronous>, transform_indices = @transform_2, window_bounds = array<i64: 32, 128>}, {pipeline_mode = #tpu.pipeline_mode<synchronous>, transform_indices = @transform_3, window_bounds = array<i64: 1, 128>}, {pipeline_mode = #tpu.pipeline_mode<synchronous>, transform_indices = @transform_4, window_bounds = array<i64: 2, 32>}, {pipeline_mode = #tpu.pipeline_mode<synchronous>, transform_indices = @transform_5, window_bounds = array<i64: 2, 32>}, {transform_indices = @transform_6, window_bounds = array<i64: 16, 32>}]} {
    %c0_i32 = arith.constant 0 : i32
    %0 = arith.cmpi eq, %arg0, %c0_i32 : i32
    %1 = arith.extui %0 : i1 to i32
    %c0_i32_0 = arith.constant 0 : i32
    %2 = arith.cmpi ne, %1, %c0_i32_0 : i32
    scf.if %2 {
      %c0_127 = arith.constant 0 : index
      %c0_128 = arith.constant 0 : index
      %281 = vector.load %arg5[%c0_127, %c0_128] : memref<2x32xf32, #tpu.memory_space<vmem>>, vector<2x32xf32>
      %c0_129 = arith.constant 0 : index
      %c0_130 = arith.constant 0 : index
      %282 = vector.load %arg8[%c0_129, %c0_130] : memref<2x32xf32, #tpu.memory_space<vmem>>, vector<2x32xf32>
      tpu.vector_store %arg8[%c0_129, %c0_130], %281 {strides = array<i32>} : memref<2x32xf32, #tpu.memory_space<vmem>>, vector<2x32xf32>,
      %c0_131 = arith.constant 0 : index
      %c0_132 = arith.constant 0 : index
      %283 = vector.load %arg6[%c0_131, %c0_132] : memref<2x32xf32, #tpu.memory_space<vmem>>, vector<2x32xf32>
      %c0_133 = arith.constant 0 : index
      %c0_134 = arith.constant 0 : index
      %284 = vector.load %arg9[%c0_133, %c0_134] : memref<2x32xf32, #tpu.memory_space<vmem>>, vector<2x32xf32>
      tpu.vector_store %arg9[%c0_133, %c0_134], %283 {strides = array<i32>} : memref<2x32xf32, #tpu.memory_space<vmem>>, vector<2x32xf32>,
    } else {
    }
    %c0 = arith.constant 0 : index
    %c0_1 = arith.constant 0 : index
    %3 = vector.load %arg1[%c0, %c0_1] : memref<16x16xf32, #tpu.memory_space<vmem>>, vector<16x16xf32>
    %c0_2 = arith.constant 0 : index
    %c0_3 = arith.constant 0 : index
    %4 = vector.load %arg2[%c0_2, %c0_3] : memref<16x128xf32, #tpu.memory_space<vmem>>, vector<16x128xf32>
    %cst = arith.constant dense<0.000000e+00> : vector<16x128xf32>
    %5 = tpu.matmul %3, %4, %cst {dimension_numbers = #tpu.dot_dimension_numbers<[1], [0], [0], [1], [0, 0, 1, 1], [], []>} : vector<16x16xf32>, vector<16x128xf32>, vector<16x128xf32> -> vector<16x128xf32>
    %c0_4 = arith.constant 0 : index
    %c0_5 = arith.constant 0 : index
    %6 = vector.load %arg4[%c0_4, %c0_5] : memref<1x128xf32, #tpu.memory_space<vmem>>, vector<1x128xf32>
    %7 = vector.broadcast %6 : vector<1x128xf32> to vector<16x128xf32>
    %8 = arith.addf %5, %7 : vector<16x128xf32>
    %9 = vector.extract_strided_slice %8 {offsets = [0, 0], sizes = [2, 128], strides = [1, 1]} : vector<16x128xf32> to vector<2x128xf32>
    %c0_6 = arith.constant 0 : index
    %c0_7 = arith.constant 0 : index
    %10 = vector.load %arg8[%c0_6, %c0_7] : memref<2x32xf32, #tpu.memory_space<vmem>>, vector<2x32xf32>
    %c0_8 = arith.constant 0 : index
    %c0_9 = arith.constant 0 : index
    %11 = vector.load %arg3[%c0_8, %c0_9] : memref<32x128xf32, #tpu.memory_space<vmem>>, vector<32x128xf32>
    %cst_10 = arith.constant dense<0.000000e+00> : vector<2x128xf32>
    %12 = tpu.matmul %10, %11, %cst_10 {dimension_numbers = #tpu.dot_dimension_numbers<[1], [0], [0], [1], [0, 0, 1, 1], [], []>} : vector<2x32xf32>, vector<32x128xf32>, vector<2x128xf32> -> vector<2x128xf32>
    %13 = arith.addf %9, %12 : vector<2x128xf32>
    %14 = vector.extract_strided_slice %13 {offsets = [0, 0], sizes = [2, 32], strides = [1, 1]} : vector<2x128xf32> to vector<2x32xf32>
    %15 = arith.negf %14 : vector<2x32xf32>
    %16 = math.exp %15 : vector<2x32xf32>
    %cst_11 = arith.constant 1.000000e+00 : f32
    %17 = vector.broadcast %cst_11 : f32 to vector<2x32xf32>
    %18 = arith.addf %17, %16 : vector<2x32xf32>
    %19 = arith.divf %17, %18 : vector<2x32xf32>
    %20 = vector.extract_strided_slice %13 {offsets = [0, 32], sizes = [2, 32], strides = [1, 1]} : vector<2x128xf32> to vector<2x32xf32>
    %21 = arith.negf %20 : vector<2x32xf32>
    %22 = math.exp %21 : vector<2x32xf32>
    %cst_12 = arith.constant 1.000000e+00 : f32
    %23 = vector.broadcast %cst_12 : f32 to vector<2x32xf32>
    %24 = arith.addf %23, %22 : vector<2x32xf32>
    %25 = arith.divf %23, %24 : vector<2x32xf32>
    %26 = vector.extract_strided_slice %13 {offsets = [0, 64], sizes = [2, 32], strides = [1, 1]} : vector<2x128xf32> to vector<2x32xf32>
    %27 = math.tanh %26 : vector<2x32xf32>
    %28 = vector.extract_strided_slice %13 {offsets = [0, 96], sizes = [2, 32], strides = [1, 1]} : vector<2x128xf32> to vector<2x32xf32>
    %29 = arith.negf %28 : vector<2x32xf32>
    %30 = math.exp %29 : vector<2x32xf32>
    %cst_13 = arith.constant 1.000000e+00 : f32
    %31 = vector.broadcast %cst_13 : f32 to vector<2x32xf32>
    %32 = arith.addf %31, %30 : vector<2x32xf32>
    %33 = arith.divf %31, %32 : vector<2x32xf32>
    %c0_14 = arith.constant 0 : index
    %c0_15 = arith.constant 0 : index
    %34 = vector.load %arg9[%c0_14, %c0_15] : memref<2x32xf32, #tpu.memory_space<vmem>>, vector<2x32xf32>
    %35 = arith.mulf %25, %34 : vector<2x32xf32>
    %36 = arith.mulf %19, %27 : vector<2x32xf32>
    %37 = arith.addf %35, %36 : vector<2x32xf32>
    %38 = math.tanh %37 : vector<2x32xf32>
    %39 = arith.mulf %33, %38 : vector<2x32xf32>
    %c0_16 = arith.constant 0 : index
    %c0_17 = arith.constant 0 : index
    %40 = vector.load %arg9[%c0_16, %c0_17] : memref<2x32xf32, #tpu.memory_space<vmem>>, vector<2x32xf32>
    tpu.vector_store %arg9[%c0_16, %c0_17], %37 {strides = array<i32>} : memref<2x32xf32, #tpu.memory_space<vmem>>, vector<2x32xf32>,
    %c0_18 = arith.constant 0 : index
    %c0_19 = arith.constant 0 : index
    %41 = vector.load %arg8[%c0_18, %c0_19] : memref<2x32xf32, #tpu.memory_space<vmem>>, vector<2x32xf32>
    tpu.vector_store %arg8[%c0_18, %c0_19], %39 {strides = array<i32>} : memref<2x32xf32, #tpu.memory_space<vmem>>, vector<2x32xf32>,
    %c0_20 = arith.constant 0 : index
    %c0_21 = arith.constant 0 : index
    %42 = vector.load %arg7[%c0_20, %c0_21] : memref<16x32xf32, #tpu.memory_space<vmem>>, vector<2x32xf32>
    tpu.vector_store %arg7[%c0_20, %c0_21], %39 {strides = array<i32>} : memref<16x32xf32, #tpu.memory_space<vmem>>, vector<2x32xf32>,
    %43 = vector.extract_strided_slice %8 {offsets = [2, 0], sizes = [2, 128], strides = [1, 1]} : vector<16x128xf32> to vector<2x128xf32>
    %c0_22 = arith.constant 0 : index
    %c0_23 = arith.constant 0 : index
    %44 = vector.load %arg8[%c0_22, %c0_23] : memref<2x32xf32, #tpu.memory_space<vmem>>, vector<2x32xf32>
    %c0_24 = arith.constant 0 : index
    %c0_25 = arith.constant 0 : index
    %45 = vector.load %arg3[%c0_24, %c0_25] : memref<32x128xf32, #tpu.memory_space<vmem>>, vector<32x128xf32>
    %cst_26 = arith.constant dense<0.000000e+00> : vector<2x128xf32>
    %46 = tpu.matmul %44, %45, %cst_26 {dimension_numbers = #tpu.dot_dimension_numbers<[1], [0], [0], [1], [0, 0, 1, 1], [], []>} : vector<2x32xf32>, vector<32x128xf32>, vector<2x128xf32> -> vector<2x128xf32>
    %47 = arith.addf %43, %46 : vector<2x128xf32>
    %48 = vector.extract_strided_slice %47 {offsets = [0, 0], sizes = [2, 32], strides = [1, 1]} : vector<2x128xf32> to vector<2x32xf32>
    %49 = arith.negf %48 : vector<2x32xf32>
    %50 = math.exp %49 : vector<2x32xf32>
    %cst_27 = arith.constant 1.000000e+00 : f32
    %51 = vector.broadcast %cst_27 : f32 to vector<2x32xf32>
    %52 = arith.addf %51, %50 : vector<2x32xf32>
    %53 = arith.divf %51, %52 : vector<2x32xf32>
    %54 = vector.extract_strided_slice %47 {offsets = [0, 32], sizes = [2, 32], strides = [1, 1]} : vector<2x128xf32> to vector<2x32xf32>
    %55 = arith.negf %54 : vector<2x32xf32>
    %56 = math.exp %55 : vector<2x32xf32>
    %cst_28 = arith.constant 1.000000e+00 : f32
    %57 = vector.broadcast %cst_28 : f32 to vector<2x32xf32>
    %58 = arith.addf %57, %56 : vector<2x32xf32>
    %59 = arith.divf %57, %58 : vector<2x32xf32>
    %60 = vector.extract_strided_slice %47 {offsets = [0, 64], sizes = [2, 32], strides = [1, 1]} : vector<2x128xf32> to vector<2x32xf32>
    %61 = math.tanh %60 : vector<2x32xf32>
    %62 = vector.extract_strided_slice %47 {offsets = [0, 96], sizes = [2, 32], strides = [1, 1]} : vector<2x128xf32> to vector<2x32xf32>
    %63 = arith.negf %62 : vector<2x32xf32>
    %64 = math.exp %63 : vector<2x32xf32>
    %cst_29 = arith.constant 1.000000e+00 : f32
    %65 = vector.broadcast %cst_29 : f32 to vector<2x32xf32>
    %66 = arith.addf %65, %64 : vector<2x32xf32>
    %67 = arith.divf %65, %66 : vector<2x32xf32>
    %c0_30 = arith.constant 0 : index
    %c0_31 = arith.constant 0 : index
    %68 = vector.load %arg9[%c0_30, %c0_31] : memref<2x32xf32, #tpu.memory_space<vmem>>, vector<2x32xf32>
    %69 = arith.mulf %59, %68 : vector<2x32xf32>
    %70 = arith.mulf %53, %61 : vector<2x32xf32>
    %71 = arith.addf %69, %70 : vector<2x32xf32>
    %72 = math.tanh %71 : vector<2x32xf32>
    %73 = arith.mulf %67, %72 : vector<2x32xf32>
    %c0_32 = arith.constant 0 : index
    %c0_33 = arith.constant 0 : index
    %74 = vector.load %arg9[%c0_32, %c0_33] : memref<2x32xf32, #tpu.memory_space<vmem>>, vector<2x32xf32>
    tpu.vector_store %arg9[%c0_32, %c0_33], %71 {strides = array<i32>} : memref<2x32xf32, #tpu.memory_space<vmem>>, vector<2x32xf32>,
    %c0_34 = arith.constant 0 : index
    %c0_35 = arith.constant 0 : index
    %75 = vector.load %arg8[%c0_34, %c0_35] : memref<2x32xf32, #tpu.memory_space<vmem>>, vector<2x32xf32>
    tpu.vector_store %arg8[%c0_34, %c0_35], %73 {strides = array<i32>} : memref<2x32xf32, #tpu.memory_space<vmem>>, vector<2x32xf32>,
    %c2 = arith.constant 2 : index
    %c0_36 = arith.constant 0 : index
    %76 = vector.load %arg7[%c2, %c0_36] : memref<16x32xf32, #tpu.memory_space<vmem>>, vector<2x32xf32>
    tpu.vector_store %arg7[%c2, %c0_36], %73 {strides = array<i32>} : memref<16x32xf32, #tpu.memory_space<vmem>>, vector<2x32xf32>,
    %77 = vector.extract_strided_slice %8 {offsets = [4, 0], sizes = [2, 128], strides = [1, 1]} : vector<16x128xf32> to vector<2x128xf32>
    %c0_37 = arith.constant 0 : index
    %c0_38 = arith.constant 0 : index
    %78 = vector.load %arg8[%c0_37, %c0_38] : memref<2x32xf32, #tpu.memory_space<vmem>>, vector<2x32xf32>
    %c0_39 = arith.constant 0 : index
    %c0_40 = arith.constant 0 : index
    %79 = vector.load %arg3[%c0_39, %c0_40] : memref<32x128xf32, #tpu.memory_space<vmem>>, vector<32x128xf32>
    %cst_41 = arith.constant dense<0.000000e+00> : vector<2x128xf32>
    %80 = tpu.matmul %78, %79, %cst_41 {dimension_numbers = #tpu.dot_dimension_numbers<[1], [0], [0], [1], [0, 0, 1, 1], [], []>} : vector<2x32xf32>, vector<32x128xf32>, vector<2x128xf32> -> vector<2x128xf32>
    %81 = arith.addf %77, %80 : vector<2x128xf32>
    %82 = vector.extract_strided_slice %81 {offsets = [0, 0], sizes = [2, 32], strides = [1, 1]} : vector<2x128xf32> to vector<2x32xf32>
    %83 = arith.negf %82 : vector<2x32xf32>
    %84 = math.exp %83 : vector<2x32xf32>
    %cst_42 = arith.constant 1.000000e+00 : f32
    %85 = vector.broadcast %cst_42 : f32 to vector<2x32xf32>
    %86 = arith.addf %85, %84 : vector<2x32xf32>
    %87 = arith.divf %85, %86 : vector<2x32xf32>
    %88 = vector.extract_strided_slice %81 {offsets = [0, 32], sizes = [2, 32], strides = [1, 1]} : vector<2x128xf32> to vector<2x32xf32>
    %89 = arith.negf %88 : vector<2x32xf32>
    %90 = math.exp %89 : vector<2x32xf32>
    %cst_43 = arith.constant 1.000000e+00 : f32
    %91 = vector.broadcast %cst_43 : f32 to vector<2x32xf32>
    %92 = arith.addf %91, %90 : vector<2x32xf32>
    %93 = arith.divf %91, %92 : vector<2x32xf32>
    %94 = vector.extract_strided_slice %81 {offsets = [0, 64], sizes = [2, 32], strides = [1, 1]} : vector<2x128xf32> to vector<2x32xf32>
    %95 = math.tanh %94 : vector<2x32xf32>
    %96 = vector.extract_strided_slice %81 {offsets = [0, 96], sizes = [2, 32], strides = [1, 1]} : vector<2x128xf32> to vector<2x32xf32>
    %97 = arith.negf %96 : vector<2x32xf32>
    %98 = math.exp %97 : vector<2x32xf32>
    %cst_44 = arith.constant 1.000000e+00 : f32
    %99 = vector.broadcast %cst_44 : f32 to vector<2x32xf32>
    %100 = arith.addf %99, %98 : vector<2x32xf32>
    %101 = arith.divf %99, %100 : vector<2x32xf32>
    %c0_45 = arith.constant 0 : index
    %c0_46 = arith.constant 0 : index
    %102 = vector.load %arg9[%c0_45, %c0_46] : memref<2x32xf32, #tpu.memory_space<vmem>>, vector<2x32xf32>
    %103 = arith.mulf %93, %102 : vector<2x32xf32>
    %104 = arith.mulf %87, %95 : vector<2x32xf32>
    %105 = arith.addf %103, %104 : vector<2x32xf32>
    %106 = math.tanh %105 : vector<2x32xf32>
    %107 = arith.mulf %101, %106 : vector<2x32xf32>
    %c0_47 = arith.constant 0 : index
    %c0_48 = arith.constant 0 : index
    %108 = vector.load %arg9[%c0_47, %c0_48] : memref<2x32xf32, #tpu.memory_space<vmem>>, vector<2x32xf32>
    tpu.vector_store %arg9[%c0_47, %c0_48], %105 {strides = array<i32>} : memref<2x32xf32, #tpu.memory_space<vmem>>, vector<2x32xf32>,
    %c0_49 = arith.constant 0 : index
    %c0_50 = arith.constant 0 : index
    %109 = vector.load %arg8[%c0_49, %c0_50] : memref<2x32xf32, #tpu.memory_space<vmem>>, vector<2x32xf32>
    tpu.vector_store %arg8[%c0_49, %c0_50], %107 {strides = array<i32>} : memref<2x32xf32, #tpu.memory_space<vmem>>, vector<2x32xf32>,
    %c4 = arith.constant 4 : index
    %c0_51 = arith.constant 0 : index
    %110 = vector.load %arg7[%c4, %c0_51] : memref<16x32xf32, #tpu.memory_space<vmem>>, vector<2x32xf32>
    tpu.vector_store %arg7[%c4, %c0_51], %107 {strides = array<i32>} : memref<16x32xf32, #tpu.memory_space<vmem>>, vector<2x32xf32>,
    %111 = vector.extract_strided_slice %8 {offsets = [6, 0], sizes = [2, 128], strides = [1, 1]} : vector<16x128xf32> to vector<2x128xf32>
    %c0_52 = arith.constant 0 : index
    %c0_53 = arith.constant 0 : index
    %112 = vector.load %arg8[%c0_52, %c0_53] : memref<2x32xf32, #tpu.memory_space<vmem>>, vector<2x32xf32>
    %c0_54 = arith.constant 0 : index
    %c0_55 = arith.constant 0 : index
    %113 = vector.load %arg3[%c0_54, %c0_55] : memref<32x128xf32, #tpu.memory_space<vmem>>, vector<32x128xf32>
    %cst_56 = arith.constant dense<0.000000e+00> : vector<2x128xf32>
    %114 = tpu.matmul %112, %113, %cst_56 {dimension_numbers = #tpu.dot_dimension_numbers<[1], [0], [0], [1], [0, 0, 1, 1], [], []>} : vector<2x32xf32>, vector<32x128xf32>, vector<2x128xf32> -> vector<2x128xf32>
    %115 = arith.addf %111, %114 : vector<2x128xf32>
    %116 = vector.extract_strided_slice %115 {offsets = [0, 0], sizes = [2, 32], strides = [1, 1]} : vector<2x128xf32> to vector<2x32xf32>
    %117 = arith.negf %116 : vector<2x32xf32>
    %118 = math.exp %117 : vector<2x32xf32>
    %cst_57 = arith.constant 1.000000e+00 : f32
    %119 = vector.broadcast %cst_57 : f32 to vector<2x32xf32>
    %120 = arith.addf %119, %118 : vector<2x32xf32>
    %121 = arith.divf %119, %120 : vector<2x32xf32>
    %122 = vector.extract_strided_slice %115 {offsets = [0, 32], sizes = [2, 32], strides = [1, 1]} : vector<2x128xf32> to vector<2x32xf32>
    %123 = arith.negf %122 : vector<2x32xf32>
    %124 = math.exp %123 : vector<2x32xf32>
    %cst_58 = arith.constant 1.000000e+00 : f32
    %125 = vector.broadcast %cst_58 : f32 to vector<2x32xf32>
    %126 = arith.addf %125, %124 : vector<2x32xf32>
    %127 = arith.divf %125, %126 : vector<2x32xf32>
    %128 = vector.extract_strided_slice %115 {offsets = [0, 64], sizes = [2, 32], strides = [1, 1]} : vector<2x128xf32> to vector<2x32xf32>
    %129 = math.tanh %128 : vector<2x32xf32>
    %130 = vector.extract_strided_slice %115 {offsets = [0, 96], sizes = [2, 32], strides = [1, 1]} : vector<2x128xf32> to vector<2x32xf32>
    %131 = arith.negf %130 : vector<2x32xf32>
    %132 = math.exp %131 : vector<2x32xf32>
    %cst_59 = arith.constant 1.000000e+00 : f32
    %133 = vector.broadcast %cst_59 : f32 to vector<2x32xf32>
    %134 = arith.addf %133, %132 : vector<2x32xf32>
    %135 = arith.divf %133, %134 : vector<2x32xf32>
    %c0_60 = arith.constant 0 : index
    %c0_61 = arith.constant 0 : index
    %136 = vector.load %arg9[%c0_60, %c0_61] : memref<2x32xf32, #tpu.memory_space<vmem>>, vector<2x32xf32>
    %137 = arith.mulf %127, %136 : vector<2x32xf32>
    %138 = arith.mulf %121, %129 : vector<2x32xf32>
    %139 = arith.addf %137, %138 : vector<2x32xf32>
    %140 = math.tanh %139 : vector<2x32xf32>
    %141 = arith.mulf %135, %140 : vector<2x32xf32>
    %c0_62 = arith.constant 0 : index
    %c0_63 = arith.constant 0 : index
    %142 = vector.load %arg9[%c0_62, %c0_63] : memref<2x32xf32, #tpu.memory_space<vmem>>, vector<2x32xf32>
    tpu.vector_store %arg9[%c0_62, %c0_63], %139 {strides = array<i32>} : memref<2x32xf32, #tpu.memory_space<vmem>>, vector<2x32xf32>,
    %c0_64 = arith.constant 0 : index
    %c0_65 = arith.constant 0 : index
    %143 = vector.load %arg8[%c0_64, %c0_65] : memref<2x32xf32, #tpu.memory_space<vmem>>, vector<2x32xf32>
    tpu.vector_store %arg8[%c0_64, %c0_65], %141 {strides = array<i32>} : memref<2x32xf32, #tpu.memory_space<vmem>>, vector<2x32xf32>,
    %c6 = arith.constant 6 : index
    %c0_66 = arith.constant 0 : index
    %144 = vector.load %arg7[%c6, %c0_66] : memref<16x32xf32, #tpu.memory_space<vmem>>, vector<2x32xf32>
    tpu.vector_store %arg7[%c6, %c0_66], %141 {strides = array<i32>} : memref<16x32xf32, #tpu.memory_space<vmem>>, vector<2x32xf32>,
    %145 = vector.extract_strided_slice %8 {offsets = [8, 0], sizes = [2, 128], strides = [1, 1]} : vector<16x128xf32> to vector<2x128xf32>
    %c0_67 = arith.constant 0 : index
    %c0_68 = arith.constant 0 : index
    %146 = vector.load %arg8[%c0_67, %c0_68] : memref<2x32xf32, #tpu.memory_space<vmem>>, vector<2x32xf32>
    %c0_69 = arith.constant 0 : index
    %c0_70 = arith.constant 0 : index
    %147 = vector.load %arg3[%c0_69, %c0_70] : memref<32x128xf32, #tpu.memory_space<vmem>>, vector<32x128xf32>
    %cst_71 = arith.constant dense<0.000000e+00> : vector<2x128xf32>
    %148 = tpu.matmul %146, %147, %cst_71 {dimension_numbers = #tpu.dot_dimension_numbers<[1], [0], [0], [1], [0, 0, 1, 1], [], []>} : vector<2x32xf32>, vector<32x128xf32>, vector<2x128xf32> -> vector<2x128xf32>
    %149 = arith.addf %145, %148 : vector<2x128xf32>
    %150 = vector.extract_strided_slice %149 {offsets = [0, 0], sizes = [2, 32], strides = [1, 1]} : vector<2x128xf32> to vector<2x32xf32>
    %151 = arith.negf %150 : vector<2x32xf32>
    %152 = math.exp %151 : vector<2x32xf32>
    %cst_72 = arith.constant 1.000000e+00 : f32
    %153 = vector.broadcast %cst_72 : f32 to vector<2x32xf32>
    %154 = arith.addf %153, %152 : vector<2x32xf32>
    %155 = arith.divf %153, %154 : vector<2x32xf32>
    %156 = vector.extract_strided_slice %149 {offsets = [0, 32], sizes = [2, 32], strides = [1, 1]} : vector<2x128xf32> to vector<2x32xf32>
    %157 = arith.negf %156 : vector<2x32xf32>
    %158 = math.exp %157 : vector<2x32xf32>
    %cst_73 = arith.constant 1.000000e+00 : f32
    %159 = vector.broadcast %cst_73 : f32 to vector<2x32xf32>
    %160 = arith.addf %159, %158 : vector<2x32xf32>
    %161 = arith.divf %159, %160 : vector<2x32xf32>
    %162 = vector.extract_strided_slice %149 {offsets = [0, 64], sizes = [2, 32], strides = [1, 1]} : vector<2x128xf32> to vector<2x32xf32>
    %163 = math.tanh %162 : vector<2x32xf32>
    %164 = vector.extract_strided_slice %149 {offsets = [0, 96], sizes = [2, 32], strides = [1, 1]} : vector<2x128xf32> to vector<2x32xf32>
    %165 = arith.negf %164 : vector<2x32xf32>
    %166 = math.exp %165 : vector<2x32xf32>
    %cst_74 = arith.constant 1.000000e+00 : f32
    %167 = vector.broadcast %cst_74 : f32 to vector<2x32xf32>
    %168 = arith.addf %167, %166 : vector<2x32xf32>
    %169 = arith.divf %167, %168 : vector<2x32xf32>
    %c0_75 = arith.constant 0 : index
    %c0_76 = arith.constant 0 : index
    %170 = vector.load %arg9[%c0_75, %c0_76] : memref<2x32xf32, #tpu.memory_space<vmem>>, vector<2x32xf32>
    %171 = arith.mulf %161, %170 : vector<2x32xf32>
    %172 = arith.mulf %155, %163 : vector<2x32xf32>
    %173 = arith.addf %171, %172 : vector<2x32xf32>
    %174 = math.tanh %173 : vector<2x32xf32>
    %175 = arith.mulf %169, %174 : vector<2x32xf32>
    %c0_77 = arith.constant 0 : index
    %c0_78 = arith.constant 0 : index
    %176 = vector.load %arg9[%c0_77, %c0_78] : memref<2x32xf32, #tpu.memory_space<vmem>>, vector<2x32xf32>
    tpu.vector_store %arg9[%c0_77, %c0_78], %173 {strides = array<i32>} : memref<2x32xf32, #tpu.memory_space<vmem>>, vector<2x32xf32>,
    %c0_79 = arith.constant 0 : index
    %c0_80 = arith.constant 0 : index
    %177 = vector.load %arg8[%c0_79, %c0_80] : memref<2x32xf32, #tpu.memory_space<vmem>>, vector<2x32xf32>
    tpu.vector_store %arg8[%c0_79, %c0_80], %175 {strides = array<i32>} : memref<2x32xf32, #tpu.memory_space<vmem>>, vector<2x32xf32>,
    %c8 = arith.constant 8 : index
    %c0_81 = arith.constant 0 : index
    %178 = vector.load %arg7[%c8, %c0_81] : memref<16x32xf32, #tpu.memory_space<vmem>>, vector<2x32xf32>
    tpu.vector_store %arg7[%c8, %c0_81], %175 {strides = array<i32>} : memref<16x32xf32, #tpu.memory_space<vmem>>, vector<2x32xf32>,
    %179 = vector.extract_strided_slice %8 {offsets = [10, 0], sizes = [2, 128], strides = [1, 1]} : vector<16x128xf32> to vector<2x128xf32>
    %c0_82 = arith.constant 0 : index
    %c0_83 = arith.constant 0 : index
    %180 = vector.load %arg8[%c0_82, %c0_83] : memref<2x32xf32, #tpu.memory_space<vmem>>, vector<2x32xf32>
    %c0_84 = arith.constant 0 : index
    %c0_85 = arith.constant 0 : index
    %181 = vector.load %arg3[%c0_84, %c0_85] : memref<32x128xf32, #tpu.memory_space<vmem>>, vector<32x128xf32>
    %cst_86 = arith.constant dense<0.000000e+00> : vector<2x128xf32>
    %182 = tpu.matmul %180, %181, %cst_86 {dimension_numbers = #tpu.dot_dimension_numbers<[1], [0], [0], [1], [0, 0, 1, 1], [], []>} : vector<2x32xf32>, vector<32x128xf32>, vector<2x128xf32> -> vector<2x128xf32>
    %183 = arith.addf %179, %182 : vector<2x128xf32>
    %184 = vector.extract_strided_slice %183 {offsets = [0, 0], sizes = [2, 32], strides = [1, 1]} : vector<2x128xf32> to vector<2x32xf32>
    %185 = arith.negf %184 : vector<2x32xf32>
    %186 = math.exp %185 : vector<2x32xf32>
    %cst_87 = arith.constant 1.000000e+00 : f32
    %187 = vector.broadcast %cst_87 : f32 to vector<2x32xf32>
    %188 = arith.addf %187, %186 : vector<2x32xf32>
    %189 = arith.divf %187, %188 : vector<2x32xf32>
    %190 = vector.extract_strided_slice %183 {offsets = [0, 32], sizes = [2, 32], strides = [1, 1]} : vector<2x128xf32> to vector<2x32xf32>
    %191 = arith.negf %190 : vector<2x32xf32>
    %192 = math.exp %191 : vector<2x32xf32>
    %cst_88 = arith.constant 1.000000e+00 : f32
    %193 = vector.broadcast %cst_88 : f32 to vector<2x32xf32>
    %194 = arith.addf %193, %192 : vector<2x32xf32>
    %195 = arith.divf %193, %194 : vector<2x32xf32>
    %196 = vector.extract_strided_slice %183 {offsets = [0, 64], sizes = [2, 32], strides = [1, 1]} : vector<2x128xf32> to vector<2x32xf32>
    %197 = math.tanh %196 : vector<2x32xf32>
    %198 = vector.extract_strided_slice %183 {offsets = [0, 96], sizes = [2, 32], strides = [1, 1]} : vector<2x128xf32> to vector<2x32xf32>
    %199 = arith.negf %198 : vector<2x32xf32>
    %200 = math.exp %199 : vector<2x32xf32>
    %cst_89 = arith.constant 1.000000e+00 : f32
    %201 = vector.broadcast %cst_89 : f32 to vector<2x32xf32>
    %202 = arith.addf %201, %200 : vector<2x32xf32>
    %203 = arith.divf %201, %202 : vector<2x32xf32>
    %c0_90 = arith.constant 0 : index
    %c0_91 = arith.constant 0 : index
    %204 = vector.load %arg9[%c0_90, %c0_91] : memref<2x32xf32, #tpu.memory_space<vmem>>, vector<2x32xf32>
    %205 = arith.mulf %195, %204 : vector<2x32xf32>
    %206 = arith.mulf %189, %197 : vector<2x32xf32>
    %207 = arith.addf %205, %206 : vector<2x32xf32>
    %208 = math.tanh %207 : vector<2x32xf32>
    %209 = arith.mulf %203, %208 : vector<2x32xf32>
    %c0_92 = arith.constant 0 : index
    %c0_93 = arith.constant 0 : index
    %210 = vector.load %arg9[%c0_92, %c0_93] : memref<2x32xf32, #tpu.memory_space<vmem>>, vector<2x32xf32>
    tpu.vector_store %arg9[%c0_92, %c0_93], %207 {strides = array<i32>} : memref<2x32xf32, #tpu.memory_space<vmem>>, vector<2x32xf32>,
    %c0_94 = arith.constant 0 : index
    %c0_95 = arith.constant 0 : index
    %211 = vector.load %arg8[%c0_94, %c0_95] : memref<2x32xf32, #tpu.memory_space<vmem>>, vector<2x32xf32>
    tpu.vector_store %arg8[%c0_94, %c0_95], %209 {strides = array<i32>} : memref<2x32xf32, #tpu.memory_space<vmem>>, vector<2x32xf32>,
    %c10 = arith.constant 10 : index
    %c0_96 = arith.constant 0 : index
    %212 = vector.load %arg7[%c10, %c0_96] : memref<16x32xf32, #tpu.memory_space<vmem>>, vector<2x32xf32>
    tpu.vector_store %arg7[%c10, %c0_96], %209 {strides = array<i32>} : memref<16x32xf32, #tpu.memory_space<vmem>>, vector<2x32xf32>,
    %213 = vector.extract_strided_slice %8 {offsets = [12, 0], sizes = [2, 128], strides = [1, 1]} : vector<16x128xf32> to vector<2x128xf32>
    %c0_97 = arith.constant 0 : index
    %c0_98 = arith.constant 0 : index
    %214 = vector.load %arg8[%c0_97, %c0_98] : memref<2x32xf32, #tpu.memory_space<vmem>>, vector<2x32xf32>
    %c0_99 = arith.constant 0 : index
    %c0_100 = arith.constant 0 : index
    %215 = vector.load %arg3[%c0_99, %c0_100] : memref<32x128xf32, #tpu.memory_space<vmem>>, vector<32x128xf32>
    %cst_101 = arith.constant dense<0.000000e+00> : vector<2x128xf32>
    %216 = tpu.matmul %214, %215, %cst_101 {dimension_numbers = #tpu.dot_dimension_numbers<[1], [0], [0], [1], [0, 0, 1, 1], [], []>} : vector<2x32xf32>, vector<32x128xf32>, vector<2x128xf32> -> vector<2x128xf32>
    %217 = arith.addf %213, %216 : vector<2x128xf32>
    %218 = vector.extract_strided_slice %217 {offsets = [0, 0], sizes = [2, 32], strides = [1, 1]} : vector<2x128xf32> to vector<2x32xf32>
    %219 = arith.negf %218 : vector<2x32xf32>
    %220 = math.exp %219 : vector<2x32xf32>
    %cst_102 = arith.constant 1.000000e+00 : f32
    %221 = vector.broadcast %cst_102 : f32 to vector<2x32xf32>
    %222 = arith.addf %221, %220 : vector<2x32xf32>
    %223 = arith.divf %221, %222 : vector<2x32xf32>
    %224 = vector.extract_strided_slice %217 {offsets = [0, 32], sizes = [2, 32], strides = [1, 1]} : vector<2x128xf32> to vector<2x32xf32>
    %225 = arith.negf %224 : vector<2x32xf32>
    %226 = math.exp %225 : vector<2x32xf32>
    %cst_103 = arith.constant 1.000000e+00 : f32
    %227 = vector.broadcast %cst_103 : f32 to vector<2x32xf32>
    %228 = arith.addf %227, %226 : vector<2x32xf32>
    %229 = arith.divf %227, %228 : vector<2x32xf32>
    %230 = vector.extract_strided_slice %217 {offsets = [0, 64], sizes = [2, 32], strides = [1, 1]} : vector<2x128xf32> to vector<2x32xf32>
    %231 = math.tanh %230 : vector<2x32xf32>
    %232 = vector.extract_strided_slice %217 {offsets = [0, 96], sizes = [2, 32], strides = [1, 1]} : vector<2x128xf32> to vector<2x32xf32>
    %233 = arith.negf %232 : vector<2x32xf32>
    %234 = math.exp %233 : vector<2x32xf32>
    %cst_104 = arith.constant 1.000000e+00 : f32
    %235 = vector.broadcast %cst_104 : f32 to vector<2x32xf32>
    %236 = arith.addf %235, %234 : vector<2x32xf32>
    %237 = arith.divf %235, %236 : vector<2x32xf32>
    %c0_105 = arith.constant 0 : index
    %c0_106 = arith.constant 0 : index
    %238 = vector.load %arg9[%c0_105, %c0_106] : memref<2x32xf32, #tpu.memory_space<vmem>>, vector<2x32xf32>
    %239 = arith.mulf %229, %238 : vector<2x32xf32>
    %240 = arith.mulf %223, %231 : vector<2x32xf32>
    %241 = arith.addf %239, %240 : vector<2x32xf32>
    %242 = math.tanh %241 : vector<2x32xf32>
    %243 = arith.mulf %237, %242 : vector<2x32xf32>
    %c0_107 = arith.constant 0 : index
    %c0_108 = arith.constant 0 : index
    %244 = vector.load %arg9[%c0_107, %c0_108] : memref<2x32xf32, #tpu.memory_space<vmem>>, vector<2x32xf32>
    tpu.vector_store %arg9[%c0_107, %c0_108], %241 {strides = array<i32>} : memref<2x32xf32, #tpu.memory_space<vmem>>, vector<2x32xf32>,
    %c0_109 = arith.constant 0 : index
    %c0_110 = arith.constant 0 : index
    %245 = vector.load %arg8[%c0_109, %c0_110] : memref<2x32xf32, #tpu.memory_space<vmem>>, vector<2x32xf32>
    tpu.vector_store %arg8[%c0_109, %c0_110], %243 {strides = array<i32>} : memref<2x32xf32, #tpu.memory_space<vmem>>, vector<2x32xf32>,
    %c12 = arith.constant 12 : index
    %c0_111 = arith.constant 0 : index
    %246 = vector.load %arg7[%c12, %c0_111] : memref<16x32xf32, #tpu.memory_space<vmem>>, vector<2x32xf32>
    tpu.vector_store %arg7[%c12, %c0_111], %243 {strides = array<i32>} : memref<16x32xf32, #tpu.memory_space<vmem>>, vector<2x32xf32>,
    %247 = vector.extract_strided_slice %8 {offsets = [14, 0], sizes = [2, 128], strides = [1, 1]} : vector<16x128xf32> to vector<2x128xf32>
    %c0_112 = arith.constant 0 : index
    %c0_113 = arith.constant 0 : index
    %248 = vector.load %arg8[%c0_112, %c0_113] : memref<2x32xf32, #tpu.memory_space<vmem>>, vector<2x32xf32>
    %c0_114 = arith.constant 0 : index
    %c0_115 = arith.constant 0 : index
    %249 = vector.load %arg3[%c0_114, %c0_115] : memref<32x128xf32, #tpu.memory_space<vmem>>, vector<32x128xf32>
    %cst_116 = arith.constant dense<0.000000e+00> : vector<2x128xf32>
    %250 = tpu.matmul %248, %249, %cst_116 {dimension_numbers = #tpu.dot_dimension_numbers<[1], [0], [0], [1], [0, 0, 1, 1], [], []>} : vector<2x32xf32>, vector<32x128xf32>, vector<2x128xf32> -> vector<2x128xf32>
    %251 = arith.addf %247, %250 : vector<2x128xf32>
    %252 = vector.extract_strided_slice %251 {offsets = [0, 0], sizes = [2, 32], strides = [1, 1]} : vector<2x128xf32> to vector<2x32xf32>
    %253 = arith.negf %252 : vector<2x32xf32>
    %254 = math.exp %253 : vector<2x32xf32>
    %cst_117 = arith.constant 1.000000e+00 : f32
    %255 = vector.broadcast %cst_117 : f32 to vector<2x32xf32>
    %256 = arith.addf %255, %254 : vector<2x32xf32>
    %257 = arith.divf %255, %256 : vector<2x32xf32>
    %258 = vector.extract_strided_slice %251 {offsets = [0, 32], sizes = [2, 32], strides = [1, 1]} : vector<2x128xf32> to vector<2x32xf32>
    %259 = arith.negf %258 : vector<2x32xf32>
    %260 = math.exp %259 : vector<2x32xf32>
    %cst_118 = arith.constant 1.000000e+00 : f32
    %261 = vector.broadcast %cst_118 : f32 to vector<2x32xf32>
    %262 = arith.addf %261, %260 : vector<2x32xf32>
    %263 = arith.divf %261, %262 : vector<2x32xf32>
    %264 = vector.extract_strided_slice %251 {offsets = [0, 64], sizes = [2, 32], strides = [1, 1]} : vector<2x128xf32> to vector<2x32xf32>
    %265 = math.tanh %264 : vector<2x32xf32>
    %266 = vector.extract_strided_slice %251 {offsets = [0, 96], sizes = [2, 32], strides = [1, 1]} : vector<2x128xf32> to vector<2x32xf32>
    %267 = arith.negf %266 : vector<2x32xf32>
    %268 = math.exp %267 : vector<2x32xf32>
    %cst_119 = arith.constant 1.000000e+00 : f32
    %269 = vector.broadcast %cst_119 : f32 to vector<2x32xf32>
    %270 = arith.addf %269, %268 : vector<2x32xf32>
    %271 = arith.divf %269, %270 : vector<2x32xf32>
    %c0_120 = arith.constant 0 : index
    %c0_121 = arith.constant 0 : index
    %272 = vector.load %arg9[%c0_120, %c0_121] : memref<2x32xf32, #tpu.memory_space<vmem>>, vector<2x32xf32>
    %273 = arith.mulf %263, %272 : vector<2x32xf32>
    %274 = arith.mulf %257, %265 : vector<2x32xf32>
    %275 = arith.addf %273, %274 : vector<2x32xf32>
    %276 = math.tanh %275 : vector<2x32xf32>
    %277 = arith.mulf %271, %276 : vector<2x32xf32>
    %c0_122 = arith.constant 0 : index
    %c0_123 = arith.constant 0 : index
    %278 = vector.load %arg9[%c0_122, %c0_123] : memref<2x32xf32, #tpu.memory_space<vmem>>, vector<2x32xf32>
    tpu.vector_store %arg9[%c0_122, %c0_123], %275 {strides = array<i32>} : memref<2x32xf32, #tpu.memory_space<vmem>>, vector<2x32xf32>,
    %c0_124 = arith.constant 0 : index
    %c0_125 = arith.constant 0 : index
    %279 = vector.load %arg8[%c0_124, %c0_125] : memref<2x32xf32, #tpu.memory_space<vmem>>, vector<2x32xf32>
    tpu.vector_store %arg8[%c0_124, %c0_125], %277 {strides = array<i32>} : memref<2x32xf32, #tpu.memory_space<vmem>>, vector<2x32xf32>,
    %c14 = arith.constant 14 : index
    %c0_126 = arith.constant 0 : index
    %280 = vector.load %arg7[%c14, %c0_126] : memref<16x32xf32, #tpu.memory_space<vmem>>, vector<2x32xf32>
    tpu.vector_store %arg7[%c14, %c0_126], %277 {strides = array<i32>} : memref<16x32xf32, #tpu.memory_space<vmem>>, vector<2x32xf32>,
    return
  }
  func.func @transform_0(%arg0: i32) -> (i32, i32) {
    %c0_i32 = arith.constant 0 : i32
    %c0_i32_0 = arith.constant 0 : i32
    return %arg0, %c0_i32 : i32, i32
  }
  func.func @transform_1(%arg0: i32) -> (i32, i32) {
    %c0_i32 = arith.constant 0 : i32
    %c0_i32_0 = arith.constant 0 : i32
    %c0_i32_1 = arith.constant 0 : i32
    return %c0_i32, %c0_i32_0 : i32, i32
  }
  func.func @transform_2(%arg0: i32) -> (i32, i32) {
    %c0_i32 = arith.constant 0 : i32
    %c0_i32_0 = arith.constant 0 : i32
    %c0_i32_1 = arith.constant 0 : i32
    return %c0_i32, %c0_i32_0 : i32, i32
  }
  func.func @transform_3(%arg0: i32) -> (i32, i32) {
    %c0_i32 = arith.constant 0 : i32
    %c0_i32_0 = arith.constant 0 : i32
    %c0_i32_1 = arith.constant 0 : i32
    return %c0_i32, %c0_i32_0 : i32, i32
  }
  func.func @transform_4(%arg0: i32) -> (i32, i32) {
    %c0_i32 = arith.constant 0 : i32
    %c0_i32_0 = arith.constant 0 : i32
    %c0_i32_1 = arith.constant 0 : i32
    return %c0_i32, %c0_i32_0 : i32, i32
  }
  func.func @transform_5(%arg0: i32) -> (i32, i32) {
    %c0_i32 = arith.constant 0 : i32
    %c0_i32_0 = arith.constant 0 : i32
    %c0_i32_1 = arith.constant 0 : i32
    return %c0_i32, %c0_i32_0 : i32, i32
  }
  func.func @transform_6(%arg0: i32) -> (i32, i32) {
    %c0_i32 = arith.constant 0 : i32
    %c0_i32_0 = arith.constant 0 : i32
    return %arg0, %c0_i32 : i32, i32
  }
}

module attributes {stable_mosaic.version = 11 : i64} {
  func.func @_lstm_chunk_kernel(%arg0: i32, %arg1: memref<16x32xf32, #tpu.memory_space<vmem>>, %arg2: memref<32x128xf32, #tpu.memory_space<vmem>>, %arg3: memref<32x128xf32, #tpu.memory_space<vmem>>, %arg4: memref<1x128xf32, #tpu.memory_space<vmem>>, %arg5: memref<2x32xf32, #tpu.memory_space<vmem>>, %arg6: memref<2x32xf32, #tpu.memory_space<vmem>>, %arg7: memref<16x32xf32, #tpu.memory_space<vmem>>, %arg8: memref<2x32xf32, #tpu.memory_space<vmem>>, %arg9: memref<2x32xf32, #tpu.memory_space<vmem>>) attributes {dimension_semantics = [#tpu.dimension_semantics<arbitrary>], iteration_bounds = array<i64: 1>, scalar_prefetch = 0 : i64, scratch_operands = 2 : i64, tpu.core_type = #tpu.core_type<tc>, window_params = [{transform_indices = @transform_0, window_bounds = array<i64: 16, 32>}, {pipeline_mode = #tpu.pipeline_mode<synchronous>, transform_indices = @transform_1, window_bounds = array<i64: 32, 128>}, {pipeline_mode = #tpu.pipeline_mode<synchronous>, transform_indices = @transform_2, window_bounds = array<i64: 32, 128>}, {pipeline_mode = #tpu.pipeline_mode<synchronous>, transform_indices = @transform_3, window_bounds = array<i64: 1, 128>}, {pipeline_mode = #tpu.pipeline_mode<synchronous>, transform_indices = @transform_4, window_bounds = array<i64: 2, 32>}, {pipeline_mode = #tpu.pipeline_mode<synchronous>, transform_indices = @transform_5, window_bounds = array<i64: 2, 32>}, {transform_indices = @transform_6, window_bounds = array<i64: 16, 32>}]} {
    %c0_i32 = arith.constant 0 : i32
    %0 = arith.cmpi eq, %arg0, %c0_i32 : i32
    %1 = arith.extui %0 : i1 to i32
    %c0_i32_0 = arith.constant 0 : i32
    %2 = arith.cmpi ne, %1, %c0_i32_0 : i32
    scf.if %2 {
      %c0_127 = arith.constant 0 : index
      %c0_128 = arith.constant 0 : index
      %281 = vector.load %arg5[%c0_127, %c0_128] : memref<2x32xf32, #tpu.memory_space<vmem>>, vector<2x32xf32>
      %c0_129 = arith.constant 0 : index
      %c0_130 = arith.constant 0 : index
      %282 = vector.load %arg8[%c0_129, %c0_130] : memref<2x32xf32, #tpu.memory_space<vmem>>, vector<2x32xf32>
      tpu.vector_store %arg8[%c0_129, %c0_130], %281 {strides = array<i32>} : memref<2x32xf32, #tpu.memory_space<vmem>>, vector<2x32xf32>,
      %c0_131 = arith.constant 0 : index
      %c0_132 = arith.constant 0 : index
      %283 = vector.load %arg6[%c0_131, %c0_132] : memref<2x32xf32, #tpu.memory_space<vmem>>, vector<2x32xf32>
      %c0_133 = arith.constant 0 : index
      %c0_134 = arith.constant 0 : index
      %284 = vector.load %arg9[%c0_133, %c0_134] : memref<2x32xf32, #tpu.memory_space<vmem>>, vector<2x32xf32>
      tpu.vector_store %arg9[%c0_133, %c0_134], %283 {strides = array<i32>} : memref<2x32xf32, #tpu.memory_space<vmem>>, vector<2x32xf32>,
    } else {
    }
    %c0 = arith.constant 0 : index
    %c0_1 = arith.constant 0 : index
    %3 = vector.load %arg1[%c0, %c0_1] : memref<16x32xf32, #tpu.memory_space<vmem>>, vector<16x32xf32>
    %c0_2 = arith.constant 0 : index
    %c0_3 = arith.constant 0 : index
    %4 = vector.load %arg2[%c0_2, %c0_3] : memref<32x128xf32, #tpu.memory_space<vmem>>, vector<32x128xf32>
    %cst = arith.constant dense<0.000000e+00> : vector<16x128xf32>
    %5 = tpu.matmul %3, %4, %cst {dimension_numbers = #tpu.dot_dimension_numbers<[1], [0], [0], [1], [0, 0, 1, 1], [], []>} : vector<16x32xf32>, vector<32x128xf32>, vector<16x128xf32> -> vector<16x128xf32>
    %c0_4 = arith.constant 0 : index
    %c0_5 = arith.constant 0 : index
    %6 = vector.load %arg4[%c0_4, %c0_5] : memref<1x128xf32, #tpu.memory_space<vmem>>, vector<1x128xf32>
    %7 = vector.broadcast %6 : vector<1x128xf32> to vector<16x128xf32>
    %8 = arith.addf %5, %7 : vector<16x128xf32>
    %9 = vector.extract_strided_slice %8 {offsets = [0, 0], sizes = [2, 128], strides = [1, 1]} : vector<16x128xf32> to vector<2x128xf32>
    %c0_6 = arith.constant 0 : index
    %c0_7 = arith.constant 0 : index
    %10 = vector.load %arg8[%c0_6, %c0_7] : memref<2x32xf32, #tpu.memory_space<vmem>>, vector<2x32xf32>
    %c0_8 = arith.constant 0 : index
    %c0_9 = arith.constant 0 : index
    %11 = vector.load %arg3[%c0_8, %c0_9] : memref<32x128xf32, #tpu.memory_space<vmem>>, vector<32x128xf32>
    %cst_10 = arith.constant dense<0.000000e+00> : vector<2x128xf32>
    %12 = tpu.matmul %10, %11, %cst_10 {dimension_numbers = #tpu.dot_dimension_numbers<[1], [0], [0], [1], [0, 0, 1, 1], [], []>} : vector<2x32xf32>, vector<32x128xf32>, vector<2x128xf32> -> vector<2x128xf32>
    %13 = arith.addf %9, %12 : vector<2x128xf32>
    %14 = vector.extract_strided_slice %13 {offsets = [0, 0], sizes = [2, 32], strides = [1, 1]} : vector<2x128xf32> to vector<2x32xf32>
    %15 = arith.negf %14 : vector<2x32xf32>
    %16 = math.exp %15 : vector<2x32xf32>
    %cst_11 = arith.constant 1.000000e+00 : f32
    %17 = vector.broadcast %cst_11 : f32 to vector<2x32xf32>
    %18 = arith.addf %17, %16 : vector<2x32xf32>
    %19 = arith.divf %17, %18 : vector<2x32xf32>
    %20 = vector.extract_strided_slice %13 {offsets = [0, 32], sizes = [2, 32], strides = [1, 1]} : vector<2x128xf32> to vector<2x32xf32>
    %21 = arith.negf %20 : vector<2x32xf32>
    %22 = math.exp %21 : vector<2x32xf32>
    %cst_12 = arith.constant 1.000000e+00 : f32
    %23 = vector.broadcast %cst_12 : f32 to vector<2x32xf32>
    %24 = arith.addf %23, %22 : vector<2x32xf32>
    %25 = arith.divf %23, %24 : vector<2x32xf32>
    %26 = vector.extract_strided_slice %13 {offsets = [0, 64], sizes = [2, 32], strides = [1, 1]} : vector<2x128xf32> to vector<2x32xf32>
    %27 = math.tanh %26 : vector<2x32xf32>
    %28 = vector.extract_strided_slice %13 {offsets = [0, 96], sizes = [2, 32], strides = [1, 1]} : vector<2x128xf32> to vector<2x32xf32>
    %29 = arith.negf %28 : vector<2x32xf32>
    %30 = math.exp %29 : vector<2x32xf32>
    %cst_13 = arith.constant 1.000000e+00 : f32
    %31 = vector.broadcast %cst_13 : f32 to vector<2x32xf32>
    %32 = arith.addf %31, %30 : vector<2x32xf32>
    %33 = arith.divf %31, %32 : vector<2x32xf32>
    %c0_14 = arith.constant 0 : index
    %c0_15 = arith.constant 0 : index
    %34 = vector.load %arg9[%c0_14, %c0_15] : memref<2x32xf32, #tpu.memory_space<vmem>>, vector<2x32xf32>
    %35 = arith.mulf %25, %34 : vector<2x32xf32>
    %36 = arith.mulf %19, %27 : vector<2x32xf32>
    %37 = arith.addf %35, %36 : vector<2x32xf32>
    %38 = math.tanh %37 : vector<2x32xf32>
    %39 = arith.mulf %33, %38 : vector<2x32xf32>
    %c0_16 = arith.constant 0 : index
    %c0_17 = arith.constant 0 : index
    %40 = vector.load %arg9[%c0_16, %c0_17] : memref<2x32xf32, #tpu.memory_space<vmem>>, vector<2x32xf32>
    tpu.vector_store %arg9[%c0_16, %c0_17], %37 {strides = array<i32>} : memref<2x32xf32, #tpu.memory_space<vmem>>, vector<2x32xf32>,
    %c0_18 = arith.constant 0 : index
    %c0_19 = arith.constant 0 : index
    %41 = vector.load %arg8[%c0_18, %c0_19] : memref<2x32xf32, #tpu.memory_space<vmem>>, vector<2x32xf32>
    tpu.vector_store %arg8[%c0_18, %c0_19], %39 {strides = array<i32>} : memref<2x32xf32, #tpu.memory_space<vmem>>, vector<2x32xf32>,
    %c0_20 = arith.constant 0 : index
    %c0_21 = arith.constant 0 : index
    %42 = vector.load %arg7[%c0_20, %c0_21] : memref<16x32xf32, #tpu.memory_space<vmem>>, vector<2x32xf32>
    tpu.vector_store %arg7[%c0_20, %c0_21], %39 {strides = array<i32>} : memref<16x32xf32, #tpu.memory_space<vmem>>, vector<2x32xf32>,
    %43 = vector.extract_strided_slice %8 {offsets = [2, 0], sizes = [2, 128], strides = [1, 1]} : vector<16x128xf32> to vector<2x128xf32>
    %c0_22 = arith.constant 0 : index
    %c0_23 = arith.constant 0 : index
    %44 = vector.load %arg8[%c0_22, %c0_23] : memref<2x32xf32, #tpu.memory_space<vmem>>, vector<2x32xf32>
    %c0_24 = arith.constant 0 : index
    %c0_25 = arith.constant 0 : index
    %45 = vector.load %arg3[%c0_24, %c0_25] : memref<32x128xf32, #tpu.memory_space<vmem>>, vector<32x128xf32>
    %cst_26 = arith.constant dense<0.000000e+00> : vector<2x128xf32>
    %46 = tpu.matmul %44, %45, %cst_26 {dimension_numbers = #tpu.dot_dimension_numbers<[1], [0], [0], [1], [0, 0, 1, 1], [], []>} : vector<2x32xf32>, vector<32x128xf32>, vector<2x128xf32> -> vector<2x128xf32>
    %47 = arith.addf %43, %46 : vector<2x128xf32>
    %48 = vector.extract_strided_slice %47 {offsets = [0, 0], sizes = [2, 32], strides = [1, 1]} : vector<2x128xf32> to vector<2x32xf32>
    %49 = arith.negf %48 : vector<2x32xf32>
    %50 = math.exp %49 : vector<2x32xf32>
    %cst_27 = arith.constant 1.000000e+00 : f32
    %51 = vector.broadcast %cst_27 : f32 to vector<2x32xf32>
    %52 = arith.addf %51, %50 : vector<2x32xf32>
    %53 = arith.divf %51, %52 : vector<2x32xf32>
    %54 = vector.extract_strided_slice %47 {offsets = [0, 32], sizes = [2, 32], strides = [1, 1]} : vector<2x128xf32> to vector<2x32xf32>
    %55 = arith.negf %54 : vector<2x32xf32>
    %56 = math.exp %55 : vector<2x32xf32>
    %cst_28 = arith.constant 1.000000e+00 : f32
    %57 = vector.broadcast %cst_28 : f32 to vector<2x32xf32>
    %58 = arith.addf %57, %56 : vector<2x32xf32>
    %59 = arith.divf %57, %58 : vector<2x32xf32>
    %60 = vector.extract_strided_slice %47 {offsets = [0, 64], sizes = [2, 32], strides = [1, 1]} : vector<2x128xf32> to vector<2x32xf32>
    %61 = math.tanh %60 : vector<2x32xf32>
    %62 = vector.extract_strided_slice %47 {offsets = [0, 96], sizes = [2, 32], strides = [1, 1]} : vector<2x128xf32> to vector<2x32xf32>
    %63 = arith.negf %62 : vector<2x32xf32>
    %64 = math.exp %63 : vector<2x32xf32>
    %cst_29 = arith.constant 1.000000e+00 : f32
    %65 = vector.broadcast %cst_29 : f32 to vector<2x32xf32>
    %66 = arith.addf %65, %64 : vector<2x32xf32>
    %67 = arith.divf %65, %66 : vector<2x32xf32>
    %c0_30 = arith.constant 0 : index
    %c0_31 = arith.constant 0 : index
    %68 = vector.load %arg9[%c0_30, %c0_31] : memref<2x32xf32, #tpu.memory_space<vmem>>, vector<2x32xf32>
    %69 = arith.mulf %59, %68 : vector<2x32xf32>
    %70 = arith.mulf %53, %61 : vector<2x32xf32>
    %71 = arith.addf %69, %70 : vector<2x32xf32>
    %72 = math.tanh %71 : vector<2x32xf32>
    %73 = arith.mulf %67, %72 : vector<2x32xf32>
    %c0_32 = arith.constant 0 : index
    %c0_33 = arith.constant 0 : index
    %74 = vector.load %arg9[%c0_32, %c0_33] : memref<2x32xf32, #tpu.memory_space<vmem>>, vector<2x32xf32>
    tpu.vector_store %arg9[%c0_32, %c0_33], %71 {strides = array<i32>} : memref<2x32xf32, #tpu.memory_space<vmem>>, vector<2x32xf32>,
    %c0_34 = arith.constant 0 : index
    %c0_35 = arith.constant 0 : index
    %75 = vector.load %arg8[%c0_34, %c0_35] : memref<2x32xf32, #tpu.memory_space<vmem>>, vector<2x32xf32>
    tpu.vector_store %arg8[%c0_34, %c0_35], %73 {strides = array<i32>} : memref<2x32xf32, #tpu.memory_space<vmem>>, vector<2x32xf32>,
    %c2 = arith.constant 2 : index
    %c0_36 = arith.constant 0 : index
    %76 = vector.load %arg7[%c2, %c0_36] : memref<16x32xf32, #tpu.memory_space<vmem>>, vector<2x32xf32>
    tpu.vector_store %arg7[%c2, %c0_36], %73 {strides = array<i32>} : memref<16x32xf32, #tpu.memory_space<vmem>>, vector<2x32xf32>,
    %77 = vector.extract_strided_slice %8 {offsets = [4, 0], sizes = [2, 128], strides = [1, 1]} : vector<16x128xf32> to vector<2x128xf32>
    %c0_37 = arith.constant 0 : index
    %c0_38 = arith.constant 0 : index
    %78 = vector.load %arg8[%c0_37, %c0_38] : memref<2x32xf32, #tpu.memory_space<vmem>>, vector<2x32xf32>
    %c0_39 = arith.constant 0 : index
    %c0_40 = arith.constant 0 : index
    %79 = vector.load %arg3[%c0_39, %c0_40] : memref<32x128xf32, #tpu.memory_space<vmem>>, vector<32x128xf32>
    %cst_41 = arith.constant dense<0.000000e+00> : vector<2x128xf32>
    %80 = tpu.matmul %78, %79, %cst_41 {dimension_numbers = #tpu.dot_dimension_numbers<[1], [0], [0], [1], [0, 0, 1, 1], [], []>} : vector<2x32xf32>, vector<32x128xf32>, vector<2x128xf32> -> vector<2x128xf32>
    %81 = arith.addf %77, %80 : vector<2x128xf32>
    %82 = vector.extract_strided_slice %81 {offsets = [0, 0], sizes = [2, 32], strides = [1, 1]} : vector<2x128xf32> to vector<2x32xf32>
    %83 = arith.negf %82 : vector<2x32xf32>
    %84 = math.exp %83 : vector<2x32xf32>
    %cst_42 = arith.constant 1.000000e+00 : f32
    %85 = vector.broadcast %cst_42 : f32 to vector<2x32xf32>
    %86 = arith.addf %85, %84 : vector<2x32xf32>
    %87 = arith.divf %85, %86 : vector<2x32xf32>
    %88 = vector.extract_strided_slice %81 {offsets = [0, 32], sizes = [2, 32], strides = [1, 1]} : vector<2x128xf32> to vector<2x32xf32>
    %89 = arith.negf %88 : vector<2x32xf32>
    %90 = math.exp %89 : vector<2x32xf32>
    %cst_43 = arith.constant 1.000000e+00 : f32
    %91 = vector.broadcast %cst_43 : f32 to vector<2x32xf32>
    %92 = arith.addf %91, %90 : vector<2x32xf32>
    %93 = arith.divf %91, %92 : vector<2x32xf32>
    %94 = vector.extract_strided_slice %81 {offsets = [0, 64], sizes = [2, 32], strides = [1, 1]} : vector<2x128xf32> to vector<2x32xf32>
    %95 = math.tanh %94 : vector<2x32xf32>
    %96 = vector.extract_strided_slice %81 {offsets = [0, 96], sizes = [2, 32], strides = [1, 1]} : vector<2x128xf32> to vector<2x32xf32>
    %97 = arith.negf %96 : vector<2x32xf32>
    %98 = math.exp %97 : vector<2x32xf32>
    %cst_44 = arith.constant 1.000000e+00 : f32
    %99 = vector.broadcast %cst_44 : f32 to vector<2x32xf32>
    %100 = arith.addf %99, %98 : vector<2x32xf32>
    %101 = arith.divf %99, %100 : vector<2x32xf32>
    %c0_45 = arith.constant 0 : index
    %c0_46 = arith.constant 0 : index
    %102 = vector.load %arg9[%c0_45, %c0_46] : memref<2x32xf32, #tpu.memory_space<vmem>>, vector<2x32xf32>
    %103 = arith.mulf %93, %102 : vector<2x32xf32>
    %104 = arith.mulf %87, %95 : vector<2x32xf32>
    %105 = arith.addf %103, %104 : vector<2x32xf32>
    %106 = math.tanh %105 : vector<2x32xf32>
    %107 = arith.mulf %101, %106 : vector<2x32xf32>
    %c0_47 = arith.constant 0 : index
    %c0_48 = arith.constant 0 : index
    %108 = vector.load %arg9[%c0_47, %c0_48] : memref<2x32xf32, #tpu.memory_space<vmem>>, vector<2x32xf32>
    tpu.vector_store %arg9[%c0_47, %c0_48], %105 {strides = array<i32>} : memref<2x32xf32, #tpu.memory_space<vmem>>, vector<2x32xf32>,
    %c0_49 = arith.constant 0 : index
    %c0_50 = arith.constant 0 : index
    %109 = vector.load %arg8[%c0_49, %c0_50] : memref<2x32xf32, #tpu.memory_space<vmem>>, vector<2x32xf32>
    tpu.vector_store %arg8[%c0_49, %c0_50], %107 {strides = array<i32>} : memref<2x32xf32, #tpu.memory_space<vmem>>, vector<2x32xf32>,
    %c4 = arith.constant 4 : index
    %c0_51 = arith.constant 0 : index
    %110 = vector.load %arg7[%c4, %c0_51] : memref<16x32xf32, #tpu.memory_space<vmem>>, vector<2x32xf32>
    tpu.vector_store %arg7[%c4, %c0_51], %107 {strides = array<i32>} : memref<16x32xf32, #tpu.memory_space<vmem>>, vector<2x32xf32>,
    %111 = vector.extract_strided_slice %8 {offsets = [6, 0], sizes = [2, 128], strides = [1, 1]} : vector<16x128xf32> to vector<2x128xf32>
    %c0_52 = arith.constant 0 : index
    %c0_53 = arith.constant 0 : index
    %112 = vector.load %arg8[%c0_52, %c0_53] : memref<2x32xf32, #tpu.memory_space<vmem>>, vector<2x32xf32>
    %c0_54 = arith.constant 0 : index
    %c0_55 = arith.constant 0 : index
    %113 = vector.load %arg3[%c0_54, %c0_55] : memref<32x128xf32, #tpu.memory_space<vmem>>, vector<32x128xf32>
    %cst_56 = arith.constant dense<0.000000e+00> : vector<2x128xf32>
    %114 = tpu.matmul %112, %113, %cst_56 {dimension_numbers = #tpu.dot_dimension_numbers<[1], [0], [0], [1], [0, 0, 1, 1], [], []>} : vector<2x32xf32>, vector<32x128xf32>, vector<2x128xf32> -> vector<2x128xf32>
    %115 = arith.addf %111, %114 : vector<2x128xf32>
    %116 = vector.extract_strided_slice %115 {offsets = [0, 0], sizes = [2, 32], strides = [1, 1]} : vector<2x128xf32> to vector<2x32xf32>
    %117 = arith.negf %116 : vector<2x32xf32>
    %118 = math.exp %117 : vector<2x32xf32>
    %cst_57 = arith.constant 1.000000e+00 : f32
    %119 = vector.broadcast %cst_57 : f32 to vector<2x32xf32>
    %120 = arith.addf %119, %118 : vector<2x32xf32>
    %121 = arith.divf %119, %120 : vector<2x32xf32>
    %122 = vector.extract_strided_slice %115 {offsets = [0, 32], sizes = [2, 32], strides = [1, 1]} : vector<2x128xf32> to vector<2x32xf32>
    %123 = arith.negf %122 : vector<2x32xf32>
    %124 = math.exp %123 : vector<2x32xf32>
    %cst_58 = arith.constant 1.000000e+00 : f32
    %125 = vector.broadcast %cst_58 : f32 to vector<2x32xf32>
    %126 = arith.addf %125, %124 : vector<2x32xf32>
    %127 = arith.divf %125, %126 : vector<2x32xf32>
    %128 = vector.extract_strided_slice %115 {offsets = [0, 64], sizes = [2, 32], strides = [1, 1]} : vector<2x128xf32> to vector<2x32xf32>
    %129 = math.tanh %128 : vector<2x32xf32>
    %130 = vector.extract_strided_slice %115 {offsets = [0, 96], sizes = [2, 32], strides = [1, 1]} : vector<2x128xf32> to vector<2x32xf32>
    %131 = arith.negf %130 : vector<2x32xf32>
    %132 = math.exp %131 : vector<2x32xf32>
    %cst_59 = arith.constant 1.000000e+00 : f32
    %133 = vector.broadcast %cst_59 : f32 to vector<2x32xf32>
    %134 = arith.addf %133, %132 : vector<2x32xf32>
    %135 = arith.divf %133, %134 : vector<2x32xf32>
    %c0_60 = arith.constant 0 : index
    %c0_61 = arith.constant 0 : index
    %136 = vector.load %arg9[%c0_60, %c0_61] : memref<2x32xf32, #tpu.memory_space<vmem>>, vector<2x32xf32>
    %137 = arith.mulf %127, %136 : vector<2x32xf32>
    %138 = arith.mulf %121, %129 : vector<2x32xf32>
    %139 = arith.addf %137, %138 : vector<2x32xf32>
    %140 = math.tanh %139 : vector<2x32xf32>
    %141 = arith.mulf %135, %140 : vector<2x32xf32>
    %c0_62 = arith.constant 0 : index
    %c0_63 = arith.constant 0 : index
    %142 = vector.load %arg9[%c0_62, %c0_63] : memref<2x32xf32, #tpu.memory_space<vmem>>, vector<2x32xf32>
    tpu.vector_store %arg9[%c0_62, %c0_63], %139 {strides = array<i32>} : memref<2x32xf32, #tpu.memory_space<vmem>>, vector<2x32xf32>,
    %c0_64 = arith.constant 0 : index
    %c0_65 = arith.constant 0 : index
    %143 = vector.load %arg8[%c0_64, %c0_65] : memref<2x32xf32, #tpu.memory_space<vmem>>, vector<2x32xf32>
    tpu.vector_store %arg8[%c0_64, %c0_65], %141 {strides = array<i32>} : memref<2x32xf32, #tpu.memory_space<vmem>>, vector<2x32xf32>,
    %c6 = arith.constant 6 : index
    %c0_66 = arith.constant 0 : index
    %144 = vector.load %arg7[%c6, %c0_66] : memref<16x32xf32, #tpu.memory_space<vmem>>, vector<2x32xf32>
    tpu.vector_store %arg7[%c6, %c0_66], %141 {strides = array<i32>} : memref<16x32xf32, #tpu.memory_space<vmem>>, vector<2x32xf32>,
    %145 = vector.extract_strided_slice %8 {offsets = [8, 0], sizes = [2, 128], strides = [1, 1]} : vector<16x128xf32> to vector<2x128xf32>
    %c0_67 = arith.constant 0 : index
    %c0_68 = arith.constant 0 : index
    %146 = vector.load %arg8[%c0_67, %c0_68] : memref<2x32xf32, #tpu.memory_space<vmem>>, vector<2x32xf32>
    %c0_69 = arith.constant 0 : index
    %c0_70 = arith.constant 0 : index
    %147 = vector.load %arg3[%c0_69, %c0_70] : memref<32x128xf32, #tpu.memory_space<vmem>>, vector<32x128xf32>
    %cst_71 = arith.constant dense<0.000000e+00> : vector<2x128xf32>
    %148 = tpu.matmul %146, %147, %cst_71 {dimension_numbers = #tpu.dot_dimension_numbers<[1], [0], [0], [1], [0, 0, 1, 1], [], []>} : vector<2x32xf32>, vector<32x128xf32>, vector<2x128xf32> -> vector<2x128xf32>
    %149 = arith.addf %145, %148 : vector<2x128xf32>
    %150 = vector.extract_strided_slice %149 {offsets = [0, 0], sizes = [2, 32], strides = [1, 1]} : vector<2x128xf32> to vector<2x32xf32>
    %151 = arith.negf %150 : vector<2x32xf32>
    %152 = math.exp %151 : vector<2x32xf32>
    %cst_72 = arith.constant 1.000000e+00 : f32
    %153 = vector.broadcast %cst_72 : f32 to vector<2x32xf32>
    %154 = arith.addf %153, %152 : vector<2x32xf32>
    %155 = arith.divf %153, %154 : vector<2x32xf32>
    %156 = vector.extract_strided_slice %149 {offsets = [0, 32], sizes = [2, 32], strides = [1, 1]} : vector<2x128xf32> to vector<2x32xf32>
    %157 = arith.negf %156 : vector<2x32xf32>
    %158 = math.exp %157 : vector<2x32xf32>
    %cst_73 = arith.constant 1.000000e+00 : f32
    %159 = vector.broadcast %cst_73 : f32 to vector<2x32xf32>
    %160 = arith.addf %159, %158 : vector<2x32xf32>
    %161 = arith.divf %159, %160 : vector<2x32xf32>
    %162 = vector.extract_strided_slice %149 {offsets = [0, 64], sizes = [2, 32], strides = [1, 1]} : vector<2x128xf32> to vector<2x32xf32>
    %163 = math.tanh %162 : vector<2x32xf32>
    %164 = vector.extract_strided_slice %149 {offsets = [0, 96], sizes = [2, 32], strides = [1, 1]} : vector<2x128xf32> to vector<2x32xf32>
    %165 = arith.negf %164 : vector<2x32xf32>
    %166 = math.exp %165 : vector<2x32xf32>
    %cst_74 = arith.constant 1.000000e+00 : f32
    %167 = vector.broadcast %cst_74 : f32 to vector<2x32xf32>
    %168 = arith.addf %167, %166 : vector<2x32xf32>
    %169 = arith.divf %167, %168 : vector<2x32xf32>
    %c0_75 = arith.constant 0 : index
    %c0_76 = arith.constant 0 : index
    %170 = vector.load %arg9[%c0_75, %c0_76] : memref<2x32xf32, #tpu.memory_space<vmem>>, vector<2x32xf32>
    %171 = arith.mulf %161, %170 : vector<2x32xf32>
    %172 = arith.mulf %155, %163 : vector<2x32xf32>
    %173 = arith.addf %171, %172 : vector<2x32xf32>
    %174 = math.tanh %173 : vector<2x32xf32>
    %175 = arith.mulf %169, %174 : vector<2x32xf32>
    %c0_77 = arith.constant 0 : index
    %c0_78 = arith.constant 0 : index
    %176 = vector.load %arg9[%c0_77, %c0_78] : memref<2x32xf32, #tpu.memory_space<vmem>>, vector<2x32xf32>
    tpu.vector_store %arg9[%c0_77, %c0_78], %173 {strides = array<i32>} : memref<2x32xf32, #tpu.memory_space<vmem>>, vector<2x32xf32>,
    %c0_79 = arith.constant 0 : index
    %c0_80 = arith.constant 0 : index
    %177 = vector.load %arg8[%c0_79, %c0_80] : memref<2x32xf32, #tpu.memory_space<vmem>>, vector<2x32xf32>
    tpu.vector_store %arg8[%c0_79, %c0_80], %175 {strides = array<i32>} : memref<2x32xf32, #tpu.memory_space<vmem>>, vector<2x32xf32>,
    %c8 = arith.constant 8 : index
    %c0_81 = arith.constant 0 : index
    %178 = vector.load %arg7[%c8, %c0_81] : memref<16x32xf32, #tpu.memory_space<vmem>>, vector<2x32xf32>
    tpu.vector_store %arg7[%c8, %c0_81], %175 {strides = array<i32>} : memref<16x32xf32, #tpu.memory_space<vmem>>, vector<2x32xf32>,
    %179 = vector.extract_strided_slice %8 {offsets = [10, 0], sizes = [2, 128], strides = [1, 1]} : vector<16x128xf32> to vector<2x128xf32>
    %c0_82 = arith.constant 0 : index
    %c0_83 = arith.constant 0 : index
    %180 = vector.load %arg8[%c0_82, %c0_83] : memref<2x32xf32, #tpu.memory_space<vmem>>, vector<2x32xf32>
    %c0_84 = arith.constant 0 : index
    %c0_85 = arith.constant 0 : index
    %181 = vector.load %arg3[%c0_84, %c0_85] : memref<32x128xf32, #tpu.memory_space<vmem>>, vector<32x128xf32>
    %cst_86 = arith.constant dense<0.000000e+00> : vector<2x128xf32>
    %182 = tpu.matmul %180, %181, %cst_86 {dimension_numbers = #tpu.dot_dimension_numbers<[1], [0], [0], [1], [0, 0, 1, 1], [], []>} : vector<2x32xf32>, vector<32x128xf32>, vector<2x128xf32> -> vector<2x128xf32>
    %183 = arith.addf %179, %182 : vector<2x128xf32>
    %184 = vector.extract_strided_slice %183 {offsets = [0, 0], sizes = [2, 32], strides = [1, 1]} : vector<2x128xf32> to vector<2x32xf32>
    %185 = arith.negf %184 : vector<2x32xf32>
    %186 = math.exp %185 : vector<2x32xf32>
    %cst_87 = arith.constant 1.000000e+00 : f32
    %187 = vector.broadcast %cst_87 : f32 to vector<2x32xf32>
    %188 = arith.addf %187, %186 : vector<2x32xf32>
    %189 = arith.divf %187, %188 : vector<2x32xf32>
    %190 = vector.extract_strided_slice %183 {offsets = [0, 32], sizes = [2, 32], strides = [1, 1]} : vector<2x128xf32> to vector<2x32xf32>
    %191 = arith.negf %190 : vector<2x32xf32>
    %192 = math.exp %191 : vector<2x32xf32>
    %cst_88 = arith.constant 1.000000e+00 : f32
    %193 = vector.broadcast %cst_88 : f32 to vector<2x32xf32>
    %194 = arith.addf %193, %192 : vector<2x32xf32>
    %195 = arith.divf %193, %194 : vector<2x32xf32>
    %196 = vector.extract_strided_slice %183 {offsets = [0, 64], sizes = [2, 32], strides = [1, 1]} : vector<2x128xf32> to vector<2x32xf32>
    %197 = math.tanh %196 : vector<2x32xf32>
    %198 = vector.extract_strided_slice %183 {offsets = [0, 96], sizes = [2, 32], strides = [1, 1]} : vector<2x128xf32> to vector<2x32xf32>
    %199 = arith.negf %198 : vector<2x32xf32>
    %200 = math.exp %199 : vector<2x32xf32>
    %cst_89 = arith.constant 1.000000e+00 : f32
    %201 = vector.broadcast %cst_89 : f32 to vector<2x32xf32>
    %202 = arith.addf %201, %200 : vector<2x32xf32>
    %203 = arith.divf %201, %202 : vector<2x32xf32>
    %c0_90 = arith.constant 0 : index
    %c0_91 = arith.constant 0 : index
    %204 = vector.load %arg9[%c0_90, %c0_91] : memref<2x32xf32, #tpu.memory_space<vmem>>, vector<2x32xf32>
    %205 = arith.mulf %195, %204 : vector<2x32xf32>
    %206 = arith.mulf %189, %197 : vector<2x32xf32>
    %207 = arith.addf %205, %206 : vector<2x32xf32>
    %208 = math.tanh %207 : vector<2x32xf32>
    %209 = arith.mulf %203, %208 : vector<2x32xf32>
    %c0_92 = arith.constant 0 : index
    %c0_93 = arith.constant 0 : index
    %210 = vector.load %arg9[%c0_92, %c0_93] : memref<2x32xf32, #tpu.memory_space<vmem>>, vector<2x32xf32>
    tpu.vector_store %arg9[%c0_92, %c0_93], %207 {strides = array<i32>} : memref<2x32xf32, #tpu.memory_space<vmem>>, vector<2x32xf32>,
    %c0_94 = arith.constant 0 : index
    %c0_95 = arith.constant 0 : index
    %211 = vector.load %arg8[%c0_94, %c0_95] : memref<2x32xf32, #tpu.memory_space<vmem>>, vector<2x32xf32>
    tpu.vector_store %arg8[%c0_94, %c0_95], %209 {strides = array<i32>} : memref<2x32xf32, #tpu.memory_space<vmem>>, vector<2x32xf32>,
    %c10 = arith.constant 10 : index
    %c0_96 = arith.constant 0 : index
    %212 = vector.load %arg7[%c10, %c0_96] : memref<16x32xf32, #tpu.memory_space<vmem>>, vector<2x32xf32>
    tpu.vector_store %arg7[%c10, %c0_96], %209 {strides = array<i32>} : memref<16x32xf32, #tpu.memory_space<vmem>>, vector<2x32xf32>,
    %213 = vector.extract_strided_slice %8 {offsets = [12, 0], sizes = [2, 128], strides = [1, 1]} : vector<16x128xf32> to vector<2x128xf32>
    %c0_97 = arith.constant 0 : index
    %c0_98 = arith.constant 0 : index
    %214 = vector.load %arg8[%c0_97, %c0_98] : memref<2x32xf32, #tpu.memory_space<vmem>>, vector<2x32xf32>
    %c0_99 = arith.constant 0 : index
    %c0_100 = arith.constant 0 : index
    %215 = vector.load %arg3[%c0_99, %c0_100] : memref<32x128xf32, #tpu.memory_space<vmem>>, vector<32x128xf32>
    %cst_101 = arith.constant dense<0.000000e+00> : vector<2x128xf32>
    %216 = tpu.matmul %214, %215, %cst_101 {dimension_numbers = #tpu.dot_dimension_numbers<[1], [0], [0], [1], [0, 0, 1, 1], [], []>} : vector<2x32xf32>, vector<32x128xf32>, vector<2x128xf32> -> vector<2x128xf32>
    %217 = arith.addf %213, %216 : vector<2x128xf32>
    %218 = vector.extract_strided_slice %217 {offsets = [0, 0], sizes = [2, 32], strides = [1, 1]} : vector<2x128xf32> to vector<2x32xf32>
    %219 = arith.negf %218 : vector<2x32xf32>
    %220 = math.exp %219 : vector<2x32xf32>
    %cst_102 = arith.constant 1.000000e+00 : f32
    %221 = vector.broadcast %cst_102 : f32 to vector<2x32xf32>
    %222 = arith.addf %221, %220 : vector<2x32xf32>
    %223 = arith.divf %221, %222 : vector<2x32xf32>
    %224 = vector.extract_strided_slice %217 {offsets = [0, 32], sizes = [2, 32], strides = [1, 1]} : vector<2x128xf32> to vector<2x32xf32>
    %225 = arith.negf %224 : vector<2x32xf32>
    %226 = math.exp %225 : vector<2x32xf32>
    %cst_103 = arith.constant 1.000000e+00 : f32
    %227 = vector.broadcast %cst_103 : f32 to vector<2x32xf32>
    %228 = arith.addf %227, %226 : vector<2x32xf32>
    %229 = arith.divf %227, %228 : vector<2x32xf32>
    %230 = vector.extract_strided_slice %217 {offsets = [0, 64], sizes = [2, 32], strides = [1, 1]} : vector<2x128xf32> to vector<2x32xf32>
    %231 = math.tanh %230 : vector<2x32xf32>
    %232 = vector.extract_strided_slice %217 {offsets = [0, 96], sizes = [2, 32], strides = [1, 1]} : vector<2x128xf32> to vector<2x32xf32>
    %233 = arith.negf %232 : vector<2x32xf32>
    %234 = math.exp %233 : vector<2x32xf32>
    %cst_104 = arith.constant 1.000000e+00 : f32
    %235 = vector.broadcast %cst_104 : f32 to vector<2x32xf32>
    %236 = arith.addf %235, %234 : vector<2x32xf32>
    %237 = arith.divf %235, %236 : vector<2x32xf32>
    %c0_105 = arith.constant 0 : index
    %c0_106 = arith.constant 0 : index
    %238 = vector.load %arg9[%c0_105, %c0_106] : memref<2x32xf32, #tpu.memory_space<vmem>>, vector<2x32xf32>
    %239 = arith.mulf %229, %238 : vector<2x32xf32>
    %240 = arith.mulf %223, %231 : vector<2x32xf32>
    %241 = arith.addf %239, %240 : vector<2x32xf32>
    %242 = math.tanh %241 : vector<2x32xf32>
    %243 = arith.mulf %237, %242 : vector<2x32xf32>
    %c0_107 = arith.constant 0 : index
    %c0_108 = arith.constant 0 : index
    %244 = vector.load %arg9[%c0_107, %c0_108] : memref<2x32xf32, #tpu.memory_space<vmem>>, vector<2x32xf32>
    tpu.vector_store %arg9[%c0_107, %c0_108], %241 {strides = array<i32>} : memref<2x32xf32, #tpu.memory_space<vmem>>, vector<2x32xf32>,
    %c0_109 = arith.constant 0 : index
    %c0_110 = arith.constant 0 : index
    %245 = vector.load %arg8[%c0_109, %c0_110] : memref<2x32xf32, #tpu.memory_space<vmem>>, vector<2x32xf32>
    tpu.vector_store %arg8[%c0_109, %c0_110], %243 {strides = array<i32>} : memref<2x32xf32, #tpu.memory_space<vmem>>, vector<2x32xf32>,
    %c12 = arith.constant 12 : index
    %c0_111 = arith.constant 0 : index
    %246 = vector.load %arg7[%c12, %c0_111] : memref<16x32xf32, #tpu.memory_space<vmem>>, vector<2x32xf32>
    tpu.vector_store %arg7[%c12, %c0_111], %243 {strides = array<i32>} : memref<16x32xf32, #tpu.memory_space<vmem>>, vector<2x32xf32>,
    %247 = vector.extract_strided_slice %8 {offsets = [14, 0], sizes = [2, 128], strides = [1, 1]} : vector<16x128xf32> to vector<2x128xf32>
    %c0_112 = arith.constant 0 : index
    %c0_113 = arith.constant 0 : index
    %248 = vector.load %arg8[%c0_112, %c0_113] : memref<2x32xf32, #tpu.memory_space<vmem>>, vector<2x32xf32>
    %c0_114 = arith.constant 0 : index
    %c0_115 = arith.constant 0 : index
    %249 = vector.load %arg3[%c0_114, %c0_115] : memref<32x128xf32, #tpu.memory_space<vmem>>, vector<32x128xf32>
    %cst_116 = arith.constant dense<0.000000e+00> : vector<2x128xf32>
    %250 = tpu.matmul %248, %249, %cst_116 {dimension_numbers = #tpu.dot_dimension_numbers<[1], [0], [0], [1], [0, 0, 1, 1], [], []>} : vector<2x32xf32>, vector<32x128xf32>, vector<2x128xf32> -> vector<2x128xf32>
    %251 = arith.addf %247, %250 : vector<2x128xf32>
    %252 = vector.extract_strided_slice %251 {offsets = [0, 0], sizes = [2, 32], strides = [1, 1]} : vector<2x128xf32> to vector<2x32xf32>
    %253 = arith.negf %252 : vector<2x32xf32>
    %254 = math.exp %253 : vector<2x32xf32>
    %cst_117 = arith.constant 1.000000e+00 : f32
    %255 = vector.broadcast %cst_117 : f32 to vector<2x32xf32>
    %256 = arith.addf %255, %254 : vector<2x32xf32>
    %257 = arith.divf %255, %256 : vector<2x32xf32>
    %258 = vector.extract_strided_slice %251 {offsets = [0, 32], sizes = [2, 32], strides = [1, 1]} : vector<2x128xf32> to vector<2x32xf32>
    %259 = arith.negf %258 : vector<2x32xf32>
    %260 = math.exp %259 : vector<2x32xf32>
    %cst_118 = arith.constant 1.000000e+00 : f32
    %261 = vector.broadcast %cst_118 : f32 to vector<2x32xf32>
    %262 = arith.addf %261, %260 : vector<2x32xf32>
    %263 = arith.divf %261, %262 : vector<2x32xf32>
    %264 = vector.extract_strided_slice %251 {offsets = [0, 64], sizes = [2, 32], strides = [1, 1]} : vector<2x128xf32> to vector<2x32xf32>
    %265 = math.tanh %264 : vector<2x32xf32>
    %266 = vector.extract_strided_slice %251 {offsets = [0, 96], sizes = [2, 32], strides = [1, 1]} : vector<2x128xf32> to vector<2x32xf32>
    %267 = arith.negf %266 : vector<2x32xf32>
    %268 = math.exp %267 : vector<2x32xf32>
    %cst_119 = arith.constant 1.000000e+00 : f32
    %269 = vector.broadcast %cst_119 : f32 to vector<2x32xf32>
    %270 = arith.addf %269, %268 : vector<2x32xf32>
    %271 = arith.divf %269, %270 : vector<2x32xf32>
    %c0_120 = arith.constant 0 : index
    %c0_121 = arith.constant 0 : index
    %272 = vector.load %arg9[%c0_120, %c0_121] : memref<2x32xf32, #tpu.memory_space<vmem>>, vector<2x32xf32>
    %273 = arith.mulf %263, %272 : vector<2x32xf32>
    %274 = arith.mulf %257, %265 : vector<2x32xf32>
    %275 = arith.addf %273, %274 : vector<2x32xf32>
    %276 = math.tanh %275 : vector<2x32xf32>
    %277 = arith.mulf %271, %276 : vector<2x32xf32>
    %c0_122 = arith.constant 0 : index
    %c0_123 = arith.constant 0 : index
    %278 = vector.load %arg9[%c0_122, %c0_123] : memref<2x32xf32, #tpu.memory_space<vmem>>, vector<2x32xf32>
    tpu.vector_store %arg9[%c0_122, %c0_123], %275 {strides = array<i32>} : memref<2x32xf32, #tpu.memory_space<vmem>>, vector<2x32xf32>,
    %c0_124 = arith.constant 0 : index
    %c0_125 = arith.constant 0 : index
    %279 = vector.load %arg8[%c0_124, %c0_125] : memref<2x32xf32, #tpu.memory_space<vmem>>, vector<2x32xf32>
    tpu.vector_store %arg8[%c0_124, %c0_125], %277 {strides = array<i32>} : memref<2x32xf32, #tpu.memory_space<vmem>>, vector<2x32xf32>,
    %c14 = arith.constant 14 : index
    %c0_126 = arith.constant 0 : index
    %280 = vector.load %arg7[%c14, %c0_126] : memref<16x32xf32, #tpu.memory_space<vmem>>, vector<2x32xf32>
    tpu.vector_store %arg7[%c14, %c0_126], %277 {strides = array<i32>} : memref<16x32xf32, #tpu.memory_space<vmem>>, vector<2x32xf32>,
    return
  }
  func.func @transform_0(%arg0: i32) -> (i32, i32) {
    %c0_i32 = arith.constant 0 : i32
    %c0_i32_0 = arith.constant 0 : i32
    return %arg0, %c0_i32 : i32, i32
  }
  func.func @transform_1(%arg0: i32) -> (i32, i32) {
    %c0_i32 = arith.constant 0 : i32
    %c0_i32_0 = arith.constant 0 : i32
    %c0_i32_1 = arith.constant 0 : i32
    return %c0_i32, %c0_i32_0 : i32, i32
  }
  func.func @transform_2(%arg0: i32) -> (i32, i32) {
    %c0_i32 = arith.constant 0 : i32
    %c0_i32_0 = arith.constant 0 : i32
    %c0_i32_1 = arith.constant 0 : i32
    return %c0_i32, %c0_i32_0 : i32, i32
  }
  func.func @transform_3(%arg0: i32) -> (i32, i32) {
    %c0_i32 = arith.constant 0 : i32
    %c0_i32_0 = arith.constant 0 : i32
    %c0_i32_1 = arith.constant 0 : i32
    return %c0_i32, %c0_i32_0 : i32, i32
  }
  func.func @transform_4(%arg0: i32) -> (i32, i32) {
    %c0_i32 = arith.constant 0 : i32
    %c0_i32_0 = arith.constant 0 : i32
    %c0_i32_1 = arith.constant 0 : i32
    return %c0_i32, %c0_i32_0 : i32, i32
  }
  func.func @transform_5(%arg0: i32) -> (i32, i32) {
    %c0_i32 = arith.constant 0 : i32
    %c0_i32_0 = arith.constant 0 : i32
    %c0_i32_1 = arith.constant 0 : i32
    return %c0_i32, %c0_i32_0 : i32, i32
  }
  func.func @transform_6(%arg0: i32) -> (i32, i32) {
    %c0_i32 = arith.constant 0 : i32
    %c0_i32_0 = arith.constant 0 : i32
    return %arg0, %c0_i32 : i32, i32
  }
}

module attributes {stable_mosaic.version = 11 : i64} {
  func.func @_decoder_tail_kernel(%arg0: memref<16x32xf32, #tpu.memory_space<vmem>>, %arg1: memref<1x32xf32, #tpu.memory_space<vmem>>, %arg2: memref<1x32xf32, #tpu.memory_space<vmem>>, %arg3: memref<32x16xf32, #tpu.memory_space<vmem>>, %arg4: memref<1x16xf32, #tpu.memory_space<vmem>>, %arg5: memref<16x16xf32, #tpu.memory_space<vmem>>) attributes {dimension_semantics = [], scalar_prefetch = 0 : i64, scratch_operands = 0 : i64, tpu.core_type = #tpu.core_type<tc>} {
    %c0 = arith.constant 0 : index
    %c0_0 = arith.constant 0 : index
    %0 = vector.load %arg0[%c0, %c0_0] : memref<16x32xf32, #tpu.memory_space<vmem>>, vector<16x32xf32>
    %cst = arith.constant dense<0.000000e+00> : vector<32xf32>
    %1 = vector.multi_reduction <add>, %0, %cst [0] : vector<16x32xf32> to vector<32xf32>
    %2 = vector.shape_cast %1 : vector<32xf32> to vector<1x32xf32>
    %cst_1 = arith.constant 1.600000e+01 : f32
    %3 = vector.broadcast %cst_1 : f32 to vector<1x32xf32>
    %4 = arith.divf %2, %3 : vector<1x32xf32>
    %5 = vector.broadcast %4 : vector<1x32xf32> to vector<16x32xf32>
    %6 = arith.subf %0, %5 : vector<16x32xf32>
    %7 = arith.mulf %6, %6 : vector<16x32xf32>
    %cst_2 = arith.constant dense<0.000000e+00> : vector<32xf32>
    %8 = vector.multi_reduction <add>, %7, %cst_2 [0] : vector<16x32xf32> to vector<32xf32>
    %9 = vector.shape_cast %8 : vector<32xf32> to vector<1x32xf32>
    %cst_3 = arith.constant 1.600000e+01 : f32
    %10 = vector.broadcast %cst_3 : f32 to vector<1x32xf32>
    %11 = arith.divf %9, %10 : vector<1x32xf32>
    %12 = vector.broadcast %4 : vector<1x32xf32> to vector<16x32xf32>
    %13 = arith.subf %0, %12 : vector<16x32xf32>
    %cst_4 = arith.constant 9.99999974E-6 : f32
    %14 = vector.broadcast %cst_4 : f32 to vector<1x32xf32>
    %15 = arith.addf %11, %14 : vector<1x32xf32>
    %16 = math.rsqrt %15 : vector<1x32xf32>
    %17 = vector.broadcast %16 : vector<1x32xf32> to vector<16x32xf32>
    %18 = arith.mulf %13, %17 : vector<16x32xf32>
    %c0_5 = arith.constant 0 : index
    %c0_6 = arith.constant 0 : index
    %19 = vector.load %arg1[%c0_5, %c0_6] : memref<1x32xf32, #tpu.memory_space<vmem>>, vector<1x32xf32>
    %20 = vector.broadcast %19 : vector<1x32xf32> to vector<16x32xf32>
    %21 = arith.mulf %18, %20 : vector<16x32xf32>
    %c0_7 = arith.constant 0 : index
    %c0_8 = arith.constant 0 : index
    %22 = vector.load %arg2[%c0_7, %c0_8] : memref<1x32xf32, #tpu.memory_space<vmem>>, vector<1x32xf32>
    %23 = vector.broadcast %22 : vector<1x32xf32> to vector<16x32xf32>
    %24 = arith.addf %21, %23 : vector<16x32xf32>
    %c0_9 = arith.constant 0 : index
    %c0_10 = arith.constant 0 : index
    %25 = vector.load %arg3[%c0_9, %c0_10] : memref<32x16xf32, #tpu.memory_space<vmem>>, vector<32x16xf32>
    %cst_11 = arith.constant dense<0.000000e+00> : vector<16x16xf32>
    %26 = tpu.matmul %24, %25, %cst_11 {dimension_numbers = #tpu.dot_dimension_numbers<[1], [0], [0], [1], [0, 0, 1, 1], [], []>} : vector<16x32xf32>, vector<32x16xf32>, vector<16x16xf32> -> vector<16x16xf32>
    %c0_12 = arith.constant 0 : index
    %c0_13 = arith.constant 0 : index
    %27 = vector.load %arg4[%c0_12, %c0_13] : memref<1x16xf32, #tpu.memory_space<vmem>>, vector<1x16xf32>
    %28 = vector.broadcast %27 : vector<1x16xf32> to vector<16x16xf32>
    %29 = arith.addf %26, %28 : vector<16x16xf32>
    %cst_14 = arith.constant dense<0xFF800000> : vector<16xf32>
    %30 = vector.multi_reduction <maximumf>, %29, %cst_14 [1] : vector<16x16xf32> to vector<16xf32>
    %31 = vector.shape_cast %30 : vector<16xf32> to vector<16x1xf32>
    %32 = vector.broadcast %31 : vector<16x1xf32> to vector<16x16xf32>
    %33 = arith.subf %29, %32 : vector<16x16xf32>
    %34 = math.exp %33 : vector<16x16xf32>
    %cst_15 = arith.constant dense<0.000000e+00> : vector<16xf32>
    %35 = vector.multi_reduction <add>, %34, %cst_15 [1] : vector<16x16xf32> to vector<16xf32>
    %36 = vector.shape_cast %35 : vector<16xf32> to vector<16x1xf32>
    %37 = math.log %36 : vector<16x1xf32>
    %38 = arith.addf %31, %37 : vector<16x1xf32>
    %39 = vector.broadcast %38 : vector<16x1xf32> to vector<16x16xf32>
    %40 = arith.subf %29, %39 : vector<16x16xf32>
    %c0_16 = arith.constant 0 : index
    %c0_17 = arith.constant 0 : index
    %41 = vector.load %arg5[%c0_16, %c0_17] : memref<16x16xf32, #tpu.memory_space<vmem>>, vector<16x16xf32>
    tpu.vector_store %arg5[%c0_16, %c0_17], %40 {strides = array<i32>} : memref<16x16xf32, #tpu.memory_space<vmem>>, vector<16x16xf32>,
    return
  }
}

</mosaic_0001>

<bundles_post_ra>
// kernel: model_forward.4
= control target key start
LH: loop header
LB: loop body
LE: loop exit
PB: predicated region body
PF: predicated region fallthrough
CT: control target
= control target key end

     0   :  { %10 = vsyncpa [#allocation3], 0  ;;  %s385_s0 = inlined_call_operand.vmem [shape: f32[2,32], index: 0, kind: input, shape index: {}]   ;;  %s386_s1 = inlined_call_operand.vmem [shape: f32[32,64], index: 1, kind: input, shape index: {}]   ;;  %s387_s2 = inlined_call_operand.hbm [shape: f32[1,64], index: 2, kind: input, shape index: {}]   ;;  %s388_s3 = inlined_call_operand.hbm [shape: f32[1,64], index: 3, kind: input, shape index: {}]   ;;  %s389_s4 = inlined_call_operand.hbm [shape: f32[1,64], index: 4, kind: input, shape index: {}]   ;;  %s390_s5 = inlined_call_operand.vmem [shape: f32[2,64], index: 5, kind: output, shape index: {}]  }
   0x1   :  { %11 = vsyncpa [#allocation5], 0  ;;  %s292_s18 = smov [#allocation4]   ;;  %s293_s20 = smov [#allocation2]  }
   0x2   :  { %s32_s19 = sshll.u32 %s292_s18, 4  ;;  %s22_s21 = sshll.u32 %s293_s20, 4  ;;  %s33_s19 = int_to_ptr.vmem [resolvable:$true] %s32_s19  ;;  %s23_s21 = int_to_ptr.vmem [resolvable:$true] %s22_s21 }
   0x3   :  { %s222_s24 = scalar_lea.hbm %s388_s3, 16 }
   0x4   :  { %p223_p0 = scmp.ne.s32.totalorder %s388_s3, %s222_s24  ;;  %p226_p1 = scmp.lt.u32.totalorder %s222_s24, %s388_s3 }
   0x6   :  { %p228_p2 = pnand %p226_p1, %p223_p0 }
   0x8   :  { %231 = shalt.err (!%p228_p2)
}
   0x9   :  { %s232_s29 = scalar_lea.vmem %s33_s19, 16  ;;  %s236_s30 = scalar_lea.vmem %s33_s19, 32 }
   0xa   :  { %p233_p3 = scmp.ne.s32.totalorder %s33_s19, %s232_s29  ;;  %p237_p4 = scmp.lt.s32.totalorder %s33_s19, %s33_s19 }
   0xb   :  { %p238_p5 = scmp.lt.s32.totalorder %s236_s30, %s232_s29 }
   0xd   :  { %p239_p6 = por %p238_p5, %p237_p4 }
   0xf   :  { %p240_p7 = pnand %p239_p6, %p233_p3 }
  0x11   :  { %243 = shalt.err (!%p240_p7)
}
  0x12   :  { %35 = dma.hbm_to_vmem [thread:$0]  %s388_s3, 16, %s33_s19, [#allocation5]  }
  0x13   :  { %s244_s10 = scalar_lea.hbm %s387_s2, 16 }
  0x14   :  { %p245_p8 = scmp.ne.s32.totalorder %s387_s2, %s244_s10  ;;  %p248_p9 = scmp.lt.u32.totalorder %s244_s10, %s387_s2 }
  0x16   :  { %p250_p10 = pnand %p248_p9, %p245_p8 }
  0x18   :  { %253 = shalt.err (!%p250_p10)
}
  0x19   :  { %s254_s15 = scalar_lea.vmem %s23_s21, 16  ;;  %s258_s16 = scalar_lea.vmem %s23_s21, 32 }
  0x1a   :  { %p255_p11 = scmp.ne.s32.totalorder %s23_s21, %s254_s15  ;;  %p259_p12 = scmp.lt.s32.totalorder %s23_s21, %s23_s21 }
  0x1b   :  { %p260_p13 = scmp.lt.s32.totalorder %s258_s16, %s254_s15 }
  0x1d   :  { %p261_p0 = por %p260_p13, %p259_p12 }
  0x1f   :  { %p262_p1 = pnand %p261_p0, %p255_p11 }
  0x21   :  { %265 = shalt.err (!%p262_p1)
}
  0x22   :  { %25 = dma.hbm_to_vmem [thread:$0]  %s387_s2, 16, %s23_s21, [#allocation3]  }
  0x23   :  { %s294_s18 = smov [#allocation6]   ;;  %s266_s23 = scalar_lea.hbm %s389_s4, 16 }
  0x24   :  { %s42_s19 = sshll.u32 %s294_s18, 4  ;;  %p267_p2 = scmp.ne.s32.totalorder %s389_s4, %s266_s23  ;;  %s43_s19 = int_to_ptr.vmem [resolvable:$true] %s42_s19 }
  0x25   :  { %p270_p3 = scmp.lt.u32.totalorder %s266_s23, %s389_s4 }
  0x27   :  { %p272_p4 = pnand %p270_p3, %p267_p2 }
  0x29   :  { %275 = shalt.err (!%p272_p4)
}
  0x2a   :  { %s276_s28 = scalar_lea.vmem %s43_s19, 16  ;;  %s280_s2 = scalar_lea.vmem %s43_s19, 32 }
  0x2b   :  { %p277_p5 = scmp.ne.s32.totalorder %s43_s19, %s276_s28  ;;  %p281_p6 = scmp.lt.s32.totalorder %s43_s19, %s43_s19 }
  0x2c   :  { %p282_p7 = scmp.lt.s32.totalorder %s280_s2, %s276_s28 }
  0x2e   :  { %p283_p8 = por %p282_p7, %p281_p6 }
  0x30   :  { %p284_p9 = pnand %p283_p8, %p277_p5 }
  0x32   :  { %287 = shalt.err (!%p284_p9)
}
  0x33   :  { %45 = dma.hbm_to_vmem [thread:$0]  %s389_s4, 16, %s43_s19, [#allocation5]  }
  0x34   :  { %288 = dma.done.wait [#allocation3], 16  }
  0x35   :  { %289 = vsyncadd [#allocation3], 4294967280 }
  0x36   :  { %290 = dma.done.wait [#allocation5], 32  }
  0x37   :  { %291 = vsyncadd [#allocation5], 4294967264  ;;  %v295_v0 = vmov 0.0|0.0   ;;  %vm296_vm0 = vmmov 0   ;;  %v297_v1 = vmov 0.0   ;;  %v56_v2 = vld [vmem:[%s386_s1] sm:$0xff] }
  0x38   :  { %208 = vmatprep.subr.bf16.mxu0 %v295_v0  ;;  %205 = vmatprep.mubr.msk.f32.mxu0 %vm296_vm0, %v297_v1  ;;  %v57_v3 = vld [vmem:[%s386_s1 + $0x8] sm:$0xff]  ;;  %v58_v4 = vld [vmem:[%s386_s1 + $0x10] sm:$0xff]  ;;  %v59_v6 = vld [vmem:[%s386_s1 + $0x18] sm:$0xff]  ;;  %vm67_vm1 = vcmask 261120   ;;  %vm141_vm2 = vcmask 517120  }
  0x39   :  { %v209_v5 = vpack.c.bf16 %v57_v3, %v56_v2  ;;  %v212_v7 = vpack.c.bf16 %v59_v6, %v58_v4  ;;  %v55_v8 = vld [vmem:[%s385_s0] sm:$0x3]  ;;  %v190_v33 = vld [vmem:[#allocation4] ss:$0 sm:$0xff]  ;;  %v191_v35 = vld [vmem:[#allocation6] ss:$0 sm:$0xff] }
  0x3a   :  { %v188_v9 = vld [vmem:[#allocation2] ss:$0 sm:$0xff] }
  0x3b   :  { %210 = vmatpush3.bf16.msra.mxu0 %v209_v5 }
  0x3c   :  { %211 = vmatprep.subr.bf16.mxu0 %v295_v0 }
  0x3f   :  { %213 = vmatpush3.bf16.msra.mxu0 %v212_v7 }
  0x42   :  { %206 = vmatmul.mubr.msk.f32.vlgmr.msra.gmra.mrb[0].mxu0 %vm67_vm1, %v55_v8 }
 0x115   :  { %v137_v10 = vpop.f32.mrb[0].mxu0 }
 0x116   :  { %v138_v11 = vadd.f32 %v188_v9, %v137_v10  ;;  %v207_v12 = vpop.f32.mrb[1].mxu0 }
 0x118   :  { %v142_v13 = vsel %vm141_vm2, %v138_v11, 0.0 }
 0x119   :  { %v143_v14 = vrot.slane %v142_v13, 4 }
 0x11b   :  { %v144_v15 = vadd.f32 %v143_v14, %v142_v13 }
 0x11d   :  { %v145_v16 = vrot.slane %v144_v15, 2 }
 0x11f   :  { %v146_v17 = vadd.f32 %v145_v16, %v144_v15 }
 0x121   :  { %v147_v18 = vrot.slane %v146_v17, 1 }
 0x123   :  { %v148_v19 = vadd.f32 %v147_v18, %v146_v17 }
 0x125   :  { %v150_v20 = vmul.f32 0.5, %v148_v19 }
 0x127   :  { %v151_v21 = vsub.f32 %v138_v11, %v150_v20 }
 0x129   :  { %v152_v22 = vmul.f32 %v151_v21, %v151_v21 }
 0x12b   :  { %v153_v23 = vsel %vm141_vm2, %v152_v22, 0.0 }
 0x12c   :  { %v154_v24 = vrot.slane %v153_v23, 4 }
 0x12e   :  { %v155_v25 = vadd.f32 %v154_v24, %v153_v23 }
 0x130   :  { %v156_v26 = vrot.slane %v155_v25, 2 }
 0x132   :  { %v157_v27 = vadd.f32 %v156_v26, %v155_v25 }
 0x134   :  { %v158_v28 = vrot.slane %v157_v27, 1 }
 0x136   :  { %v159_v29 = vadd.f32 %v158_v28, %v157_v27 }
 0x138   :  { %v160_v30 = vmul.f32 0.5, %v159_v29 }
 0x13a   :  { %v161_v31 = vadd.f32 1e-05, %v160_v30 }
 0x13c   :  { %220 = vrsqrt.f32 %v161_v31 }
 0x146   :  { %v221_v32 = vpop.eup %220 }
 0x147   :  { %v163_v34 = vmul.f32 %v221_v32, %v151_v21 }
 0x149   :  { %v171_v36 = vmul.f32 %v190_v33, %v163_v34 }
 0x14b   :  { %v179_v37 = vadd.f32 %v191_v35, %v171_v36 }
 0x14d   :  { %v180_v38 = vmax.f32 %v179_v37, 0.0 }
 0x14f   :  { %181 = vst.msk [vmem:[%s390_s5] sm:$0x3] %vm141_vm2, %v180_v38 }
 0x150   :  { %186 = vsyncpa [#allocation3], 1 }
 0x151   :  { %187 = vsyncpa [#allocation5], 1 }

// kernel: model_forward.7
= control target key start
LH: loop header
LB: loop body
LE: loop exit
PB: predicated region body
PF: predicated region fallthrough
CT: control target
= control target key end

     0   :  { %vm22_vm0 = vcmask 261120   ;;  %vm162_vm1 = vcmask 130048   ;;  %s310_s3 = inlined_call_operand.vmem [shape: f32[32,16], index: 3, kind: input, shape index: {}]   ;;  %s311_s0 = inlined_call_operand.vmem [shape: f32[16,32], index: 0, kind: input, shape index: {}]   ;;  %s312_s1 = inlined_call_operand.vmem [shape: f32[1,32], index: 1, kind: input, shape index: {}]   ;;  %s313_s2 = inlined_call_operand.vmem [shape: f32[1,32], index: 2, kind: input, shape index: {}]   ;;  %s314_s4 = inlined_call_operand.vmem [shape: f32[1,16], index: 4, kind: input, shape index: {}]   ;;  %s315_s5 = inlined_call_operand.vmem [shape: f32[16,16], index: 5, kind: output, shape index: {}]  }
   0x1   :  { %v70_v0 = vld [vmem:[%s310_s3] sm:$0xff]  ;;  %v71_v1 = vld [vmem:[%s310_s3 + $0x8] sm:$0xff]  ;;  %v72_v2 = vld [vmem:[%s310_s3 + $0x10] sm:$0xff] }
   0x2   :  { %v217_v3 = vpack.c.bf16 %v71_v1, %v70_v0  ;;  %v73_v4 = vld [vmem:[%s310_s3 + $0x18] sm:$0xff]  ;;  %v20_v5 = vld [vmem:[%s311_s0] sm:$0xff]  ;;  %v21_v6 = vld [vmem:[%s311_s0 + $0x8] sm:$0xff] }
   0x3   :  { %v221_v7 = vpack.c.bf16 %v73_v4, %v72_v2  ;;  %v23_v8 = vsel %vm22_vm0, %v20_v5, 0.0  ;;  %v24_v9 = vsel %vm22_vm0, %v21_v6, 0.0  ;;  %v195_v34 = vld [vmem:[%s312_s1] ss:$0 sm:$0xff] }
   0x4   :  { %218 = vmatprep.subr.bf16.mxu0 %v217_v3  ;;  %v25_v10 = vadd.f32 %v24_v9, %v23_v8  ;;  %v196_v37 = vld [vmem:[%s313_s2] ss:$0 sm:$0xff] }
   0x5   :  { %220 = vmatpush3.bf16.msra.mxu0 %v217_v3  ;;  %v197_v42 = vld [vmem:[%s314_s4] ss:$0 sm:$0xff] }
   0x6   :  { %222 = vmatprep.subr.bf16.mxu0 %v221_v7  ;;  %v26_v11 = vrot.slane %v25_v10, 4 }
   0x8   :  { %v27_v12 = vadd.f32 %v26_v11, %v25_v10 }
   0x9   :  { %224 = vmatpush3.bf16.msra.mxu0 %v221_v7 }
   0xa   :  { %v28_v13 = vrot.slane %v27_v12, 2 }
   0xc   :  { %v29_v14 = vadd.f32 %v28_v13, %v27_v12 }
   0xe   :  { %v30_v15 = vrot.slane %v29_v14, 1 }
  0x10   :  { %v31_v16 = vadd.f32 %v30_v15, %v29_v14 }
  0x12   :  { %v33_v17 = vmul.f32 0.0625, %v31_v16 }
  0x14   :  { %v34_v18 = vsub.f32 %v20_v5, %v33_v17  ;;  %v35_v19 = vsub.f32 %v21_v6, %v33_v17 }
  0x16   :  { %v36_v20 = vmul.f32 %v34_v18, %v34_v18  ;;  %v37_v21 = vmul.f32 %v35_v19, %v35_v19 }
  0x18   :  { %v38_v22 = vsel %vm22_vm0, %v36_v20, 0.0  ;;  %v39_v23 = vsel %vm22_vm0, %v37_v21, 0.0 }
  0x19   :  { %v40_v24 = vadd.f32 %v39_v23, %v38_v22 }
  0x1b   :  { %v41_v25 = vrot.slane %v40_v24, 4 }
  0x1d   :  { %v42_v26 = vadd.f32 %v41_v25, %v40_v24 }
  0x1f   :  { %v43_v27 = vrot.slane %v42_v26, 2 }
  0x21   :  { %v44_v28 = vadd.f32 %v43_v27, %v42_v26 }
  0x23   :  { %v45_v29 = vrot.slane %v44_v28, 1 }
  0x25   :  { %v46_v30 = vadd.f32 %v45_v29, %v44_v28 }
  0x27   :  { %v47_v31 = vmul.f32 0.0625, %v46_v30 }
  0x29   :  { %v48_v32 = vadd.f32 1e-05, %v47_v31 }
  0x2b   :  { %225 = vrsqrt.f32 %v48_v32 }
  0x35   :  { %v226_v33 = vpop.eup %225 }
  0x36   :  { %v50_v35 = vmul.f32 %v226_v33, %v34_v18  ;;  %v51_v36 = vmul.f32 %v226_v33, %v35_v19 }
  0x38   :  { %v59_v38 = vmul.f32 %v195_v34, %v50_v35  ;;  %v60_v39 = vmul.f32 %v195_v34, %v51_v36 }
  0x3a   :  { %v68_v40 = vadd.f32 %v196_v37, %v59_v38  ;;  %v69_v41 = vadd.f32 %v196_v37, %v60_v39 }
  0x3c   :  { %214 = vmatprep.mubr.msk.f32.mxu0 %vm22_vm0, %v68_v40 }
  0x3d   :  { %215 = vmatmul.mubr.msk.f32.vlgmr.msra.gmra.mrb[0].mxu0 %vm22_vm0, %v69_v41 }
 0x110   :  { %v216_v43 = vpop.f32.mrb[0].mxu0 }
 0x111   :  { %v153_v44 = vpop.f32.mrb[1].mxu0  ;;  %v159_v46 = vadd.f32 %v216_v43, %v197_v42 }
 0x112   :  { %v154_v45 = vadd.f32 %v197_v42, %v153_v44 }
 0x113   :  { %v166_v48 = vsel %vm162_vm1, %v159_v46, -inf }
 0x114   :  { %v163_v47 = vsel %vm162_vm1, %v154_v45, -inf }
 0x115   :  { %164 = vmax.xlane.f32.xlu0 %v163_v47 }
 0x119   :  { %167 = vmax.xlane.f32.xlu0 %v166_v48 }
 0x1a2   :  { %v165_v49 = vpop.xlane.xlu0 %164 }
 0x1a3   :  { %v169_v50 = vsub.f32 %v154_v45, %v165_v49 }
 0x1a5   :  { %v171_v51 = vmul.f32 1.442695, %v169_v50 }
 0x1a6   :  { %v168_v52 = vpop.xlane.xlu0 %167 }
 0x1a7   :  { %227 = vpow2.f32 %v171_v51  ;;  %v170_v53 = vsub.f32 %v159_v46, %v168_v52 }
 0x1a9   :  { %v173_v54 = vmul.f32 1.442695, %v170_v53 }
 0x1ab   :  { %229 = vpow2.f32 %v173_v54 }
 0x1b1   :  { %v228_v55 = vpop.eup %227 }
 0x1b2   :  { %v175_v56 = vsel %vm162_vm1, %v228_v55, 0.0 }
 0x1b3   :  { %176 = vadd.xlane.f32.xlu1 %v175_v56 }
 0x1b5   :  { %v230_v57 = vpop.eup %229 }
 0x1b6   :  { %v178_v58 = vsel %vm162_vm1, %v230_v57, 0.0 }
 0x1b7   :  { %179 = vadd.xlane.f32.xlu1 %v178_v58 }
 0x240   :  { %v177_v59 = vpop.xlane.xlu1 %176 }
 0x241   :  { %231 = vlog2.f32 %v177_v59 }
 0x244   :  { %v180_v60 = vpop.xlane.xlu1 %179 }
 0x245   :  { %233 = vlog2.f32 %v180_v60 }
 0x24b   :  { %v232_v61 = vpop.eup %231 }
 0x24c   :  { %v182_v62 = vmul.f32 0.6931472, %v232_v61 }
 0x24e   :  { %v185_v63 = vadd.f32 %v182_v62, %v165_v49 }
 0x24f   :  { %v234_v0 = vpop.eup %233 }
 0x250   :  { %v187_v1 = vsub.f32 %v154_v45, %v185_v63  ;;  %v184_v2 = vmul.f32 0.6931472, %v234_v0 }
 0x252   :  { %189 = vst.msk [vmem:[%s315_s5] sm:$0xff] %vm162_vm1, %v187_v1  ;;  %v186_v3 = vadd.f32 %v184_v2, %v168_v52 }
 0x254   :  { %v188_v4 = vsub.f32 %v159_v46, %v186_v3 }
 0x256   :  { %190 = vst.msk [vmem:[%s315_s5 + $0x8] sm:$0xff] %vm162_vm1, %v188_v4 }

// kernel: model_forward.5
= control target key start
LH: loop header
LB: loop body
LE: loop exit
PB: predicated region body
PF: predicated region fallthrough
CT: control target
= control target key end

     0   :  { %vm43_vm0 = vcmask 130048   ;;  %v1390_v0 = vmov 0.0|0.0   ;;  %vm1391_vm1 = vmmov 0   ;;  %v1392_v4 = vmov 0.0   ;;  %s1393_s15 = smov 64   ;;  %s1636_s1 = inlined_call_operand.vmem [shape: f32[16,128], index: 1, kind: input, shape index: {}]   ;;  %s1637_s2 = inlined_call_operand.vmem [shape: f32[32,128], index: 2, kind: input, shape index: {}]   ;;  %s1638_s0 = inlined_call_operand.vmem [shape: f32[16,16], index: 0, kind: input, shape index: {}]   ;;  %s1639_s4 = inlined_call_operand.vmem [shape: f32[2,32], index: 4, kind: input, shape index: {}]   ;;  %s1640_s5 = inlined_call_operand.vmem [shape: f32[2,32], index: 5, kind: input, shape index: {}]   ;;  %s1641_s3 = inlined_call_operand.vmem [shape: f32[1,128], index: 3, kind: input, shape index: {}]   ;;  %s1642_s6 = inlined_call_operand.vmem [shape: f32[16,32], index: 6, kind: output, shape index: {}]  }
   0x1   :  { %1272 = vmatprep.subr.bf16.mxu1 %v1390_v0  ;;  %v34_v1 = vld [vmem:[%s1636_s1] sm:$0xff]  ;;  %v35_v2 = vld [vmem:[%s1636_s1 + $0x8] sm:$0xff]  ;;  %1188 = vmatprep.mubr.msk.f32.mxu1 %vm1391_vm1, %v1392_v4  ;;  %vm28_vm2 = vcmask 254976   ;;  %v128_v9 = vld [vmem:[%s1637_s2 + $0x10] sm:$0xff]  ;;  %vm130_vm3 = vcmask 261120   ;;  %vm362_vm4 = vcmask 257026  }
   0x2   :  { %v126_v3 = vld [vmem:[%s1637_s2] sm:$0xff]  ;;  %v1268_v5 = vpack.c.bf16 %v35_v2, %v34_v1  ;;  %v127_v6 = vld [vmem:[%s1637_s2 + $0x8] sm:$0xff]  ;;  %v129_v10 = vld [vmem:[%s1637_s2 + $0x18] sm:$0xff]  ;;  %vm486_vm5 = vcmask 259076   ;;  %vm610_vm6 = vcmask 261126  }
   0x3   :  { %v32_v7 = vld [vmem:[%s1638_s0] sm:$0xff]  ;;  %v1449_v8 = vpack.c.bf16 %v127_v6, %v126_v3  ;;  %v33_v12 = vld [vmem:[%s1638_s0 + $0x8] sm:$0xff]  ;;  %v1466_v13 = vpack.c.bf16 %v129_v10, %v128_v9 }
   0x4   :  { %1177 = vmatprep.mubr.msk.f32.mxu0 %vm43_vm0, %v32_v7  ;;  %v27_v11 = vld [vmem:[%s1639_s4] sm:$0x3]  ;;  %1269 = vmatprep.subr.bf16.mxu0 %v1268_v5 }
   0x5   :  { %29 = vst.msk [vmem:[#allocation2] sm:$0x3] %vm28_vm2, %v27_v11  ;;  %1274 = vmatpush3.bf16.msra.mxu1 %v1449_v8  ;;  %1271 = vmatpush3.bf16.msra.mxu0 %v1268_v5  ;;  %v30_v15 = vld [vmem:[%s1640_s5] sm:$0x3]  ;;  %s1394_s5 = smov 32  }
   0x6   :  { %1275 = vmatprep.subr.bf16.mxu1 %v1390_v0  ;;  %1278 = vmatprep.subr.bf16.mxu0 %v1390_v0  ;;  %31 = vst.msk [vmem:[#allocation3] sm:$0x3] %vm28_vm2, %v30_v15  ;;  %v1110_v16 = vld [vmem:[%s1641_s3] ss:$0 sm:$0xff]  ;;  %s1395_s3 = smov 96  }
   0x8   :  { %1178 = vmatmul.mubr.msk.f32.vlgmr.msra.gmra.mrb[0].mxu0 %vm43_vm0, %v33_v12 }
   0x9   :  { %1277 = vmatpush3.bf16.msra.mxu1 %v1466_v13  ;;  %1280 = vmatpush3.bf16.msra.mxu0 %v1449_v8 }
   0xa   :  { %1281 = vmatprep.subr.bf16.mxu0 %v1390_v0  ;;  %1199 = vmatprep.mubr.msk.f32.mxu0 %vm1391_vm1, %v1392_v4 }
   0xb   :  { %1284 = vmatprep.subr.bf16.mxu1 %v1390_v0 }
   0xc   :  { %v125_v14 = vld [vmem:[#allocation2] sm:$0x3] }
   0xd   :  { %1189 = vmatmul.mubr.msk.f32.vlgmr.msra.gmra.mrb[0].mxu1 %vm130_vm3, %v125_v14  ;;  %1283 = vmatpush3.bf16.msra.mxu0 %v1466_v13  ;;  %v212_v25 = vld [vmem:[#allocation3] sm:$0x3] }
   0xe   :  { %1286 = vmatpush3.bf16.msra.mxu1 %v1449_v8  ;;  %1210 = vmatprep.mubr.msk.f32.mxu1 %vm1391_vm1, %v1392_v4 }
   0xf   :  { %1287 = vmatprep.subr.bf16.mxu1 %v1390_v0  ;;  %1290 = vmatprep.subr.bf16.mxu0 %v1390_v0 }
  0x12   :  { %1289 = vmatpush3.bf16.msra.mxu1 %v1466_v13 }
  0x13   :  { %1296 = vmatprep.subr.bf16.mxu1 %v1390_v0 }
  0xdb   :  { %v1179_v17 = vpop.f32.mrb[0].mxu0 }
  0xdc   :  { %v1493_v18 = vadd.f32 %v1179_v17, %v1110_v16  ;;  %v116_v19 = vpop.f32.mrb[1].mxu0 }
  0xdd   :  { %v1495_v20 = vadd.f32 %v1110_v16, %v116_v19 }
  0xe0   :  { %v200_v21 = vpop.f32.mrb[0].mxu1 }
  0xe1   :  { %v204_v22 = vadd.f32 %v200_v21, %v1495_v20  ;;  %v1190_v23 = vpop.f32.mrb[1].mxu1 }
  0xe3   :  { %1326 = vtanh.f32 %v204_v22  ;;  %v1114_v26 = vmul.f32 -1.442695, %v204_v22 }
  0xe5   :  { %1328 = vpow2.f32 %v1114_v26 }
  0xed   :  { %v1327_v24 = vpop.eup %1326 }
  0xee   :  { %219 = vrot.lane.b32.xlu0 %v1327_v24, %s1393_s15 }
  0xef   :  { %v1329_v27 = vpop.eup %1328 }
  0xf0   :  { %v208_v28 = vadd.f32 1.0, %v1329_v27 }
  0xf2   :  { %214 = vrot.lane.b32.xlu0 %v212_v25, %s1394_s5  ;;  %1330 = vrcp.f32 %v208_v28 }
  0xfc   :  { %v1331_v29 = vpop.eup %1330 }
 0x160   :  { %v220_v30 = vpop.permute.xlu0 %219 }
 0x161   :  { %v222_v31 = vmul.f32 %v1331_v29, %v220_v30 }
 0x163   :  { %224 = vrot.lane.b32.xlu1 %v222_v31, %s1394_s5 }
 0x164   :  { %v215_v32 = vpop.permute.xlu0 %214 }
 0x165   :  { %v217_v33 = vmul.f32 %v1331_v29, %v215_v32 }
 0x1d5   :  { %v225_v34 = vpop.permute.xlu1 %224 }
 0x1d6   :  { %v227_v35 = vadd.f32 %v225_v34, %v217_v33 }
 0x1d8   :  { %1332 = vtanh.f32 %v227_v35 }
 0x1e2   :  { %v1333_v36 = vpop.eup %1332 }
 0x1e3   :  { %230 = vrot.lane.b32.xlu1 %v1333_v36, %s1393_s15 }
 0x1e7   :  { %235 = vrot.lane.b32.xlu1 %v227_v35, %s1395_s3 }
 0x255   :  { %v231_v37 = vpop.permute.xlu1 %230 }
 0x256   :  { %v233_v38 = vmul.f32 %v1331_v29, %v231_v37 }
 0x258   :  { %241 = vrot.lane.b32.xlu0 %v233_v38, %s1394_s5 }
 0x259   :  { %v236_v39 = vpop.permute.xlu1 %235 }
 0x25a   :  { %239 = vst.msk [vmem:[#allocation3] sm:$0x3] %vm28_vm2, %v236_v39 }
 0x261   :  { %v335_v40 = vld [vmem:[#allocation3] sm:$0x3] }
 0x262   :  { %v337_v41 = vrot.slane %v335_v40, 6 }
 0x264   :  { %338 = vrot.lane.b32.xlu1 %v337_v41, %s1394_s5 }
 0x2ca   :  { %v242_v42 = vpop.permute.xlu0 %241 }
 0x2cb   :  { %244 = vst.msk [vmem:[#allocation2] sm:$0x3] %vm28_vm2, %v242_v42  ;;  %245 = vst.msk [vmem:[%s1642_s6] sm:$0x3] %vm28_vm2, %v242_v42 }
 0x2d2   :  { %v246_v43 = vld [vmem:[#allocation2] sm:$0x3] }
 0x2d3   :  { %1200 = vmatmul.mubr.msk.f32.vlgmr.msra.gmra.mrb[2].mxu0 %vm130_vm3, %v246_v43 }
 0x2d4   :  { %1292 = vmatpush3.bf16.msra.mxu0 %v1449_v8  ;;  %1221 = vmatprep.mubr.msk.f32.mxu0 %vm1391_vm1, %v1392_v4 }
 0x2d5   :  { %1293 = vmatprep.subr.bf16.mxu0 %v1390_v0 }
 0x2d6   :  { %v339_v55 = vpop.permute.xlu1 %338 }
 0x2d8   :  { %1295 = vmatpush3.bf16.msra.mxu0 %v1466_v13 }
 0x2d9   :  { %1302 = vmatprep.subr.bf16.mxu0 %v1390_v0 }
 0x3a6   :  { %v320_v44 = vpop.f32.mrb[2].mxu0 }
 0x3a7   :  { %v325_v45 = vrot.slane %v320_v44, 6  ;;  %v1201_v46 = vpop.f32.mrb[3].mxu0 }
 0x3a9   :  { %v327_v47 = vadd.f32 %v325_v45, %v1495_v20 }
 0x3ab   :  { %1334 = vtanh.f32 %v327_v47  ;;  %v1116_v49 = vmul.f32 -1.442695, %v327_v47 }
 0x3ad   :  { %1336 = vpow2.f32 %v1116_v49 }
 0x3b5   :  { %v1335_v48 = vpop.eup %1334 }
 0x3b6   :  { %343 = vrot.lane.b32.xlu0 %v1335_v48, %s1393_s15 }
 0x3b7   :  { %v1337_v50 = vpop.eup %1336 }
 0x3b8   :  { %v331_v51 = vadd.f32 1.0, %v1337_v50 }
 0x3ba   :  { %1338 = vrcp.f32 %v331_v51 }
 0x3c4   :  { %v1339_v52 = vpop.eup %1338 }
 0x3c5   :  { %v341_v56 = vmul.f32 %v1339_v52, %v339_v55 }
 0x428   :  { %v344_v53 = vpop.permute.xlu0 %343 }
 0x429   :  { %v346_v54 = vmul.f32 %v1339_v52, %v344_v53 }
 0x42b   :  { %348 = vrot.lane.b32.xlu0 %v346_v54, %s1394_s5 }
 0x49d   :  { %v349_v57 = vpop.permute.xlu0 %348 }
 0x49e   :  { %v351_v58 = vadd.f32 %v349_v57, %v341_v56 }
 0x4a0   :  { %1340 = vtanh.f32 %v351_v58 }
 0x4aa   :  { %v1341_v59 = vpop.eup %1340 }
 0x4ab   :  { %354 = vrot.lane.b32.xlu1 %v1341_v59, %s1393_s15 }
 0x4af   :  { %359 = vrot.lane.b32.xlu1 %v351_v58, %s1395_s3 }
 0x51d   :  { %v355_v60 = vpop.permute.xlu1 %354 }
 0x51e   :  { %v357_v61 = vmul.f32 %v1339_v52, %v355_v60 }
 0x520   :  { %365 = vrot.lane.b32.xlu0 %v357_v61, %s1394_s5 }
 0x521   :  { %v360_v62 = vpop.permute.xlu1 %359 }
 0x522   :  { %363 = vst.msk [vmem:[#allocation3 - $0x2] sm:$0xc] %vm362_vm4, %v360_v62 }
 0x529   :  { %v459_v63 = vld [vmem:[#allocation3] sm:$0x3] }
 0x52a   :  { %v461_v1 = vrot.slane %v459_v63, 4 }
 0x52c   :  { %462 = vrot.lane.b32.xlu1 %v461_v1, %s1394_s5 }
 0x592   :  { %v366_v2 = vpop.permute.xlu0 %365 }
 0x593   :  { %368 = vst.msk [vmem:[#allocation2 - $0x2] sm:$0xc] %vm362_vm4, %v366_v2  ;;  %369 = vst.msk [vmem:[%s1642_s6] sm:$0xc] %vm362_vm4, %v366_v2 }
 0x59a   :  { %v370_v3 = vld [vmem:[#allocation2] sm:$0x3] }
 0x59b   :  { %1211 = vmatmul.mubr.msk.f32.vlgmr.msra.gmra.mrb[2].mxu1 %vm130_vm3, %v370_v3 }
 0x59c   :  { %1298 = vmatpush3.bf16.msra.mxu1 %v1449_v8  ;;  %1232 = vmatprep.mubr.msk.f32.mxu1 %vm1391_vm1, %v1392_v4 }
 0x59d   :  { %1299 = vmatprep.subr.bf16.mxu1 %v1390_v0 }
 0x59e   :  { %v463_v19 = vpop.permute.xlu1 %462 }
 0x5a0   :  { %1301 = vmatpush3.bf16.msra.mxu1 %v1466_v13 }
 0x5a1   :  { %1308 = vmatprep.subr.bf16.mxu1 %v1390_v0 }
 0x66e   :  { %v444_v5 = vpop.f32.mrb[2].mxu1 }
 0x66f   :  { %v449_v6 = vrot.slane %v444_v5, 4  ;;  %v1212_v7 = vpop.f32.mrb[3].mxu1 }
 0x671   :  { %v451_v9 = vadd.f32 %v449_v6, %v1495_v20 }
 0x673   :  { %1342 = vtanh.f32 %v451_v9  ;;  %v1118_v11 = vmul.f32 -1.442695, %v451_v9 }
 0x675   :  { %1344 = vpow2.f32 %v1118_v11 }
 0x67d   :  { %v1343_v10 = vpop.eup %1342 }
 0x67e   :  { %467 = vrot.lane.b32.xlu0 %v1343_v10, %s1393_s15 }
 0x67f   :  { %v1345_v12 = vpop.eup %1344 }
 0x680   :  { %v455_v14 = vadd.f32 1.0, %v1345_v12 }
 0x682   :  { %1346 = vrcp.f32 %v455_v14 }
 0x68c   :  { %v1347_v15 = vpop.eup %1346 }
 0x68d   :  { %v465_v21 = vmul.f32 %v1347_v15, %v463_v19 }
 0x6f0   :  { %v468_v16 = vpop.permute.xlu0 %467 }
 0x6f1   :  { %v470_v17 = vmul.f32 %v1347_v15, %v468_v16 }
 0x6f3   :  { %472 = vrot.lane.b32.xlu0 %v470_v17, %s1394_s5 }
 0x765   :  { %v473_v22 = vpop.permute.xlu0 %472 }
 0x766   :  { %v475_v23 = vadd.f32 %v473_v22, %v465_v21 }
 0x768   :  { %1348 = vtanh.f32 %v475_v23 }
 0x772   :  { %v1349_v24 = vpop.eup %1348 }
 0x773   :  { %478 = vrot.lane.b32.xlu1 %v1349_v24, %s1393_s15 }
 0x777   :  { %483 = vrot.lane.b32.xlu1 %v475_v23, %s1395_s3 }
 0x7e5   :  { %v479_v25 = vpop.permute.xlu1 %478 }
 0x7e6   :  { %v481_v26 = vmul.f32 %v1347_v15, %v479_v25 }
 0x7e8   :  { %489 = vrot.lane.b32.xlu0 %v481_v26, %s1394_s5 }
 0x7e9   :  { %v484_v27 = vpop.permute.xlu1 %483 }
 0x7ea   :  { %487 = vst.msk [vmem:[#allocation3 - $0x4] sm:$0x30] %vm486_vm5, %v484_v27 }
 0x7f1   :  { %v583_v28 = vld [vmem:[#allocation3] sm:$0x3] }
 0x7f2   :  { %v585_v29 = vrot.slane %v583_v28, 2 }
 0x7f4   :  { %586 = vrot.lane.b32.xlu1 %v585_v29, %s1394_s5 }
 0x85a   :  { %v490_v30 = vpop.permute.xlu0 %489 }
 0x85b   :  { %492 = vst.msk [vmem:[#allocation2 - $0x4] sm:$0x30] %vm486_vm5, %v490_v30  ;;  %493 = vst.msk [vmem:[%s1642_s6] sm:$0x30] %vm486_vm5, %v490_v30 }
 0x862   :  { %v494_v31 = vld [vmem:[#allocation2] sm:$0x3] }
 0x863   :  { %1222 = vmatmul.mubr.msk.f32.vlgmr.msra.gmra.mrb[4].mxu0 %vm130_vm3, %v494_v31 }
 0x864   :  { %1304 = vmatpush3.bf16.msra.mxu0 %v1449_v8  ;;  %1243 = vmatprep.mubr.msk.f32.mxu0 %vm1391_vm1, %v1392_v4 }
 0x865   :  { %1305 = vmatprep.subr.bf16.mxu0 %v1390_v0 }
 0x866   :  { %v587_v43 = vpop.permute.xlu1 %586 }
 0x868   :  { %1307 = vmatpush3.bf16.msra.mxu0 %v1466_v13 }
 0x869   :  { %1314 = vmatprep.subr.bf16.mxu0 %v1390_v0 }
 0x936   :  { %v568_v32 = vpop.f32.mrb[4].mxu0 }
 0x937   :  { %v573_v33 = vrot.slane %v568_v32, 2  ;;  %v1223_v34 = vpop.f32.mrb[5].mxu0 }
 0x939   :  { %v575_v35 = vadd.f32 %v573_v33, %v1495_v20 }
 0x93b   :  { %1350 = vtanh.f32 %v575_v35  ;;  %v1120_v37 = vmul.f32 -1.442695, %v575_v35 }
 0x93d   :  { %1352 = vpow2.f32 %v1120_v37 }
 0x945   :  { %v1351_v36 = vpop.eup %1350 }
 0x946   :  { %591 = vrot.lane.b32.xlu0 %v1351_v36, %s1393_s15 }
 0x947   :  { %v1353_v38 = vpop.eup %1352 }
 0x948   :  { %v579_v39 = vadd.f32 1.0, %v1353_v38 }
 0x94a   :  { %1354 = vrcp.f32 %v579_v39 }
 0x954   :  { %v1355_v40 = vpop.eup %1354 }
 0x955   :  { %v589_v44 = vmul.f32 %v1355_v40, %v587_v43 }
 0x9b8   :  { %v592_v41 = vpop.permute.xlu0 %591 }
 0x9b9   :  { %v594_v42 = vmul.f32 %v1355_v40, %v592_v41 }
 0x9bb   :  { %596 = vrot.lane.b32.xlu0 %v594_v42, %s1394_s5 }
 0xa2d   :  { %v597_v45 = vpop.permute.xlu0 %596 }
 0xa2e   :  { %v599_v46 = vadd.f32 %v597_v45, %v589_v44 }
 0xa30   :  { %1356 = vtanh.f32 %v599_v46 }
 0xa3a   :  { %v1357_v20 = vpop.eup %1356 }
 0xa3b   :  { %602 = vrot.lane.b32.xlu1 %v1357_v20, %s1393_s15 }
 0xa3f   :  { %607 = vrot.lane.b32.xlu1 %v599_v46, %s1395_s3 }
 0xaad   :  { %v603_v47 = vpop.permute.xlu1 %602 }
 0xaae   :  { %v605_v48 = vmul.f32 %v1355_v40, %v603_v47 }
 0xab0   :  { %613 = vrot.lane.b32.xlu0 %v605_v48, %s1394_s5 }
 0xab1   :  { %v608_v49 = vpop.permute.xlu1 %607 }
 0xab2   :  { %611 = vst.msk [vmem:[#allocation3 - $0x6] sm:$0xc0] %vm610_vm6, %v608_v49 }
 0xab9   :  { %v704_v50 = vld [vmem:[#allocation3] sm:$0x3] }
 0xaba   :  { %706 = vrot.lane.b32.xlu1 %v704_v50, %s1394_s5 }
 0xb22   :  { %v614_v51 = vpop.permute.xlu0 %613 }
 0xb23   :  { %616 = vst.msk [vmem:[#allocation2 - $0x6] sm:$0xc0] %vm610_vm6, %v614_v51  ;;  %617 = vst.msk [vmem:[%s1642_s6] sm:$0xc0] %vm610_vm6, %v614_v51 }
 0xb2a   :  { %v618_v52 = vld [vmem:[#allocation2] sm:$0x3] }
 0xb2b   :  { %1233 = vmatmul.mubr.msk.f32.vlgmr.msra.gmra.mrb[4].mxu1 %vm130_vm3, %v618_v52 }
 0xb2c   :  { %1310 = vmatpush3.bf16.msra.mxu1 %v1449_v8  ;;  %1254 = vmatprep.mubr.msk.f32.mxu1 %vm1391_vm1, %v1392_v4  ;;  %v707_v63 = vpop.permute.xlu1 %706 }
 0xb2d   :  { %1311 = vmatprep.subr.bf16.mxu1 %v1390_v0 }
 0xb30   :  { %1313 = vmatpush3.bf16.msra.mxu1 %v1466_v13 }
 0xbfe   :  { %v692_v53 = vpop.f32.mrb[4].mxu1 }
 0xbff   :  { %v696_v54 = vadd.f32 %v692_v53, %v1493_v18  ;;  %v1234_v55 = vpop.f32.mrb[5].mxu1 }
 0xc01   :  { %1358 = vtanh.f32 %v696_v54  ;;  %v1122_v57 = vmul.f32 -1.442695, %v696_v54 }
 0xc03   :  { %1360 = vpow2.f32 %v1122_v57 }
 0xc0b   :  { %v1359_v56 = vpop.eup %1358 }
 0xc0c   :  { %711 = vrot.lane.b32.xlu0 %v1359_v56, %s1393_s15 }
 0xc0d   :  { %v1361_v58 = vpop.eup %1360 }
 0xc0e   :  { %v700_v59 = vadd.f32 1.0, %v1361_v58 }
 0xc10   :  { %1362 = vrcp.f32 %v700_v59 }
 0xc1a   :  { %v1363_v60 = vpop.eup %1362 }
 0xc1b   :  { %v709_v1 = vmul.f32 %v1363_v60, %v707_v63 }
 0xc7e   :  { %v712_v61 = vpop.permute.xlu0 %711 }
 0xc7f   :  { %v714_v62 = vmul.f32 %v1363_v60, %v712_v61 }
 0xc81   :  { %716 = vrot.lane.b32.xlu0 %v714_v62, %s1394_s5 }
 0xcf3   :  { %v717_v2 = vpop.permute.xlu0 %716 }
 0xcf4   :  { %v719_v3 = vadd.f32 %v717_v2, %v709_v1 }
 0xcf6   :  { %1364 = vtanh.f32 %v719_v3 }
 0xd00   :  { %v1365_v5 = vpop.eup %1364 }
 0xd01   :  { %722 = vrot.lane.b32.xlu1 %v1365_v5, %s1393_s15 }
 0xd05   :  { %727 = vrot.lane.b32.xlu1 %v719_v3, %s1395_s3 }
 0xd73   :  { %v723_v6 = vpop.permute.xlu1 %722 }
 0xd74   :  { %v725_v7 = vmul.f32 %v1363_v60, %v723_v6 }
 0xd76   :  { %732 = vrot.lane.b32.xlu0 %v725_v7, %s1394_s5 }
 0xd77   :  { %v728_v9 = vpop.permute.xlu1 %727 }
 0xd78   :  { %730 = vst.msk [vmem:[#allocation3] sm:$0x3] %vm28_vm2, %v728_v9 }
 0xd7f   :  { %v826_v10 = vld [vmem:[#allocation3] sm:$0x3] }
 0xd80   :  { %v828_v11 = vrot.slane %v826_v10, 6 }
 0xd82   :  { %829 = vrot.lane.b32.xlu1 %v828_v11, %s1394_s5 }
 0xde8   :  { %v733_v12 = vpop.permute.xlu0 %732 }
 0xde9   :  { %735 = vst.msk [vmem:[#allocation2] sm:$0x3] %vm28_vm2, %v733_v12  ;;  %736 = vst.msk [vmem:[%s1642_s6 + $0x8] sm:$0x3] %vm28_vm2, %v733_v12 }
 0xdf0   :  { %v737_v14 = vld [vmem:[#allocation2] sm:$0x3] }
 0xdf1   :  { %1244 = vmatmul.mubr.msk.f32.vlgmr.msra.gmra.mrb[6].mxu0 %vm130_vm3, %v737_v14 }
 0xdf2   :  { %1316 = vmatpush3.bf16.msra.mxu0 %v1449_v8  ;;  %1265 = vmatprep.mubr.msk.f32.mxu0 %vm1391_vm1, %v1392_v4 }
 0xdf3   :  { %1317 = vmatprep.subr.bf16.mxu0 %v1390_v0 }
 0xdf4   :  { %v830_v0 = vpop.permute.xlu1 %829 }
 0xdf6   :  { %1319 = vmatpush3.bf16.msra.mxu0 %v1466_v13 }
 0xec4   :  { %v811_v15 = vpop.f32.mrb[6].mxu0 }
 0xec5   :  { %v816_v16 = vrot.slane %v811_v15, 6  ;;  %v1245_v17 = vpop.f32.mrb[7].mxu0 }
 0xec7   :  { %v818_v19 = vadd.f32 %v816_v16, %v1493_v18 }
 0xec9   :  { %1366 = vtanh.f32 %v818_v19  ;;  %v1124_v22 = vmul.f32 -1.442695, %v818_v19 }
 0xecb   :  { %1368 = vpow2.f32 %v1124_v22 }
 0xed3   :  { %v1367_v21 = vpop.eup %1366 }
 0xed4   :  { %834 = vrot.lane.b32.xlu0 %v1367_v21, %s1393_s15 }
 0xed5   :  { %v1369_v23 = vpop.eup %1368 }
 0xed6   :  { %v822_v8 = vadd.f32 1.0, %v1369_v23 }
 0xed8   :  { %1370 = vrcp.f32 %v822_v8 }
 0xee2   :  { %v1371_v24 = vpop.eup %1370 }
 0xee3   :  { %v832_v13 = vmul.f32 %v1371_v24, %v830_v0 }
 0xf46   :  { %v835_v4 = vpop.permute.xlu0 %834 }
 0xf47   :  { %v837_v25 = vmul.f32 %v1371_v24, %v835_v4 }
 0xf49   :  { %839 = vrot.lane.b32.xlu0 %v837_v25, %s1394_s5 }
 0xfbb   :  { %v840_v26 = vpop.permute.xlu0 %839 }
 0xfbc   :  { %v842_v27 = vadd.f32 %v840_v26, %v832_v13 }
 0xfbe   :  { %1372 = vtanh.f32 %v842_v27 }
 0xfc8   :  { %v1373_v28 = vpop.eup %1372 }
 0xfc9   :  { %845 = vrot.lane.b32.xlu1 %v1373_v28, %s1393_s15 }
 0xfcd   :  { %850 = vrot.lane.b32.xlu1 %v842_v27, %s1395_s3 }
0x103b   :  { %v846_v29 = vpop.permute.xlu1 %845 }
0x103c   :  { %v848_v30 = vmul.f32 %v1371_v24, %v846_v29 }
0x103e   :  { %855 = vrot.lane.b32.xlu0 %v848_v30, %s1394_s5 }
0x103f   :  { %v851_v31 = vpop.permute.xlu1 %850 }
0x1040   :  { %853 = vst.msk [vmem:[#allocation3 - $0x2] sm:$0xc] %vm362_vm4, %v851_v31 }
0x1047   :  { %v949_v32 = vld [vmem:[#allocation3] sm:$0x3] }
0x1048   :  { %v951_v33 = vrot.slane %v949_v32, 4 }
0x104a   :  { %952 = vrot.lane.b32.xlu1 %v951_v33, %s1394_s5 }
0x10b0   :  { %v856_v34 = vpop.permute.xlu0 %855 }
0x10b1   :  { %858 = vst.msk [vmem:[#allocation2 - $0x2] sm:$0xc] %vm362_vm4, %v856_v34  ;;  %859 = vst.msk [vmem:[%s1642_s6 + $0x8] sm:$0xc] %vm362_vm4, %v856_v34 }
0x10b8   :  { %v860_v35 = vld [vmem:[#allocation2] sm:$0x3] }
0x10b9   :  { %1255 = vmatmul.mubr.msk.f32.vlgmr.msra.gmra.mrb[6].mxu1 %vm130_vm3, %v860_v35 }
0x10bc   :  { %v953_v20 = vpop.permute.xlu1 %952 }
0x118c   :  { %v934_v36 = vpop.f32.mrb[6].mxu1 }
0x118d   :  { %v939_v37 = vrot.slane %v934_v36, 4  ;;  %v1256_v38 = vpop.f32.mrb[7].mxu1 }
0x118f   :  { %v941_v39 = vadd.f32 %v939_v37, %v1493_v18 }
0x1191   :  { %1374 = vtanh.f32 %v941_v39  ;;  %v1126_v41 = vmul.f32 -1.442695, %v941_v39 }
0x1193   :  { %1376 = vpow2.f32 %v1126_v41 }
0x119b   :  { %v1375_v40 = vpop.eup %1374 }
0x119c   :  { %957 = vrot.lane.b32.xlu0 %v1375_v40, %s1393_s15 }
0x119d   :  { %v1377_v42 = vpop.eup %1376 }
0x119e   :  { %v945_v43 = vadd.f32 1.0, %v1377_v42 }
0x11a0   :  { %1378 = vrcp.f32 %v945_v43 }
0x11aa   :  { %v1379_v44 = vpop.eup %1378 }
0x11ab   :  { %v955_v47 = vmul.f32 %v1379_v44, %v953_v20 }
0x120e   :  { %v958_v45 = vpop.permute.xlu0 %957 }
0x120f   :  { %v960_v46 = vmul.f32 %v1379_v44, %v958_v45 }
0x1211   :  { %962 = vrot.lane.b32.xlu0 %v960_v46, %s1394_s5 }
0x1283   :  { %v963_v48 = vpop.permute.xlu0 %962 }
0x1284   :  { %v965_v49 = vadd.f32 %v963_v48, %v955_v47 }
0x1286   :  { %1380 = vtanh.f32 %v965_v49 }
0x1290   :  { %v1381_v50 = vpop.eup %1380 }
0x1291   :  { %968 = vrot.lane.b32.xlu1 %v1381_v50, %s1393_s15 }
0x1295   :  { %973 = vrot.lane.b32.xlu1 %v965_v49, %s1395_s3 }
0x1303   :  { %v969_v51 = vpop.permute.xlu1 %968 }
0x1304   :  { %v971_v52 = vmul.f32 %v1379_v44, %v969_v51 }
0x1306   :  { %978 = vrot.lane.b32.xlu0 %v971_v52, %s1394_s5 }
0x1307   :  { %v974_v53 = vpop.permute.xlu1 %973 }
0x1308   :  { %976 = vst.msk [vmem:[#allocation3 - $0x4] sm:$0x30] %vm486_vm5, %v974_v53 }
0x130f   :  { %v1072_v54 = vld [vmem:[#allocation3] sm:$0x3] }
0x1310   :  { %v1074_v55 = vrot.slane %v1072_v54, 2 }
0x1312   :  { %1075 = vrot.lane.b32.xlu1 %v1074_v55, %s1394_s5 }
0x1378   :  { %v979_v56 = vpop.permute.xlu0 %978 }
0x1379   :  { %981 = vst.msk [vmem:[#allocation2 - $0x4] sm:$0x30] %vm486_vm5, %v979_v56  ;;  %982 = vst.msk [vmem:[%s1642_s6 + $0x8] sm:$0x30] %vm486_vm5, %v979_v56 }
0x1380   :  { %v983_v57 = vld [vmem:[#allocation2] sm:$0x3] }
0x1381   :  { %1266 = vmatmul.mubr.msk.f32.vlgmr.msra.gmra.mrb[8].mxu0 %vm130_vm3, %v983_v57 }
0x1384   :  { %v1076_v7 = vpop.permute.xlu1 %1075 }
0x1454   :  { %v1057_v58 = vpop.f32.mrb[8].mxu0 }
0x1455   :  { %v1062_v59 = vrot.slane %v1057_v58, 2  ;;  %v1267_v60 = vpop.f32.mrb[9].mxu0 }
0x1457   :  { %v1064_v61 = vadd.f32 %v1062_v59, %v1493_v18 }
0x1459   :  { %1382 = vtanh.f32 %v1064_v61  ;;  %v1128_v63 = vmul.f32 -1.442695, %v1064_v61 }
0x145b   :  { %1384 = vpow2.f32 %v1128_v63 }
0x1463   :  { %v1383_v62 = vpop.eup %1382 }
0x1464   :  { %1080 = vrot.lane.b32.xlu0 %v1383_v62, %s1393_s15 }
0x1465   :  { %v1385_v1 = vpop.eup %1384 }
0x1466   :  { %v1068_v2 = vadd.f32 1.0, %v1385_v1 }
0x1468   :  { %1386 = vrcp.f32 %v1068_v2 }
0x1472   :  { %v1387_v3 = vpop.eup %1386 }
0x1473   :  { %v1078_v9 = vmul.f32 %v1387_v3, %v1076_v7 }
0x14d6   :  { %v1081_v5 = vpop.permute.xlu0 %1080 }
0x14d7   :  { %v1083_v6 = vmul.f32 %v1387_v3, %v1081_v5 }
0x14d9   :  { %1085 = vrot.lane.b32.xlu0 %v1083_v6, %s1394_s5 }
0x154b   :  { %v1086_v10 = vpop.permute.xlu0 %1085 }
0x154c   :  { %v1088_v11 = vadd.f32 %v1086_v10, %v1078_v9 }
0x154e   :  { %1388 = vtanh.f32 %v1088_v11  ;;  %1096 = vrot.lane.b32.xlu0 %v1088_v11, %s1395_s3 }
0x1558   :  { %v1389_v18 = vpop.eup %1388 }
0x1559   :  { %1091 = vrot.lane.b32.xlu1 %v1389_v18, %s1393_s15 }
0x15c0   :  { %v1097_v12 = vpop.permute.xlu0 %1096 }
0x15c1   :  { %1099 = vst.msk [vmem:[#allocation3 - $0x6] sm:$0xc0] %vm610_vm6, %v1097_v12 }
0x15cb   :  { %v1092_v14 = vpop.permute.xlu1 %1091 }
0x15cc   :  { %v1094_v15 = vmul.f32 %v1387_v3, %v1092_v14 }
0x15ce   :  { %1101 = vrot.lane.b32.xlu1 %v1094_v15, %s1394_s5 }
0x1640   :  { %v1102_v16 = vpop.permute.xlu1 %1101 }
0x1641   :  { %1104 = vst.msk [vmem:[#allocation2 - $0x6] sm:$0xc0] %vm610_vm6, %v1102_v16  ;;  %1105 = vst.msk [vmem:[%s1642_s6 + $0x8] sm:$0xc0] %vm610_vm6, %v1102_v16 }

// kernel: model_forward.6
= control target key start
LH: loop header
LB: loop body
LE: loop exit
PB: predicated region body
PF: predicated region fallthrough
CT: control target
= control target key end

     0   :  { %v1401_v2 = vmov 0.0|0.0   ;;  %vm45_vm0 = vcmask 261120   ;;  %vm1402_vm1 = vmmov 0   ;;  %v1403_v4 = vmov 0.0   ;;  %s1404_s19 = smov 64   ;;  %s1653_s1 = inlined_call_operand.vmem [shape: f32[32,128], index: 1, kind: input, shape index: {}]   ;;  %s1654_s2 = inlined_call_operand.vmem [shape: f32[32,128], index: 2, kind: input, shape index: {}]   ;;  %s1655_s0 = inlined_call_operand.vmem [shape: f32[16,32], index: 0, kind: input, shape index: {}]   ;;  %s1656_s4 = inlined_call_operand.vmem [shape: f32[2,32], index: 4, kind: input, shape index: {}]   ;;  %s1657_s5 = inlined_call_operand.vmem [shape: f32[2,32], index: 5, kind: input, shape index: {}]   ;;  %s1658_s3 = inlined_call_operand.vmem [shape: f32[1,128], index: 3, kind: input, shape index: {}]   ;;  %s1659_s6 = inlined_call_operand.vmem [shape: f32[16,32], index: 6, kind: output, shape index: {}]  }
   0x1   :  { %v34_v0 = vld [vmem:[%s1653_s1] sm:$0xff]  ;;  %v35_v1 = vld [vmem:[%s1653_s1 + $0x8] sm:$0xff]  ;;  %1283 = vmatprep.subr.bf16.mxu1 %v1401_v2  ;;  %1195 = vmatprep.mubr.msk.f32.mxu1 %vm1402_vm1, %v1403_v4  ;;  %v36_v7 = vld [vmem:[%s1653_s1 + $0x10] sm:$0xff]  ;;  %vm28_vm2 = vcmask 254976   ;;  %vm363_vm3 = vcmask 257026   ;;  %vm487_vm4 = vcmask 259076  }
   0x2   :  { %v128_v3 = vld [vmem:[%s1654_s2] sm:$0xff]  ;;  %v1275_v5 = vpack.c.bf16 %v35_v1, %v34_v0  ;;  %v129_v6 = vld [vmem:[%s1654_s2 + $0x8] sm:$0xff]  ;;  %v37_v8 = vld [vmem:[%s1653_s1 + $0x18] sm:$0xff]  ;;  %vm611_vm5 = vcmask 261126  }
   0x3   :  { %v1463_v9 = vpack.c.bf16 %v129_v6, %v128_v3  ;;  %v1279_v10 = vpack.c.bf16 %v37_v8, %v36_v7  ;;  %v32_v11 = vld [vmem:[%s1655_s0] sm:$0xff]  ;;  %v130_v12 = vld [vmem:[%s1654_s2 + $0x10] sm:$0xff]  ;;  %v131_v13 = vld [vmem:[%s1654_s2 + $0x18] sm:$0xff] }
   0x4   :  { %1276 = vmatprep.subr.bf16.mxu0 %v1275_v5  ;;  %1184 = vmatprep.mubr.msk.f32.mxu0 %vm45_vm0, %v32_v11  ;;  %v27_v14 = vld [vmem:[%s1656_s4] sm:$0x3]  ;;  %v1479_v15 = vpack.c.bf16 %v131_v13, %v130_v12  ;;  %v33_v16 = vld [vmem:[%s1655_s0 + $0x8] sm:$0xff] }
   0x5   :  { %1278 = vmatpush3.bf16.msra.mxu0 %v1275_v5  ;;  %1285 = vmatpush3.bf16.msra.mxu1 %v1463_v9  ;;  %29 = vst.msk [vmem:[#allocation2] sm:$0x3] %vm28_vm2, %v27_v14  ;;  %v30_v18 = vld [vmem:[%s1657_s5] sm:$0x3]  ;;  %s1405_s5 = smov 32  }
   0x6   :  { %1280 = vmatprep.subr.bf16.mxu0 %v1279_v10  ;;  %1286 = vmatprep.subr.bf16.mxu1 %v1401_v2  ;;  %31 = vst.msk [vmem:[#allocation3] sm:$0x3] %vm28_vm2, %v30_v18  ;;  %v1111_v19 = vld [vmem:[%s1658_s3] ss:$0 sm:$0xff]  ;;  %s1406_s3 = smov 96  }
   0x9   :  { %1282 = vmatpush3.bf16.msra.mxu0 %v1279_v10  ;;  %1288 = vmatpush3.bf16.msra.mxu1 %v1479_v15 }
   0xa   :  { %1289 = vmatprep.subr.bf16.mxu0 %v1401_v2  ;;  %1295 = vmatprep.subr.bf16.mxu1 %v1401_v2 }
   0xc   :  { %1185 = vmatmul.mubr.msk.f32.vlgmr.msra.gmra.mrb[0].mxu0 %vm45_vm0, %v33_v16  ;;  %v127_v17 = vld [vmem:[#allocation2] sm:$0x3] }
   0xd   :  { %1196 = vmatmul.mubr.msk.f32.vlgmr.msra.gmra.mrb[0].mxu1 %vm45_vm0, %v127_v17  ;;  %1291 = vmatpush3.bf16.msra.mxu0 %v1463_v9  ;;  %v213_v28 = vld [vmem:[#allocation3] sm:$0x3] }
   0xe   :  { %1292 = vmatprep.subr.bf16.mxu0 %v1401_v2  ;;  %1206 = vmatprep.mubr.msk.f32.mxu0 %vm1402_vm1, %v1403_v4 }
   0xf   :  { %1297 = vmatpush3.bf16.msra.mxu1 %v1463_v9  ;;  %1217 = vmatprep.mubr.msk.f32.mxu1 %vm1402_vm1, %v1403_v4 }
  0x10   :  { %1298 = vmatprep.subr.bf16.mxu1 %v1401_v2 }
  0x11   :  { %1294 = vmatpush3.bf16.msra.mxu0 %v1479_v15 }
  0x12   :  { %1301 = vmatprep.subr.bf16.mxu0 %v1401_v2 }
  0x13   :  { %1300 = vmatpush3.bf16.msra.mxu1 %v1479_v15 }
  0x14   :  { %1307 = vmatprep.subr.bf16.mxu1 %v1401_v2 }
  0xdf   :  { %v1186_v20 = vpop.f32.mrb[0].mxu0 }
  0xe0   :  { %v1510_v21 = vadd.f32 %v1186_v20, %v1111_v19  ;;  %v118_v22 = vpop.f32.mrb[1].mxu0  ;;  %v201_v23 = vpop.f32.mrb[0].mxu1 }
  0xe1   :  { %v1512_v24 = vadd.f32 %v1111_v19, %v118_v22  ;;  %v1197_v25 = vpop.f32.mrb[1].mxu1 }
  0xe3   :  { %v205_v26 = vadd.f32 %v201_v23, %v1512_v24 }
  0xe5   :  { %1337 = vtanh.f32 %v205_v26  ;;  %v1115_v29 = vmul.f32 -1.442695, %v205_v26 }
  0xe7   :  { %1339 = vpow2.f32 %v1115_v29 }
  0xef   :  { %v1338_v27 = vpop.eup %1337 }
  0xf0   :  { %220 = vrot.lane.b32.xlu0 %v1338_v27, %s1404_s19 }
  0xf1   :  { %v1340_v30 = vpop.eup %1339 }
  0xf2   :  { %v209_v31 = vadd.f32 1.0, %v1340_v30 }
  0xf4   :  { %215 = vrot.lane.b32.xlu0 %v213_v28, %s1405_s5  ;;  %1341 = vrcp.f32 %v209_v31 }
  0xfe   :  { %v1342_v32 = vpop.eup %1341 }
 0x162   :  { %v221_v33 = vpop.permute.xlu0 %220 }
 0x163   :  { %v223_v34 = vmul.f32 %v1342_v32, %v221_v33 }
 0x165   :  { %225 = vrot.lane.b32.xlu1 %v223_v34, %s1405_s5 }
 0x166   :  { %v216_v35 = vpop.permute.xlu0 %215 }
 0x167   :  { %v218_v36 = vmul.f32 %v1342_v32, %v216_v35 }
 0x1d7   :  { %v226_v37 = vpop.permute.xlu1 %225 }
 0x1d8   :  { %v228_v38 = vadd.f32 %v226_v37, %v218_v36 }
 0x1da   :  { %1343 = vtanh.f32 %v228_v38 }
 0x1e4   :  { %v1344_v39 = vpop.eup %1343 }
 0x1e5   :  { %231 = vrot.lane.b32.xlu1 %v1344_v39, %s1404_s19 }
 0x1e9   :  { %236 = vrot.lane.b32.xlu1 %v228_v38, %s1406_s3 }
 0x257   :  { %v232_v40 = vpop.permute.xlu1 %231 }
 0x258   :  { %v234_v41 = vmul.f32 %v1342_v32, %v232_v40 }
 0x25a   :  { %242 = vrot.lane.b32.xlu0 %v234_v41, %s1405_s5 }
 0x25b   :  { %v237_v42 = vpop.permute.xlu1 %236 }
 0x25c   :  { %240 = vst.msk [vmem:[#allocation3] sm:$0x3] %vm28_vm2, %v237_v42 }
 0x263   :  { %v336_v43 = vld [vmem:[#allocation3] sm:$0x3] }
 0x264   :  { %v338_v44 = vrot.slane %v336_v43, 6 }
 0x266   :  { %339 = vrot.lane.b32.xlu1 %v338_v44, %s1405_s5 }
 0x2cc   :  { %v243_v45 = vpop.permute.xlu0 %242 }
 0x2cd   :  { %245 = vst.msk [vmem:[#allocation2] sm:$0x3] %vm28_vm2, %v243_v45  ;;  %246 = vst.msk [vmem:[%s1659_s6] sm:$0x3] %vm28_vm2, %v243_v45 }
 0x2d4   :  { %v247_v46 = vld [vmem:[#allocation2] sm:$0x3] }
 0x2d5   :  { %1207 = vmatmul.mubr.msk.f32.vlgmr.msra.gmra.mrb[2].mxu0 %vm45_vm0, %v247_v46 }
 0x2d6   :  { %1303 = vmatpush3.bf16.msra.mxu0 %v1463_v9  ;;  %1228 = vmatprep.mubr.msk.f32.mxu0 %vm1402_vm1, %v1403_v4 }
 0x2d7   :  { %1304 = vmatprep.subr.bf16.mxu0 %v1401_v2 }
 0x2d8   :  { %v340_v58 = vpop.permute.xlu1 %339 }
 0x2da   :  { %1306 = vmatpush3.bf16.msra.mxu0 %v1479_v15 }
 0x2db   :  { %1313 = vmatprep.subr.bf16.mxu0 %v1401_v2 }
 0x3a8   :  { %v321_v47 = vpop.f32.mrb[2].mxu0 }
 0x3a9   :  { %v326_v48 = vrot.slane %v321_v47, 6  ;;  %v1208_v49 = vpop.f32.mrb[3].mxu0 }
 0x3ab   :  { %v328_v50 = vadd.f32 %v326_v48, %v1512_v24 }
 0x3ad   :  { %1345 = vtanh.f32 %v328_v50  ;;  %v1117_v52 = vmul.f32 -1.442695, %v328_v50 }
 0x3af   :  { %1347 = vpow2.f32 %v1117_v52 }
 0x3b7   :  { %v1346_v51 = vpop.eup %1345 }
 0x3b8   :  { %344 = vrot.lane.b32.xlu0 %v1346_v51, %s1404_s19 }
 0x3b9   :  { %v1348_v53 = vpop.eup %1347 }
 0x3ba   :  { %v332_v54 = vadd.f32 1.0, %v1348_v53 }
 0x3bc   :  { %1349 = vrcp.f32 %v332_v54 }
 0x3c6   :  { %v1350_v55 = vpop.eup %1349 }
 0x3c7   :  { %v342_v59 = vmul.f32 %v1350_v55, %v340_v58 }
 0x42a   :  { %v345_v56 = vpop.permute.xlu0 %344 }
 0x42b   :  { %v347_v57 = vmul.f32 %v1350_v55, %v345_v56 }
 0x42d   :  { %349 = vrot.lane.b32.xlu0 %v347_v57, %s1405_s5 }
 0x49f   :  { %v350_v60 = vpop.permute.xlu0 %349 }
 0x4a0   :  { %v352_v61 = vadd.f32 %v350_v60, %v342_v59 }
 0x4a2   :  { %1351 = vtanh.f32 %v352_v61 }
 0x4ac   :  { %v1352_v62 = vpop.eup %1351 }
 0x4ad   :  { %355 = vrot.lane.b32.xlu1 %v1352_v62, %s1404_s19 }
 0x4b1   :  { %360 = vrot.lane.b32.xlu1 %v352_v61, %s1406_s3 }
 0x51f   :  { %v356_v63 = vpop.permute.xlu1 %355 }
 0x520   :  { %v358_v0 = vmul.f32 %v1350_v55, %v356_v63 }
 0x522   :  { %366 = vrot.lane.b32.xlu0 %v358_v0, %s1405_s5 }
 0x523   :  { %v361_v1 = vpop.permute.xlu1 %360 }
 0x524   :  { %364 = vst.msk [vmem:[#allocation3 - $0x2] sm:$0xc] %vm363_vm3, %v361_v1 }
 0x52b   :  { %v460_v3 = vld [vmem:[#allocation3] sm:$0x3] }
 0x52c   :  { %v462_v5 = vrot.slane %v460_v3, 4 }
 0x52e   :  { %463 = vrot.lane.b32.xlu1 %v462_v5, %s1405_s5 }
 0x594   :  { %v367_v6 = vpop.permute.xlu0 %366 }
 0x595   :  { %369 = vst.msk [vmem:[#allocation2 - $0x2] sm:$0xc] %vm363_vm3, %v367_v6  ;;  %370 = vst.msk [vmem:[%s1659_s6] sm:$0xc] %vm363_vm3, %v367_v6 }
 0x59c   :  { %v371_v7 = vld [vmem:[#allocation2] sm:$0x3] }
 0x59d   :  { %1218 = vmatmul.mubr.msk.f32.vlgmr.msra.gmra.mrb[2].mxu1 %vm45_vm0, %v371_v7 }
 0x59e   :  { %1309 = vmatpush3.bf16.msra.mxu1 %v1463_v9  ;;  %1239 = vmatprep.mubr.msk.f32.mxu1 %vm1402_vm1, %v1403_v4 }
 0x59f   :  { %1310 = vmatprep.subr.bf16.mxu1 %v1401_v2 }
 0x5a0   :  { %v464_v22 = vpop.permute.xlu1 %463 }
 0x5a2   :  { %1312 = vmatpush3.bf16.msra.mxu1 %v1479_v15 }
 0x5a3   :  { %1319 = vmatprep.subr.bf16.mxu1 %v1401_v2 }
 0x670   :  { %v445_v8 = vpop.f32.mrb[2].mxu1 }
 0x671   :  { %v450_v10 = vrot.slane %v445_v8, 4  ;;  %v1219_v11 = vpop.f32.mrb[3].mxu1 }
 0x673   :  { %v452_v12 = vadd.f32 %v450_v10, %v1512_v24 }
 0x675   :  { %1353 = vtanh.f32 %v452_v12  ;;  %v1119_v14 = vmul.f32 -1.442695, %v452_v12 }
 0x677   :  { %1355 = vpow2.f32 %v1119_v14 }
 0x67f   :  { %v1354_v13 = vpop.eup %1353 }
 0x680   :  { %468 = vrot.lane.b32.xlu0 %v1354_v13, %s1404_s19 }
 0x681   :  { %v1356_v16 = vpop.eup %1355 }
 0x682   :  { %v456_v17 = vadd.f32 1.0, %v1356_v16 }
 0x684   :  { %1357 = vrcp.f32 %v456_v17 }
 0x68e   :  { %v1358_v18 = vpop.eup %1357 }
 0x68f   :  { %v466_v23 = vmul.f32 %v1358_v18, %v464_v22 }
 0x6f2   :  { %v469_v19 = vpop.permute.xlu0 %468 }
 0x6f3   :  { %v471_v20 = vmul.f32 %v1358_v18, %v469_v19 }
 0x6f5   :  { %473 = vrot.lane.b32.xlu0 %v471_v20, %s1405_s5 }
 0x767   :  { %v474_v25 = vpop.permute.xlu0 %473 }
 0x768   :  { %v476_v26 = vadd.f32 %v474_v25, %v466_v23 }
 0x76a   :  { %1359 = vtanh.f32 %v476_v26 }
 0x774   :  { %v1360_v27 = vpop.eup %1359 }
 0x775   :  { %479 = vrot.lane.b32.xlu1 %v1360_v27, %s1404_s19 }
 0x779   :  { %484 = vrot.lane.b32.xlu1 %v476_v26, %s1406_s3 }
 0x7e7   :  { %v480_v28 = vpop.permute.xlu1 %479 }
 0x7e8   :  { %v482_v29 = vmul.f32 %v1358_v18, %v480_v28 }
 0x7ea   :  { %490 = vrot.lane.b32.xlu0 %v482_v29, %s1405_s5 }
 0x7eb   :  { %v485_v30 = vpop.permute.xlu1 %484 }
 0x7ec   :  { %488 = vst.msk [vmem:[#allocation3 - $0x4] sm:$0x30] %vm487_vm4, %v485_v30 }
 0x7f3   :  { %v584_v31 = vld [vmem:[#allocation3] sm:$0x3] }
 0x7f4   :  { %v586_v32 = vrot.slane %v584_v31, 2 }
 0x7f6   :  { %587 = vrot.lane.b32.xlu1 %v586_v32, %s1405_s5 }
 0x85c   :  { %v491_v33 = vpop.permute.xlu0 %490 }
 0x85d   :  { %493 = vst.msk [vmem:[#allocation2 - $0x4] sm:$0x30] %vm487_vm4, %v491_v33  ;;  %494 = vst.msk [vmem:[%s1659_s6] sm:$0x30] %vm487_vm4, %v491_v33 }
 0x864   :  { %v495_v34 = vld [vmem:[#allocation2] sm:$0x3] }
 0x865   :  { %1229 = vmatmul.mubr.msk.f32.vlgmr.msra.gmra.mrb[4].mxu0 %vm45_vm0, %v495_v34 }
 0x866   :  { %1315 = vmatpush3.bf16.msra.mxu0 %v1463_v9  ;;  %1250 = vmatprep.mubr.msk.f32.mxu0 %vm1402_vm1, %v1403_v4 }
 0x867   :  { %1316 = vmatprep.subr.bf16.mxu0 %v1401_v2 }
 0x868   :  { %v588_v46 = vpop.permute.xlu1 %587 }
 0x86a   :  { %1318 = vmatpush3.bf16.msra.mxu0 %v1479_v15 }
 0x86b   :  { %1325 = vmatprep.subr.bf16.mxu0 %v1401_v2 }
 0x938   :  { %v569_v35 = vpop.f32.mrb[4].mxu0 }
 0x939   :  { %v574_v36 = vrot.slane %v569_v35, 2  ;;  %v1230_v37 = vpop.f32.mrb[5].mxu0 }
 0x93b   :  { %v576_v38 = vadd.f32 %v574_v36, %v1512_v24 }
 0x93d   :  { %1361 = vtanh.f32 %v576_v38  ;;  %v1121_v40 = vmul.f32 -1.442695, %v576_v38 }
 0x93f   :  { %1363 = vpow2.f32 %v1121_v40 }
 0x947   :  { %v1362_v39 = vpop.eup %1361 }
 0x948   :  { %592 = vrot.lane.b32.xlu0 %v1362_v39, %s1404_s19 }
 0x949   :  { %v1364_v41 = vpop.eup %1363 }
 0x94a   :  { %v580_v42 = vadd.f32 1.0, %v1364_v41 }
 0x94c   :  { %1365 = vrcp.f32 %v580_v42 }
 0x956   :  { %v1366_v43 = vpop.eup %1365 }
 0x957   :  { %v590_v47 = vmul.f32 %v1366_v43, %v588_v46 }
 0x9ba   :  { %v593_v44 = vpop.permute.xlu0 %592 }
 0x9bb   :  { %v595_v45 = vmul.f32 %v1366_v43, %v593_v44 }
 0x9bd   :  { %597 = vrot.lane.b32.xlu0 %v595_v45, %s1405_s5 }
 0xa2f   :  { %v598_v48 = vpop.permute.xlu0 %597 }
 0xa30   :  { %v600_v49 = vadd.f32 %v598_v48, %v590_v47 }
 0xa32   :  { %1367 = vtanh.f32 %v600_v49 }
 0xa3c   :  { %v1368_v24 = vpop.eup %1367 }
 0xa3d   :  { %603 = vrot.lane.b32.xlu1 %v1368_v24, %s1404_s19 }
 0xa41   :  { %608 = vrot.lane.b32.xlu1 %v600_v49, %s1406_s3 }
 0xaaf   :  { %v604_v50 = vpop.permute.xlu1 %603 }
 0xab0   :  { %v606_v51 = vmul.f32 %v1366_v43, %v604_v50 }
 0xab2   :  { %614 = vrot.lane.b32.xlu0 %v606_v51, %s1405_s5 }
 0xab3   :  { %v609_v52 = vpop.permute.xlu1 %608 }
 0xab4   :  { %612 = vst.msk [vmem:[#allocation3 - $0x6] sm:$0xc0] %vm611_vm5, %v609_v52 }
 0xabb   :  { %v705_v53 = vld [vmem:[#allocation3] sm:$0x3] }
 0xabc   :  { %707 = vrot.lane.b32.xlu1 %v705_v53, %s1405_s5 }
 0xb24   :  { %v615_v54 = vpop.permute.xlu0 %614 }
 0xb25   :  { %617 = vst.msk [vmem:[#allocation2 - $0x6] sm:$0xc0] %vm611_vm5, %v615_v54  ;;  %618 = vst.msk [vmem:[%s1659_s6] sm:$0xc0] %vm611_vm5, %v615_v54 }
 0xb2c   :  { %v619_v55 = vld [vmem:[#allocation2] sm:$0x3] }
 0xb2d   :  { %1240 = vmatmul.mubr.msk.f32.vlgmr.msra.gmra.mrb[4].mxu1 %vm45_vm0, %v619_v55 }
 0xb2e   :  { %1321 = vmatpush3.bf16.msra.mxu1 %v1463_v9  ;;  %1261 = vmatprep.mubr.msk.f32.mxu1 %vm1402_vm1, %v1403_v4  ;;  %v708_v3 = vpop.permute.xlu1 %707 }
 0xb2f   :  { %1322 = vmatprep.subr.bf16.mxu1 %v1401_v2 }
 0xb32   :  { %1324 = vmatpush3.bf16.msra.mxu1 %v1479_v15 }
 0xc00   :  { %v693_v56 = vpop.f32.mrb[4].mxu1 }
 0xc01   :  { %v697_v57 = vadd.f32 %v693_v56, %v1510_v21  ;;  %v1241_v58 = vpop.f32.mrb[5].mxu1 }
 0xc03   :  { %1369 = vtanh.f32 %v697_v57  ;;  %v1123_v60 = vmul.f32 -1.442695, %v697_v57 }
 0xc05   :  { %1371 = vpow2.f32 %v1123_v60 }
 0xc0d   :  { %v1370_v59 = vpop.eup %1369 }
 0xc0e   :  { %712 = vrot.lane.b32.xlu0 %v1370_v59, %s1404_s19 }
 0xc0f   :  { %v1372_v61 = vpop.eup %1371 }
 0xc10   :  { %v701_v62 = vadd.f32 1.0, %v1372_v61 }
 0xc12   :  { %1373 = vrcp.f32 %v701_v62 }
 0xc1c   :  { %v1374_v63 = vpop.eup %1373 }
 0xc1d   :  { %v710_v5 = vmul.f32 %v1374_v63, %v708_v3 }
 0xc80   :  { %v713_v0 = vpop.permute.xlu0 %712 }
 0xc81   :  { %v715_v1 = vmul.f32 %v1374_v63, %v713_v0 }
 0xc83   :  { %717 = vrot.lane.b32.xlu0 %v715_v1, %s1405_s5 }
 0xcf5   :  { %v718_v6 = vpop.permute.xlu0 %717 }
 0xcf6   :  { %v720_v7 = vadd.f32 %v718_v6, %v710_v5 }
 0xcf8   :  { %1375 = vtanh.f32 %v720_v7 }
 0xd02   :  { %v1376_v8 = vpop.eup %1375 }
 0xd03   :  { %723 = vrot.lane.b32.xlu1 %v1376_v8, %s1404_s19 }
 0xd07   :  { %728 = vrot.lane.b32.xlu1 %v720_v7, %s1406_s3 }
 0xd75   :  { %v724_v10 = vpop.permute.xlu1 %723 }
 0xd76   :  { %v726_v11 = vmul.f32 %v1374_v63, %v724_v10 }
 0xd78   :  { %733 = vrot.lane.b32.xlu0 %v726_v11, %s1405_s5 }
 0xd79   :  { %v729_v12 = vpop.permute.xlu1 %728 }
 0xd7a   :  { %731 = vst.msk [vmem:[#allocation3] sm:$0x3] %vm28_vm2, %v729_v12 }
 0xd81   :  { %v827_v13 = vld [vmem:[#allocation3] sm:$0x3] }
 0xd82   :  { %v829_v14 = vrot.slane %v827_v13, 6 }
 0xd84   :  { %830 = vrot.lane.b32.xlu1 %v829_v14, %s1405_s5 }
 0xdea   :  { %v734_v16 = vpop.permute.xlu0 %733 }
 0xdeb   :  { %736 = vst.msk [vmem:[#allocation2] sm:$0x3] %vm28_vm2, %v734_v16  ;;  %737 = vst.msk [vmem:[%s1659_s6 + $0x8] sm:$0x3] %vm28_vm2, %v734_v16 }
 0xdf2   :  { %v738_v17 = vld [vmem:[#allocation2] sm:$0x3] }
 0xdf3   :  { %1251 = vmatmul.mubr.msk.f32.vlgmr.msra.gmra.mrb[6].mxu0 %vm45_vm0, %v738_v17 }
 0xdf4   :  { %1327 = vmatpush3.bf16.msra.mxu0 %v1463_v9  ;;  %1272 = vmatprep.mubr.msk.f32.mxu0 %vm1402_vm1, %v1403_v4 }
 0xdf5   :  { %1328 = vmatprep.subr.bf16.mxu0 %v1401_v2 }
 0xdf6   :  { %v831_v2 = vpop.permute.xlu1 %830 }
 0xdf8   :  { %1330 = vmatpush3.bf16.msra.mxu0 %v1479_v15 }
 0xec6   :  { %v812_v18 = vpop.f32.mrb[6].mxu0 }
 0xec7   :  { %v817_v19 = vrot.slane %v812_v18, 6  ;;  %v1252_v20 = vpop.f32.mrb[7].mxu0 }
 0xec9   :  { %v819_v22 = vadd.f32 %v817_v19, %v1510_v21 }
 0xecb   :  { %1377 = vtanh.f32 %v819_v22  ;;  %v1125_v25 = vmul.f32 -1.442695, %v819_v22 }
 0xecd   :  { %1379 = vpow2.f32 %v1125_v25 }
 0xed5   :  { %v1378_v23 = vpop.eup %1377 }
 0xed6   :  { %835 = vrot.lane.b32.xlu0 %v1378_v23, %s1404_s19 }
 0xed7   :  { %v1380_v26 = vpop.eup %1379 }
 0xed8   :  { %v823_v9 = vadd.f32 1.0, %v1380_v26 }
 0xeda   :  { %1381 = vrcp.f32 %v823_v9 }
 0xee4   :  { %v1382_v27 = vpop.eup %1381 }
 0xee5   :  { %v833_v15 = vmul.f32 %v1382_v27, %v831_v2 }
 0xf48   :  { %v836_v4 = vpop.permute.xlu0 %835 }
 0xf49   :  { %v838_v28 = vmul.f32 %v1382_v27, %v836_v4 }
 0xf4b   :  { %840 = vrot.lane.b32.xlu0 %v838_v28, %s1405_s5 }
 0xfbd   :  { %v841_v29 = vpop.permute.xlu0 %840 }
 0xfbe   :  { %v843_v30 = vadd.f32 %v841_v29, %v833_v15 }
 0xfc0   :  { %1383 = vtanh.f32 %v843_v30 }
 0xfca   :  { %v1384_v31 = vpop.eup %1383 }
 0xfcb   :  { %846 = vrot.lane.b32.xlu1 %v1384_v31, %s1404_s19 }
 0xfcf   :  { %851 = vrot.lane.b32.xlu1 %v843_v30, %s1406_s3 }
0x103d   :  { %v847_v32 = vpop.permute.xlu1 %846 }
0x103e   :  { %v849_v33 = vmul.f32 %v1382_v27, %v847_v32 }
0x1040   :  { %856 = vrot.lane.b32.xlu0 %v849_v33, %s1405_s5 }
0x1041   :  { %v852_v34 = vpop.permute.xlu1 %851 }
0x1042   :  { %854 = vst.msk [vmem:[#allocation3 - $0x2] sm:$0xc] %vm363_vm3, %v852_v34 }
0x1049   :  { %v950_v35 = vld [vmem:[#allocation3] sm:$0x3] }
0x104a   :  { %v952_v36 = vrot.slane %v950_v35, 4 }
0x104c   :  { %953 = vrot.lane.b32.xlu1 %v952_v36, %s1405_s5 }
0x10b2   :  { %v857_v37 = vpop.permute.xlu0 %856 }
0x10b3   :  { %859 = vst.msk [vmem:[#allocation2 - $0x2] sm:$0xc] %vm363_vm3, %v857_v37  ;;  %860 = vst.msk [vmem:[%s1659_s6 + $0x8] sm:$0xc] %vm363_vm3, %v857_v37 }
0x10ba   :  { %v861_v38 = vld [vmem:[#allocation2] sm:$0x3] }
0x10bb   :  { %1262 = vmatmul.mubr.msk.f32.vlgmr.msra.gmra.mrb[6].mxu1 %vm45_vm0, %v861_v38 }
0x10be   :  { %v954_v24 = vpop.permute.xlu1 %953 }
0x118e   :  { %v935_v39 = vpop.f32.mrb[6].mxu1 }
0x118f   :  { %v940_v40 = vrot.slane %v935_v39, 4  ;;  %v1263_v41 = vpop.f32.mrb[7].mxu1 }
0x1191   :  { %v942_v42 = vadd.f32 %v940_v40, %v1510_v21 }
0x1193   :  { %1385 = vtanh.f32 %v942_v42  ;;  %v1127_v44 = vmul.f32 -1.442695, %v942_v42 }
0x1195   :  { %1387 = vpow2.f32 %v1127_v44 }
0x119d   :  { %v1386_v43 = vpop.eup %1385 }
0x119e   :  { %958 = vrot.lane.b32.xlu0 %v1386_v43, %s1404_s19 }
0x119f   :  { %v1388_v45 = vpop.eup %1387 }
0x11a0   :  { %v946_v46 = vadd.f32 1.0, %v1388_v45 }
0x11a2   :  { %1389 = vrcp.f32 %v946_v46 }
0x11ac   :  { %v1390_v47 = vpop.eup %1389 }
0x11ad   :  { %v956_v50 = vmul.f32 %v1390_v47, %v954_v24 }
0x1210   :  { %v959_v48 = vpop.permute.xlu0 %958 }
0x1211   :  { %v961_v49 = vmul.f32 %v1390_v47, %v959_v48 }
0x1213   :  { %963 = vrot.lane.b32.xlu0 %v961_v49, %s1405_s5 }
0x1285   :  { %v964_v51 = vpop.permute.xlu0 %963 }
0x1286   :  { %v966_v52 = vadd.f32 %v964_v51, %v956_v50 }
0x1288   :  { %1391 = vtanh.f32 %v966_v52 }
0x1292   :  { %v1392_v53 = vpop.eup %1391 }
0x1293   :  { %969 = vrot.lane.b32.xlu1 %v1392_v53, %s1404_s19 }
0x1297   :  { %974 = vrot.lane.b32.xlu1 %v966_v52, %s1406_s3 }
0x1305   :  { %v970_v54 = vpop.permute.xlu1 %969 }
0x1306   :  { %v972_v55 = vmul.f32 %v1390_v47, %v970_v54 }
0x1308   :  { %979 = vrot.lane.b32.xlu0 %v972_v55, %s1405_s5 }
0x1309   :  { %v975_v56 = vpop.permute.xlu1 %974 }
0x130a   :  { %977 = vst.msk [vmem:[#allocation3 - $0x4] sm:$0x30] %vm487_vm4, %v975_v56 }
0x1311   :  { %v1073_v57 = vld [vmem:[#allocation3] sm:$0x3] }
0x1312   :  { %v1075_v58 = vrot.slane %v1073_v57, 2 }
0x1314   :  { %1076 = vrot.lane.b32.xlu1 %v1075_v58, %s1405_s5 }
0x137a   :  { %v980_v59 = vpop.permute.xlu0 %979 }
0x137b   :  { %982 = vst.msk [vmem:[#allocation2 - $0x4] sm:$0x30] %vm487_vm4, %v980_v59  ;;  %983 = vst.msk [vmem:[%s1659_s6 + $0x8] sm:$0x30] %vm487_vm4, %v980_v59 }
0x1382   :  { %v984_v60 = vld [vmem:[#allocation2] sm:$0x3] }
0x1383   :  { %1273 = vmatmul.mubr.msk.f32.vlgmr.msra.gmra.mrb[8].mxu0 %vm45_vm0, %v984_v60 }
0x1386   :  { %v1077_v11 = vpop.permute.xlu1 %1076 }
0x1456   :  { %v1058_v61 = vpop.f32.mrb[8].mxu0 }
0x1457   :  { %v1063_v62 = vrot.slane %v1058_v61, 2  ;;  %v1274_v63 = vpop.f32.mrb[9].mxu0 }
0x1459   :  { %v1065_v0 = vadd.f32 %v1063_v62, %v1510_v21 }
0x145b   :  { %1393 = vtanh.f32 %v1065_v0  ;;  %v1129_v3 = vmul.f32 -1.442695, %v1065_v0 }
0x145d   :  { %1395 = vpow2.f32 %v1129_v3 }
0x1465   :  { %v1394_v1 = vpop.eup %1393 }
0x1466   :  { %1081 = vrot.lane.b32.xlu0 %v1394_v1, %s1404_s19 }
0x1467   :  { %v1396_v5 = vpop.eup %1395 }
0x1468   :  { %v1069_v6 = vadd.f32 1.0, %v1396_v5 }
0x146a   :  { %1397 = vrcp.f32 %v1069_v6 }
0x1474   :  { %v1398_v7 = vpop.eup %1397 }
0x1475   :  { %v1079_v12 = vmul.f32 %v1398_v7, %v1077_v11 }
0x14d8   :  { %v1082_v8 = vpop.permute.xlu0 %1081 }
0x14d9   :  { %v1084_v10 = vmul.f32 %v1398_v7, %v1082_v8 }
0x14db   :  { %1086 = vrot.lane.b32.xlu0 %v1084_v10, %s1405_s5 }
0x154d   :  { %v1087_v13 = vpop.permute.xlu0 %1086 }
0x154e   :  { %v1089_v14 = vadd.f32 %v1087_v13, %v1079_v12 }
0x1550   :  { %1399 = vtanh.f32 %v1089_v14  ;;  %1097 = vrot.lane.b32.xlu0 %v1089_v14, %s1406_s3 }
0x155a   :  { %v1400_v21 = vpop.eup %1399 }
0x155b   :  { %1092 = vrot.lane.b32.xlu1 %v1400_v21, %s1404_s19 }
0x15c2   :  { %v1098_v16 = vpop.permute.xlu0 %1097 }
0x15c3   :  { %1100 = vst.msk [vmem:[#allocation3 - $0x6] sm:$0xc0] %vm611_vm5, %v1098_v16 }
0x15cd   :  { %v1093_v17 = vpop.permute.xlu1 %1092 }
0x15ce   :  { %v1095_v18 = vmul.f32 %v1398_v7, %v1093_v17 }
0x15d0   :  { %1102 = vrot.lane.b32.xlu1 %v1095_v18, %s1405_s5 }
0x1642   :  { %v1103_v19 = vpop.permute.xlu1 %1102 }
0x1643   :  { %1105 = vst.msk [vmem:[#allocation2 - $0x6] sm:$0xc0] %vm611_vm5, %v1103_v19  ;;  %1106 = vst.msk [vmem:[%s1659_s6 + $0x8] sm:$0xc0] %vm611_vm5, %v1103_v19 }

</bundles_post_ra>
